<compile_context>
chip_gen: v6e
topology: v6e:2x2x1
jax: 0.10.0
libtpu: 0.0.40
codegen_flags: <defaults>
</compile_context>

<pallas_src>
import math

import jax
import jax.numpy as jnp
from jax import lax
from jax.experimental import pallas as pl
from jax.experimental.pallas import tpu as pltpu


# --------------------- host-side constant-matrix builders -------------------

def _make_band(w_eff, W):
    """Banded weight slabs for a 3x3 conv (pad=1) on the (N*H, W*Cin) layout.

    Returns (3, W*Cin, W*Cout) with
      band[ky][w_in*Cin + ci, w_out*Cout + co] = w_eff[co, ci, ky, w_in-w_out+1]
    when |w_in - w_out| <= 1, else 0.
    """
    Cout, Cin = w_eff.shape[0], w_eff.shape[1]
    a = jnp.arange(W)
    k = jnp.arange(3)
    # D[k, w_in, w_out] = 1  iff  w_in == w_out + k - 1
    D = (a[None, :, None] == a[None, None, :] + k[:, None, None] - 1)
    D = D.astype(jnp.float32)
    band = jnp.einsum("kaw,oiyk->yaiwo", D, w_eff,
                      precision=lax.Precision.HIGHEST)
    return band.reshape(3, W * Cin, W * Cout)


def _even_rows_mat(R):
    """(R//2, R): [k, 2k] = 1 (select rows with even h)."""
    k = jnp.arange(R // 2)[:, None]
    r = jnp.arange(R)[None, :]
    return (r == 2 * k).astype(jnp.float32)


def _lane_sel_mat(WC, C, parity):
    """(WC, WC//2): (y @ M)[:, w2*C + c] = y[:, (2*w2 + parity)*C + c]."""
    p = jnp.arange(WC)[:, None]
    q = jnp.arange(WC // 2)[None, :]
    return (p == (2 * (q // C) + parity) * C + (q % C)).astype(jnp.float32)


def _gap_mats(Nb, H, W, C):
    """A: (Nb, Nb*H) mean over h;  B: (W*C, C) mean over w."""
    R, WC = Nb * H, W * C
    n = jnp.arange(Nb)[:, None]
    r = jnp.arange(R)[None, :]
    A = ((r // H) == n).astype(jnp.float32) / float(H)
    p = jnp.arange(WC)[:, None]
    c = jnp.arange(C)[None, :]
    B = ((p % C) == c).astype(jnp.float32) / float(W)
    return A, B


def _build_plan(conv_params, fc, Nb, H0, W0):
    """Fold BN into conv weights and build the constant operands (bf16 where
    they feed the MXU).  Returns (aux inputs, static per-step config)."""
    eps = 1e-5
    H, W = H0, W0
    stage_inputs, cfg, bias_rows = [], [], []
    for idx, p in enumerate(conv_params):
        Cout = p["w"].shape[0]
        scale = p["gamma"] / jnp.sqrt(p["var"] + eps)
        w_eff = (p["w"] * scale[:, None, None, None]).astype(jnp.float32)
        b_eff = (p["beta"] + scale * (p["b"] - p["mean"])).astype(jnp.float32)
        stage_inputs.append(_make_band(w_eff, W).astype(jnp.bfloat16))
        bias_rows.append(jnp.tile(b_eff, W))            # (W*Cout,)
        cfg.append(("conv", H, idx, W * Cout))
        if idx in (1, 3):                               # nn.MaxPool2d(2, 2)
            R, WC = Nb * H, W * Cout
            selr = _even_rows_mat(R).astype(jnp.bfloat16)
            selw = jnp.stack([_lane_sel_mat(WC, Cout, 0),
                              _lane_sel_mat(WC, Cout, 1)]).astype(jnp.bfloat16)
            stage_inputs += [selr, selw]
            cfg.append(("pool",))
            H //= 2
            W //= 2
    # Pack all folded-BN biases into one f32 slab, lane-padded to 128.
    pad_w = ((max(b.shape[0] for b in bias_rows) + 127) // 128) * 128
    bias_slab = jnp.stack(
        [jnp.pad(b, (0, pad_w - b.shape[0])) for b in bias_rows]
    ).astype(jnp.float32)                               # (6, pad_w)
    # Head: GAP-over-h matrix; GAP-over-w folded into the FC weight.
    Cf = conv_params[-1]["w"].shape[0]
    A, B = _gap_mats(Nb, H, W, Cf)
    fc_w, fc_b = fc
    folded_fc = jnp.dot(B, jnp.transpose(fc_w).astype(jnp.float32),
                        precision=lax.Precision.HIGHEST)  # (W*Cf, 10)
    stage_inputs += [A.astype(jnp.bfloat16),
                     folded_fc.astype(jnp.bfloat16),
                     fc_b.reshape(1, -1).astype(jnp.float32)]
    cfg.append(("head",))
    return [bias_slab] + stage_inputs, cfg


# ------------------------- fused Pallas forward pass -------------------------

def _fused_forward(x2d, aux, cfg, Nb, num_blocks, H0, W0C0, num_classes):
    all_inputs = [x2d] + list(aux)

    def _zero_map(nd):
        def f(i):
            return (0,) * nd
        return f

    in_specs = [pl.BlockSpec((Nb * H0, W0C0), lambda i: (i, 0))]
    in_specs += [pl.BlockSpec(a.shape, _zero_map(a.ndim)) for a in aux]
    out_spec = pl.BlockSpec((1, Nb, num_classes), lambda i: (i, 0, 0))

    def kernel(*args):
        x_ref, bias_ref, o_ref = args[0], args[1], args[-1]
        it = iter(args[2:-1])
        x = x_ref[...]                                  # (Nb*H, W*Cin) f32
        for step in cfg:
            if step[0] == "conv":
                _, H, layer, wcout = step
                band_ref = next(it)                     # (3, W*Cin, W*Cout) bf16
                R = x.shape[0]
                h = lax.broadcasted_iota(jnp.int32, (R, 1), 0) % H
                # Vertical taps: XLU sublane rolls + iota boundary masks.
                x_up = pltpu.roll(x, 1, axis=0) * (h > 0).astype(x.dtype)
                x_dn = pltpu.roll(x, R - 1, axis=0) * (h < H - 1).astype(x.dtype)
                # Three independent bf16 MXU matmuls, f32 accumulation.
                acc = jnp.dot(x.astype(jnp.bfloat16), band_ref[1],
                              preferred_element_type=jnp.float32)
                acc = acc + jnp.dot(x_up.astype(jnp.bfloat16), band_ref[0],
                                    preferred_element_type=jnp.float32)
                acc = acc + jnp.dot(x_dn.astype(jnp.bfloat16), band_ref[2],
                                    preferred_element_type=jnp.float32)
                bias = bias_ref[layer:layer + 1, 0:wcout]   # folded BN bias
                x = jnp.maximum(acc + bias, 0.0)            # f32 epilogue
            elif step[0] == "pool":
                selr_ref = next(it)                     # (R//2, R)      bf16
                selw_ref = next(it)                     # (2, WC, WC//2) bf16
                R = x.shape[0]
                # Rows: pair (h, h+1) via roll; wrapped row is never selected.
                mh = jnp.maximum(x, pltpu.roll(x, R - 1, axis=0))
                y = jnp.dot(selr_ref[...], mh.astype(jnp.bfloat16),
                            preferred_element_type=jnp.float32)
                # Lanes: independent even/odd w selections, then max.
                yb = y.astype(jnp.bfloat16)
                x = jnp.maximum(
                    jnp.dot(yb, selw_ref[0],
                            preferred_element_type=jnp.float32),
                    jnp.dot(yb, selw_ref[1],
                            preferred_element_type=jnp.float32))
            else:                                       # head: GAP + Linear
                a_ref = next(it)                        # (Nb, Nb*Hf)   bf16
                fcw_ref = next(it)                      # (Wf*Cf, 10)   bf16
                fcb_ref = next(it)                      # (1, 10)       f32
                pooled = jnp.dot(a_ref[...], x.astype(jnp.bfloat16),
                                 preferred_element_type=jnp.float32)
                o_ref[0] = (jnp.dot(pooled.astype(jnp.bfloat16), fcw_ref[...],
                                    preferred_element_type=jnp.float32)
                            + fcb_ref[...])

    return pl.pallas_call(
        kernel,
        out_shape=jax.ShapeDtypeStruct((num_blocks, Nb, num_classes),
                                       jnp.float32),
        grid_spec=pltpu.PrefetchScalarGridSpec(
            num_scalar_prefetch=0,
            grid=(num_blocks,),
            in_specs=in_specs,
            out_specs=out_spec,
        ),
        compiler_params=pltpu.CompilerParams(
            dimension_semantics=("parallel",)),
    )(*all_inputs)


def forward(x_nchw, conv_params, fc):
    N, C0, H0, W0 = x_nchw.shape
    # Split the batch into 2 grid blocks when possible: on v7x the "parallel"
    # grid axis places one block on each TensorCore; on v5e/v6e it is a cheap
    # 2-step serial loop (everything stays VMEM-resident either way).
    num_blocks = 2 if (N >= 4 and N % 2 == 0) else 1
    Nb = N // num_blocks
    # NCHW -> NHWC -> (N*H, W*C): rows = n*H + h, lanes = w*C + c.
    x2d = jnp.transpose(x_nchw, (0, 2, 3, 1)).reshape(
        N * H0, W0 * C0).astype(jnp.float32)
    aux, cfg = _build_plan(conv_params, fc, Nb, H0, W0)
    num_classes = fc[0].shape[0]
    out = _fused_forward(x2d, aux, cfg, Nb, num_blocks, H0, W0 * C0,
                         num_classes)
    return out.reshape(N, num_classes)


# --------------------------- parameter init ---------------------------------

def init_params(key):
    conv_dims = [(1, 4), (4, 8), (8, 12), (12, 24), (24, 36), (36, 24)]
    conv_params = []
    for cin, cout in conv_dims:
        key, k1, k2, k3, k4, k5, k6 = jax.random.split(key, 7)
        conv_params.append(dict(
            w=jax.random.normal(k1, (cout, cin, 3, 3), jnp.float32)
              * (1.0 / math.sqrt(9 * cin)),
            b=0.05 * jax.random.normal(k2, (cout,), jnp.float32),
            gamma=1.0 + 0.1 * jax.random.normal(k3, (cout,), jnp.float32),
            beta=0.05 * jax.random.normal(k4, (cout,), jnp.float32),
            mean=0.1 * jax.random.normal(k5, (cout,), jnp.float32),
            var=1.0 + 0.1 * jnp.abs(jax.random.normal(k6, (cout,), jnp.float32)),
        ))
    key, kw, kb = jax.random.split(key, 3)
    fc_w = jax.random.normal(kw, (10, 24), jnp.float32) * (1.0 / math.sqrt(24))
    fc_b = 0.05 * jax.random.normal(kb, (10,), jnp.float32)
    return conv_params, (fc_w, fc_b)


# ----------------------------- pure-JAX reference ---------------------------

def reference(x_nchw, conv_params, fc):
    eps = 1e-5
    x = x_nchw
    for idx, p in enumerate(conv_params):
        x = lax.conv_general_dilated(
            x, p["w"], window_strides=(1, 1), padding=((1, 1), (1, 1)),
            dimension_numbers=("NCHW", "OIHW", "NCHW"),
            precision=lax.Precision.HIGHEST)
        x = x + p["b"][None, :, None, None]
        x = (x - p["mean"][None, :, None, None]) / jnp.sqrt(
            p["var"] + eps)[None, :, None, None]
        x = x * p["gamma"][None, :, None, None] + p["beta"][None, :, None, None]
        x = jnp.maximum(x, 0.0)
        if idx in (1, 3):
            x = lax.reduce_window(x, -jnp.inf, lax.max,
                                  (1, 1, 2, 2), (1, 1, 2, 2), "VALID")
    pooled = jnp.mean(x, axis=(2, 3))
    fc_w, fc_b = fc
    return jnp.dot(pooled, fc_w.T, precision=lax.Precision.HIGHEST) + fc_b


# --------------------------------- main --------------------------------------

if __name__ == "__main__":
    key = jax.random.PRNGKey(0)
    key, kx = jax.random.split(key)
    # MNIST-like input: batch=4, 1 channel, 16x16 spatial (NCHW, like PyTorch).
    x = jax.random.normal(kx, (4, 1, 16, 16), jnp.float32)
    conv_params, fc = init_params(key)

    logits = jax.jit(forward)(x, conv_params, fc)
    jax.block_until_ready(logits)

    ref = reference(x, conv_params, fc)
    assert logits.shape == (4, 10)
    # bf16 MXU operands (with f32 accumulation) -> slightly looser tolerance
    # than the all-f32 HIGHEST-precision reference.
    assert jnp.allclose(logits, ref, atol=2e-2, rtol=2e-2), (logits, ref)

    print("KERNEL_OK")
</pallas_src>

<mosaic_0001>
module attributes {stable_mosaic.version = 11 : i64} {
  func.func @kernel(%arg0: i32, %arg1: memref<32x16xf32, #tpu.memory_space<vmem>>, %arg2: memref<6x256xf32, #tpu.memory_space<vmem>>, %arg3: memref<3x16x64xbf16, #tpu.memory_space<vmem>>, %arg4: memref<3x64x128xbf16, #tpu.memory_space<vmem>>, %arg5: memref<16x32xbf16, #tpu.memory_space<vmem>>, %arg6: memref<2x128x64xbf16, #tpu.memory_space<vmem>>, %arg7: memref<3x64x96xbf16, #tpu.memory_space<vmem>>, %arg8: memref<3x96x192xbf16, #tpu.memory_space<vmem>>, %arg9: memref<8x16xbf16, #tpu.memory_space<vmem>>, %arg10: memref<2x192x96xbf16, #tpu.memory_space<vmem>>, %arg11: memref<3x96x144xbf16, #tpu.memory_space<vmem>>, %arg12: memref<3x144x96xbf16, #tpu.memory_space<vmem>>, %arg13: memref<2x8xbf16, #tpu.memory_space<vmem>>, %arg14: memref<96x10xbf16, #tpu.memory_space<vmem>>, %arg15: memref<1x10xf32, #tpu.memory_space<vmem>>, %arg16: memref<1x2x10xf32, #tpu.memory_space<vmem>>) attributes {dimension_semantics = [#tpu.dimension_semantics<parallel>], iteration_bounds = array<i64: 2>, scalar_prefetch = 0 : i64, scratch_operands = 0 : i64, tpu.core_type = #tpu.core_type<tc>, window_params = [{transform_indices = @transform_0, window_bounds = array<i64: 32, 16>}, {pipeline_mode = #tpu.pipeline_mode<synchronous>, transform_indices = @transform_1, window_bounds = array<i64: 6, 256>}, {pipeline_mode = #tpu.pipeline_mode<synchronous>, transform_indices = @transform_2, window_bounds = array<i64: 3, 16, 64>}, {pipeline_mode = #tpu.pipeline_mode<synchronous>, transform_indices = @transform_3, window_bounds = array<i64: 3, 64, 128>}, {pipeline_mode = #tpu.pipeline_mode<synchronous>, transform_indices = @transform_4, window_bounds = array<i64: 16, 32>}, {pipeline_mode = #tpu.pipeline_mode<synchronous>, transform_indices = @transform_5, window_bounds = array<i64: 2, 128, 64>}, {pipeline_mode = #tpu.pipeline_mode<synchronous>, transform_indices = @transform_6, window_bounds = array<i64: 3, 64, 96>}, {pipeline_mode = #tpu.pipeline_mode<synchronous>, transform_indices = @transform_7, window_bounds = array<i64: 3, 96, 192>}, {pipeline_mode = #tpu.pipeline_mode<synchronous>, transform_indices = @transform_8, window_bounds = array<i64: 8, 16>}, {pipeline_mode = #tpu.pipeline_mode<synchronous>, transform_indices = @transform_9, window_bounds = array<i64: 2, 192, 96>}, {pipeline_mode = #tpu.pipeline_mode<synchronous>, transform_indices = @transform_10, window_bounds = array<i64: 3, 96, 144>}, {pipeline_mode = #tpu.pipeline_mode<synchronous>, transform_indices = @transform_11, window_bounds = array<i64: 3, 144, 96>}, {pipeline_mode = #tpu.pipeline_mode<synchronous>, transform_indices = @transform_12, window_bounds = array<i64: 2, 8>}, {pipeline_mode = #tpu.pipeline_mode<synchronous>, transform_indices = @transform_13, window_bounds = array<i64: 96, 10>}, {pipeline_mode = #tpu.pipeline_mode<synchronous>, transform_indices = @transform_14, window_bounds = array<i64: 1, 10>}, {transform_indices = @transform_15, window_bounds = array<i64: 1, 2, 10>}]} {
    %c0 = arith.constant 0 : index
    %c0_0 = arith.constant 0 : index
    %0 = vector.load %arg1[%c0, %c0_0] : memref<32x16xf32, #tpu.memory_space<vmem>>, vector<32x16xf32>
    %1 = tpu.iota {dimensions = array<i32: 0>} : vector<32x1xi32>
    %c16_i32 = arith.constant 16 : i32
    %c0_i32 = arith.constant 0 : i32
    %2 = arith.cmpi eq, %c16_i32, %c0_i32 : i32
    %c1_i32 = arith.constant 1 : i32
    %3 = arith.select %2, %c1_i32, %c16_i32 : i32
    %4 = vector.broadcast %3 : i32 to vector<32x1xi32>
    %5 = arith.remsi %1, %4 : vector<32x1xi32>
    %c0_i32_1 = arith.constant 0 : i32
    %6 = vector.broadcast %c0_i32_1 : i32 to vector<32x1xi32>
    %7 = arith.cmpi ne, %5, %6 : vector<32x1xi32>
    %c0_i32_2 = arith.constant 0 : i32
    %8 = vector.broadcast %c0_i32_2 : i32 to vector<32x1xi32>
    %9 = arith.cmpi slt, %5, %8 : vector<32x1xi32>
    %c0_i32_3 = arith.constant 0 : i32
    %10 = arith.cmpi slt, %3, %c0_i32_3 : i32
    %11 = vector.broadcast %10 : i1 to vector<32x1xi1>
    %12 = vector.broadcast %11 : vector<32x1xi1> to vector<32x1xi1>
    %13 = arith.xori %9, %12 : vector<32x1xi1>
    %14 = arith.andi %13, %7 : vector<32x1xi1>
    %15 = vector.broadcast %3 : i32 to vector<32x1xi32>
    %16 = arith.addi %5, %15 : vector<32x1xi32>
    %17 = arith.select %14, %16, %5 : vector<32x1xi1>, vector<32x1xi32>
    %c1_i32_4 = arith.constant 1 : i32
    %18 = tpu.dynamic_rotate %0 by %c1_i32_4 dim 0 : vector<32x16xf32>, i32 -> vector<32x16xf32>
    %c0_i32_5 = arith.constant 0 : i32
    %19 = vector.broadcast %c0_i32_5 : i32 to vector<32x1xi32>
    %20 = arith.cmpi sgt, %17, %19 : vector<32x1xi32>
    %21 = arith.extui %20 : vector<32x1xi1> to vector<32x1xi32>
    %22 = arith.sitofp %21 : vector<32x1xi32> to vector<32x1xf32>
    %23 = vector.broadcast %22 : vector<32x1xf32> to vector<32x16xf32>
    %24 = arith.mulf %18, %23 : vector<32x16xf32>
    %c31_i32 = arith.constant 31 : i32
    %25 = tpu.dynamic_rotate %0 by %c31_i32 dim 0 : vector<32x16xf32>, i32 -> vector<32x16xf32>
    %c15_i32 = arith.constant 15 : i32
    %26 = vector.broadcast %c15_i32 : i32 to vector<32x1xi32>
    %27 = arith.cmpi slt, %17, %26 : vector<32x1xi32>
    %28 = arith.extui %27 : vector<32x1xi1> to vector<32x1xi32>
    %29 = arith.sitofp %28 : vector<32x1xi32> to vector<32x1xf32>
    %30 = vector.broadcast %29 : vector<32x1xf32> to vector<32x16xf32>
    %31 = arith.mulf %25, %30 : vector<32x16xf32>
    %32 = arith.truncf %0 : vector<32x16xf32> to vector<32x16xbf16>
    %c1 = arith.constant 1 : index
    %c0_6 = arith.constant 0 : index
    %c0_7 = arith.constant 0 : index
    %33 = vector.load %arg3[%c1, %c0_6, %c0_7] : memref<3x16x64xbf16, #tpu.memory_space<vmem>>, vector<1x16x64xbf16>
    %34 = vector.shape_cast %33 : vector<1x16x64xbf16> to vector<16x64xbf16>
    %cst = arith.constant dense<0.000000e+00> : vector<32x64xf32>
    %35 = tpu.matmul %32, %34, %cst {dimension_numbers = #tpu.dot_dimension_numbers<[1], [0], [0], [1], [0, 0, 1, 1], [], []>} : vector<32x16xbf16>, vector<16x64xbf16>, vector<32x64xf32> -> vector<32x64xf32>
    %36 = arith.truncf %24 : vector<32x16xf32> to vector<32x16xbf16>
    %c0_8 = arith.constant 0 : index
    %c0_9 = arith.constant 0 : index
    %c0_10 = arith.constant 0 : index
    %37 = vector.load %arg3[%c0_8, %c0_9, %c0_10] : memref<3x16x64xbf16, #tpu.memory_space<vmem>>, vector<1x16x64xbf16>
    %38 = vector.shape_cast %37 : vector<1x16x64xbf16> to vector<16x64xbf16>
    %cst_11 = arith.constant dense<0.000000e+00> : vector<32x64xf32>
    %39 = tpu.matmul %36, %38, %cst_11 {dimension_numbers = #tpu.dot_dimension_numbers<[1], [0], [0], [1], [0, 0, 1, 1], [], []>} : vector<32x16xbf16>, vector<16x64xbf16>, vector<32x64xf32> -> vector<32x64xf32>
    %40 = arith.addf %35, %39 : vector<32x64xf32>
    %41 = arith.truncf %31 : vector<32x16xf32> to vector<32x16xbf16>
    %c2 = arith.constant 2 : index
    %c0_12 = arith.constant 0 : index
    %c0_13 = arith.constant 0 : index
    %42 = vector.load %arg3[%c2, %c0_12, %c0_13] : memref<3x16x64xbf16, #tpu.memory_space<vmem>>, vector<1x16x64xbf16>
    %43 = vector.shape_cast %42 : vector<1x16x64xbf16> to vector<16x64xbf16>
    %cst_14 = arith.constant dense<0.000000e+00> : vector<32x64xf32>
    %44 = tpu.matmul %41, %43, %cst_14 {dimension_numbers = #tpu.dot_dimension_numbers<[1], [0], [0], [1], [0, 0, 1, 1], [], []>} : vector<32x16xbf16>, vector<16x64xbf16>, vector<32x64xf32> -> vector<32x64xf32>
    %45 = arith.addf %40, %44 : vector<32x64xf32>
    %c0_15 = arith.constant 0 : index
    %c0_16 = arith.constant 0 : index
    %46 = vector.load %arg2[%c0_15, %c0_16] : memref<6x256xf32, #tpu.memory_space<vmem>>, vector<1x64xf32>
    %47 = vector.broadcast %46 : vector<1x64xf32> to vector<32x64xf32>
    %48 = arith.addf %45, %47 : vector<32x64xf32>
    %cst_17 = arith.constant 0.000000e+00 : f32
    %49 = vector.broadcast %cst_17 : f32 to vector<32x64xf32>
    %50 = arith.maximumf %48, %49 : vector<32x64xf32>
    %51 = tpu.iota {dimensions = array<i32: 0>} : vector<32x1xi32>
    %c16_i32_18 = arith.constant 16 : i32
    %c0_i32_19 = arith.constant 0 : i32
    %52 = arith.cmpi eq, %c16_i32_18, %c0_i32_19 : i32
    %c1_i32_20 = arith.constant 1 : i32
    %53 = arith.select %52, %c1_i32_20, %c16_i32_18 : i32
    %54 = vector.broadcast %53 : i32 to vector<32x1xi32>
    %55 = arith.remsi %51, %54 : vector<32x1xi32>
    %c0_i32_21 = arith.constant 0 : i32
    %56 = vector.broadcast %c0_i32_21 : i32 to vector<32x1xi32>
    %57 = arith.cmpi ne, %55, %56 : vector<32x1xi32>
    %c0_i32_22 = arith.constant 0 : i32
    %58 = vector.broadcast %c0_i32_22 : i32 to vector<32x1xi32>
    %59 = arith.cmpi slt, %55, %58 : vector<32x1xi32>
    %c0_i32_23 = arith.constant 0 : i32
    %60 = arith.cmpi slt, %53, %c0_i32_23 : i32
    %61 = vector.broadcast %60 : i1 to vector<32x1xi1>
    %62 = vector.broadcast %61 : vector<32x1xi1> to vector<32x1xi1>
    %63 = arith.xori %59, %62 : vector<32x1xi1>
    %64 = arith.andi %63, %57 : vector<32x1xi1>
    %65 = vector.broadcast %53 : i32 to vector<32x1xi32>
    %66 = arith.addi %55, %65 : vector<32x1xi32>
    %67 = arith.select %64, %66, %55 : vector<32x1xi1>, vector<32x1xi32>
    %c1_i32_24 = arith.constant 1 : i32
    %68 = tpu.dynamic_rotate %50 by %c1_i32_24 dim 0 : vector<32x64xf32>, i32 -> vector<32x64xf32>
    %c0_i32_25 = arith.constant 0 : i32
    %69 = vector.broadcast %c0_i32_25 : i32 to vector<32x1xi32>
    %70 = arith.cmpi sgt, %67, %69 : vector<32x1xi32>
    %71 = arith.extui %70 : vector<32x1xi1> to vector<32x1xi32>
    %72 = arith.sitofp %71 : vector<32x1xi32> to vector<32x1xf32>
    %73 = vector.broadcast %72 : vector<32x1xf32> to vector<32x64xf32>
    %74 = arith.mulf %68, %73 : vector<32x64xf32>
    %c31_i32_26 = arith.constant 31 : i32
    %75 = tpu.dynamic_rotate %50 by %c31_i32_26 dim 0 : vector<32x64xf32>, i32 -> vector<32x64xf32>
    %c15_i32_27 = arith.constant 15 : i32
    %76 = vector.broadcast %c15_i32_27 : i32 to vector<32x1xi32>
    %77 = arith.cmpi slt, %67, %76 : vector<32x1xi32>
    %78 = arith.extui %77 : vector<32x1xi1> to vector<32x1xi32>
    %79 = arith.sitofp %78 : vector<32x1xi32> to vector<32x1xf32>
    %80 = vector.broadcast %79 : vector<32x1xf32> to vector<32x64xf32>
    %81 = arith.mulf %75, %80 : vector<32x64xf32>
    %82 = arith.truncf %50 : vector<32x64xf32> to vector<32x64xbf16>
    %c1_28 = arith.constant 1 : index
    %c0_29 = arith.constant 0 : index
    %c0_30 = arith.constant 0 : index
    %83 = vector.load %arg4[%c1_28, %c0_29, %c0_30] : memref<3x64x128xbf16, #tpu.memory_space<vmem>>, vector<1x64x128xbf16>
    %84 = vector.shape_cast %83 : vector<1x64x128xbf16> to vector<64x128xbf16>
    %cst_31 = arith.constant dense<0.000000e+00> : vector<32x128xf32>
    %85 = tpu.matmul %82, %84, %cst_31 {dimension_numbers = #tpu.dot_dimension_numbers<[1], [0], [0], [1], [0, 0, 1, 1], [], []>} : vector<32x64xbf16>, vector<64x128xbf16>, vector<32x128xf32> -> vector<32x128xf32>
    %86 = arith.truncf %74 : vector<32x64xf32> to vector<32x64xbf16>
    %c0_32 = arith.constant 0 : index
    %c0_33 = arith.constant 0 : index
    %c0_34 = arith.constant 0 : index
    %87 = vector.load %arg4[%c0_32, %c0_33, %c0_34] : memref<3x64x128xbf16, #tpu.memory_space<vmem>>, vector<1x64x128xbf16>
    %88 = vector.shape_cast %87 : vector<1x64x128xbf16> to vector<64x128xbf16>
    %cst_35 = arith.constant dense<0.000000e+00> : vector<32x128xf32>
    %89 = tpu.matmul %86, %88, %cst_35 {dimension_numbers = #tpu.dot_dimension_numbers<[1], [0], [0], [1], [0, 0, 1, 1], [], []>} : vector<32x64xbf16>, vector<64x128xbf16>, vector<32x128xf32> -> vector<32x128xf32>
    %90 = arith.addf %85, %89 : vector<32x128xf32>
    %91 = arith.truncf %81 : vector<32x64xf32> to vector<32x64xbf16>
    %c2_36 = arith.constant 2 : index
    %c0_37 = arith.constant 0 : index
    %c0_38 = arith.constant 0 : index
    %92 = vector.load %arg4[%c2_36, %c0_37, %c0_38] : memref<3x64x128xbf16, #tpu.memory_space<vmem>>, vector<1x64x128xbf16>
    %93 = vector.shape_cast %92 : vector<1x64x128xbf16> to vector<64x128xbf16>
    %cst_39 = arith.constant dense<0.000000e+00> : vector<32x128xf32>
    %94 = tpu.matmul %91, %93, %cst_39 {dimension_numbers = #tpu.dot_dimension_numbers<[1], [0], [0], [1], [0, 0, 1, 1], [], []>} : vector<32x64xbf16>, vector<64x128xbf16>, vector<32x128xf32> -> vector<32x128xf32>
    %95 = arith.addf %90, %94 : vector<32x128xf32>
    %c1_40 = arith.constant 1 : index
    %c0_41 = arith.constant 0 : index
    %96 = vector.load %arg2[%c1_40, %c0_41] : memref<6x256xf32, #tpu.memory_space<vmem>>, vector<1x128xf32>
    %97 = vector.broadcast %96 : vector<1x128xf32> to vector<32x128xf32>
    %98 = arith.addf %95, %97 : vector<32x128xf32>
    %cst_42 = arith.constant 0.000000e+00 : f32
    %99 = vector.broadcast %cst_42 : f32 to vector<32x128xf32>
    %100 = arith.maximumf %98, %99 : vector<32x128xf32>
    %c31_i32_43 = arith.constant 31 : i32
    %101 = tpu.dynamic_rotate %100 by %c31_i32_43 dim 0 : vector<32x128xf32>, i32 -> vector<32x128xf32>
    %102 = arith.maximumf %100, %101 : vector<32x128xf32>
    %c0_44 = arith.constant 0 : index
    %c0_45 = arith.constant 0 : index
    %103 = vector.load %arg5[%c0_44, %c0_45] : memref<16x32xbf16, #tpu.memory_space<vmem>>, vector<16x32xbf16>
    %104 = arith.truncf %102 : vector<32x128xf32> to vector<32x128xbf16>
    %cst_46 = arith.constant dense<0.000000e+00> : vector<16x128xf32>
    %105 = tpu.matmul %103, %104, %cst_46 {dimension_numbers = #tpu.dot_dimension_numbers<[1], [0], [0], [1], [0, 0, 1, 1], [], []>} : vector<16x32xbf16>, vector<32x128xbf16>, vector<16x128xf32> -> vector<16x128xf32>
    %106 = arith.truncf %105 : vector<16x128xf32> to vector<16x128xbf16>
    %c0_47 = arith.constant 0 : index
    %c0_48 = arith.constant 0 : index
    %c0_49 = arith.constant 0 : index
    %107 = vector.load %arg6[%c0_47, %c0_48, %c0_49] : memref<2x128x64xbf16, #tpu.memory_space<vmem>>, vector<1x128x64xbf16>
    %108 = vector.shape_cast %107 : vector<1x128x64xbf16> to vector<128x64xbf16>
    %cst_50 = arith.constant dense<0.000000e+00> : vector<16x64xf32>
    %109 = tpu.matmul %106, %108, %cst_50 {dimension_numbers = #tpu.dot_dimension_numbers<[1], [0], [0], [1], [0, 0, 1, 1], [], []>} : vector<16x128xbf16>, vector<128x64xbf16>, vector<16x64xf32> -> vector<16x64xf32>
    %c1_51 = arith.constant 1 : index
    %c0_52 = arith.constant 0 : index
    %c0_53 = arith.constant 0 : index
    %110 = vector.load %arg6[%c1_51, %c0_52, %c0_53] : memref<2x128x64xbf16, #tpu.memory_space<vmem>>, vector<1x128x64xbf16>
    %111 = vector.shape_cast %110 : vector<1x128x64xbf16> to vector<128x64xbf16>
    %cst_54 = arith.constant dense<0.000000e+00> : vector<16x64xf32>
    %112 = tpu.matmul %106, %111, %cst_54 {dimension_numbers = #tpu.dot_dimension_numbers<[1], [0], [0], [1], [0, 0, 1, 1], [], []>} : vector<16x128xbf16>, vector<128x64xbf16>, vector<16x64xf32> -> vector<16x64xf32>
    %113 = arith.maximumf %109, %112 : vector<16x64xf32>
    %114 = tpu.iota {dimensions = array<i32: 0>} : vector<16x1xi32>
    %c8_i32 = arith.constant 8 : i32
    %c0_i32_55 = arith.constant 0 : i32
    %115 = arith.cmpi eq, %c8_i32, %c0_i32_55 : i32
    %c1_i32_56 = arith.constant 1 : i32
    %116 = arith.select %115, %c1_i32_56, %c8_i32 : i32
    %117 = vector.broadcast %116 : i32 to vector<16x1xi32>
    %118 = arith.remsi %114, %117 : vector<16x1xi32>
    %c0_i32_57 = arith.constant 0 : i32
    %119 = vector.broadcast %c0_i32_57 : i32 to vector<16x1xi32>
    %120 = arith.cmpi ne, %118, %119 : vector<16x1xi32>
    %c0_i32_58 = arith.constant 0 : i32
    %121 = vector.broadcast %c0_i32_58 : i32 to vector<16x1xi32>
    %122 = arith.cmpi slt, %118, %121 : vector<16x1xi32>
    %c0_i32_59 = arith.constant 0 : i32
    %123 = arith.cmpi slt, %116, %c0_i32_59 : i32
    %124 = vector.broadcast %123 : i1 to vector<16x1xi1>
    %125 = vector.broadcast %124 : vector<16x1xi1> to vector<16x1xi1>
    %126 = arith.xori %122, %125 : vector<16x1xi1>
    %127 = arith.andi %126, %120 : vector<16x1xi1>
    %128 = vector.broadcast %116 : i32 to vector<16x1xi32>
    %129 = arith.addi %118, %128 : vector<16x1xi32>
    %130 = arith.select %127, %129, %118 : vector<16x1xi1>, vector<16x1xi32>
    %c1_i32_60 = arith.constant 1 : i32
    %131 = tpu.dynamic_rotate %113 by %c1_i32_60 dim 0 : vector<16x64xf32>, i32 -> vector<16x64xf32>
    %c0_i32_61 = arith.constant 0 : i32
    %132 = vector.broadcast %c0_i32_61 : i32 to vector<16x1xi32>
    %133 = arith.cmpi sgt, %130, %132 : vector<16x1xi32>
    %134 = arith.extui %133 : vector<16x1xi1> to vector<16x1xi32>
    %135 = arith.sitofp %134 : vector<16x1xi32> to vector<16x1xf32>
    %136 = vector.broadcast %135 : vector<16x1xf32> to vector<16x64xf32>
    %137 = arith.mulf %131, %136 : vector<16x64xf32>
    %c15_i32_62 = arith.constant 15 : i32
    %138 = tpu.dynamic_rotate %113 by %c15_i32_62 dim 0 : vector<16x64xf32>, i32 -> vector<16x64xf32>
    %c7_i32 = arith.constant 7 : i32
    %139 = vector.broadcast %c7_i32 : i32 to vector<16x1xi32>
    %140 = arith.cmpi slt, %130, %139 : vector<16x1xi32>
    %141 = arith.extui %140 : vector<16x1xi1> to vector<16x1xi32>
    %142 = arith.sitofp %141 : vector<16x1xi32> to vector<16x1xf32>
    %143 = vector.broadcast %142 : vector<16x1xf32> to vector<16x64xf32>
    %144 = arith.mulf %138, %143 : vector<16x64xf32>
    %145 = arith.truncf %113 : vector<16x64xf32> to vector<16x64xbf16>
    %c1_63 = arith.constant 1 : index
    %c0_64 = arith.constant 0 : index
    %c0_65 = arith.constant 0 : index
    %146 = vector.load %arg7[%c1_63, %c0_64, %c0_65] : memref<3x64x96xbf16, #tpu.memory_space<vmem>>, vector<1x64x96xbf16>
    %147 = vector.shape_cast %146 : vector<1x64x96xbf16> to vector<64x96xbf16>
    %cst_66 = arith.constant dense<0.000000e+00> : vector<16x96xf32>
    %148 = tpu.matmul %145, %147, %cst_66 {dimension_numbers = #tpu.dot_dimension_numbers<[1], [0], [0], [1], [0, 0, 1, 1], [], []>} : vector<16x64xbf16>, vector<64x96xbf16>, vector<16x96xf32> -> vector<16x96xf32>
    %149 = arith.truncf %137 : vector<16x64xf32> to vector<16x64xbf16>
    %c0_67 = arith.constant 0 : index
    %c0_68 = arith.constant 0 : index
    %c0_69 = arith.constant 0 : index
    %150 = vector.load %arg7[%c0_67, %c0_68, %c0_69] : memref<3x64x96xbf16, #tpu.memory_space<vmem>>, vector<1x64x96xbf16>
    %151 = vector.shape_cast %150 : vector<1x64x96xbf16> to vector<64x96xbf16>
    %cst_70 = arith.constant dense<0.000000e+00> : vector<16x96xf32>
    %152 = tpu.matmul %149, %151, %cst_70 {dimension_numbers = #tpu.dot_dimension_numbers<[1], [0], [0], [1], [0, 0, 1, 1], [], []>} : vector<16x64xbf16>, vector<64x96xbf16>, vector<16x96xf32> -> vector<16x96xf32>
    %153 = arith.addf %148, %152 : vector<16x96xf32>
    %154 = arith.truncf %144 : vector<16x64xf32> to vector<16x64xbf16>
    %c2_71 = arith.constant 2 : index
    %c0_72 = arith.constant 0 : index
    %c0_73 = arith.constant 0 : index
    %155 = vector.load %arg7[%c2_71, %c0_72, %c0_73] : memref<3x64x96xbf16, #tpu.memory_space<vmem>>, vector<1x64x96xbf16>
    %156 = vector.shape_cast %155 : vector<1x64x96xbf16> to vector<64x96xbf16>
    %cst_74 = arith.constant dense<0.000000e+00> : vector<16x96xf32>
    %157 = tpu.matmul %154, %156, %cst_74 {dimension_numbers = #tpu.dot_dimension_numbers<[1], [0], [0], [1], [0, 0, 1, 1], [], []>} : vector<16x64xbf16>, vector<64x96xbf16>, vector<16x96xf32> -> vector<16x96xf32>
    %158 = arith.addf %153, %157 : vector<16x96xf32>
    %c2_75 = arith.constant 2 : index
    %c0_76 = arith.constant 0 : index
    %159 = vector.load %arg2[%c2_75, %c0_76] : memref<6x256xf32, #tpu.memory_space<vmem>>, vector<1x96xf32>
    %160 = vector.broadcast %159 : vector<1x96xf32> to vector<16x96xf32>
    %161 = arith.addf %158, %160 : vector<16x96xf32>
    %cst_77 = arith.constant 0.000000e+00 : f32
    %162 = vector.broadcast %cst_77 : f32 to vector<16x96xf32>
    %163 = arith.maximumf %161, %162 : vector<16x96xf32>
    %164 = tpu.iota {dimensions = array<i32: 0>} : vector<16x1xi32>
    %c8_i32_78 = arith.constant 8 : i32
    %c0_i32_79 = arith.constant 0 : i32
    %165 = arith.cmpi eq, %c8_i32_78, %c0_i32_79 : i32
    %c1_i32_80 = arith.constant 1 : i32
    %166 = arith.select %165, %c1_i32_80, %c8_i32_78 : i32
    %167 = vector.broadcast %166 : i32 to vector<16x1xi32>
    %168 = arith.remsi %164, %167 : vector<16x1xi32>
    %c0_i32_81 = arith.constant 0 : i32
    %169 = vector.broadcast %c0_i32_81 : i32 to vector<16x1xi32>
    %170 = arith.cmpi ne, %168, %169 : vector<16x1xi32>
    %c0_i32_82 = arith.constant 0 : i32
    %171 = vector.broadcast %c0_i32_82 : i32 to vector<16x1xi32>
    %172 = arith.cmpi slt, %168, %171 : vector<16x1xi32>
    %c0_i32_83 = arith.constant 0 : i32
    %173 = arith.cmpi slt, %166, %c0_i32_83 : i32
    %174 = vector.broadcast %173 : i1 to vector<16x1xi1>
    %175 = vector.broadcast %174 : vector<16x1xi1> to vector<16x1xi1>
    %176 = arith.xori %172, %175 : vector<16x1xi1>
    %177 = arith.andi %176, %170 : vector<16x1xi1>
    %178 = vector.broadcast %166 : i32 to vector<16x1xi32>
    %179 = arith.addi %168, %178 : vector<16x1xi32>
    %180 = arith.select %177, %179, %168 : vector<16x1xi1>, vector<16x1xi32>
    %c1_i32_84 = arith.constant 1 : i32
    %181 = tpu.dynamic_rotate %163 by %c1_i32_84 dim 0 : vector<16x96xf32>, i32 -> vector<16x96xf32>
    %c0_i32_85 = arith.constant 0 : i32
    %182 = vector.broadcast %c0_i32_85 : i32 to vector<16x1xi32>
    %183 = arith.cmpi sgt, %180, %182 : vector<16x1xi32>
    %184 = arith.extui %183 : vector<16x1xi1> to vector<16x1xi32>
    %185 = arith.sitofp %184 : vector<16x1xi32> to vector<16x1xf32>
    %186 = vector.broadcast %185 : vector<16x1xf32> to vector<16x96xf32>
    %187 = arith.mulf %181, %186 : vector<16x96xf32>
    %c15_i32_86 = arith.constant 15 : i32
    %188 = tpu.dynamic_rotate %163 by %c15_i32_86 dim 0 : vector<16x96xf32>, i32 -> vector<16x96xf32>
    %c7_i32_87 = arith.constant 7 : i32
    %189 = vector.broadcast %c7_i32_87 : i32 to vector<16x1xi32>
    %190 = arith.cmpi slt, %180, %189 : vector<16x1xi32>
    %191 = arith.extui %190 : vector<16x1xi1> to vector<16x1xi32>
    %192 = arith.sitofp %191 : vector<16x1xi32> to vector<16x1xf32>
    %193 = vector.broadcast %192 : vector<16x1xf32> to vector<16x96xf32>
    %194 = arith.mulf %188, %193 : vector<16x96xf32>
    %195 = arith.truncf %163 : vector<16x96xf32> to vector<16x96xbf16>
    %c1_88 = arith.constant 1 : index
    %c0_89 = arith.constant 0 : index
    %c0_90 = arith.constant 0 : index
    %196 = vector.load %arg8[%c1_88, %c0_89, %c0_90] : memref<3x96x192xbf16, #tpu.memory_space<vmem>>, vector<1x96x192xbf16>
    %197 = vector.shape_cast %196 : vector<1x96x192xbf16> to vector<96x192xbf16>
    %cst_91 = arith.constant dense<0.000000e+00> : vector<16x192xf32>
    %198 = tpu.matmul %195, %197, %cst_91 {dimension_numbers = #tpu.dot_dimension_numbers<[1], [0], [0], [1], [0, 0, 1, 1], [], []>} : vector<16x96xbf16>, vector<96x192xbf16>, vector<16x192xf32> -> vector<16x192xf32>
    %199 = arith.truncf %187 : vector<16x96xf32> to vector<16x96xbf16>
    %c0_92 = arith.constant 0 : index
    %c0_93 = arith.constant 0 : index
    %c0_94 = arith.constant 0 : index
    %200 = vector.load %arg8[%c0_92, %c0_93, %c0_94] : memref<3x96x192xbf16, #tpu.memory_space<vmem>>, vector<1x96x192xbf16>
    %201 = vector.shape_cast %200 : vector<1x96x192xbf16> to vector<96x192xbf16>
    %cst_95 = arith.constant dense<0.000000e+00> : vector<16x192xf32>
    %202 = tpu.matmul %199, %201, %cst_95 {dimension_numbers = #tpu.dot_dimension_numbers<[1], [0], [0], [1], [0, 0, 1, 1], [], []>} : vector<16x96xbf16>, vector<96x192xbf16>, vector<16x192xf32> -> vector<16x192xf32>
    %203 = arith.addf %198, %202 : vector<16x192xf32>
    %204 = arith.truncf %194 : vector<16x96xf32> to vector<16x96xbf16>
    %c2_96 = arith.constant 2 : index
    %c0_97 = arith.constant 0 : index
    %c0_98 = arith.constant 0 : index
    %205 = vector.load %arg8[%c2_96, %c0_97, %c0_98] : memref<3x96x192xbf16, #tpu.memory_space<vmem>>, vector<1x96x192xbf16>
    %206 = vector.shape_cast %205 : vector<1x96x192xbf16> to vector<96x192xbf16>
    %cst_99 = arith.constant dense<0.000000e+00> : vector<16x192xf32>
    %207 = tpu.matmul %204, %206, %cst_99 {dimension_numbers = #tpu.dot_dimension_numbers<[1], [0], [0], [1], [0, 0, 1, 1], [], []>} : vector<16x96xbf16>, vector<96x192xbf16>, vector<16x192xf32> -> vector<16x192xf32>
    %208 = arith.addf %203, %207 : vector<16x192xf32>
    %c3 = arith.constant 3 : index
    %c0_100 = arith.constant 0 : index
    %209 = vector.load %arg2[%c3, %c0_100] : memref<6x256xf32, #tpu.memory_space<vmem>>, vector<1x192xf32>
    %210 = vector.broadcast %209 : vector<1x192xf32> to vector<16x192xf32>
    %211 = arith.addf %208, %210 : vector<16x192xf32>
    %cst_101 = arith.constant 0.000000e+00 : f32
    %212 = vector.broadcast %cst_101 : f32 to vector<16x192xf32>
    %213 = arith.maximumf %211, %212 : vector<16x192xf32>
    %c15_i32_102 = arith.constant 15 : i32
    %214 = tpu.dynamic_rotate %213 by %c15_i32_102 dim 0 : vector<16x192xf32>, i32 -> vector<16x192xf32>
    %215 = arith.maximumf %213, %214 : vector<16x192xf32>
    %c0_103 = arith.constant 0 : index
    %c0_104 = arith.constant 0 : index
    %216 = vector.load %arg9[%c0_103, %c0_104] : memref<8x16xbf16, #tpu.memory_space<vmem>>, vector<8x16xbf16>
    %217 = arith.truncf %215 : vector<16x192xf32> to vector<16x192xbf16>
    %cst_105 = arith.constant dense<0.000000e+00> : vector<8x192xf32>
    %218 = tpu.matmul %216, %217, %cst_105 {dimension_numbers = #tpu.dot_dimension_numbers<[1], [0], [0], [1], [0, 0, 1, 1], [], []>} : vector<8x16xbf16>, vector<16x192xbf16>, vector<8x192xf32> -> vector<8x192xf32>
    %219 = arith.truncf %218 : vector<8x192xf32> to vector<8x192xbf16>
    %c0_106 = arith.constant 0 : index
    %c0_107 = arith.constant 0 : index
    %c0_108 = arith.constant 0 : index
    %220 = vector.load %arg10[%c0_106, %c0_107, %c0_108] : memref<2x192x96xbf16, #tpu.memory_space<vmem>>, vector<1x192x96xbf16>
    %221 = vector.shape_cast %220 : vector<1x192x96xbf16> to vector<192x96xbf16>
    %cst_109 = arith.constant dense<0.000000e+00> : vector<8x96xf32>
    %222 = tpu.matmul %219, %221, %cst_109 {dimension_numbers = #tpu.dot_dimension_numbers<[1], [0], [0], [1], [0, 0, 1, 1], [], []>} : vector<8x192xbf16>, vector<192x96xbf16>, vector<8x96xf32> -> vector<8x96xf32>
    %c1_110 = arith.constant 1 : index
    %c0_111 = arith.constant 0 : index
    %c0_112 = arith.constant 0 : index
    %223 = vector.load %arg10[%c1_110, %c0_111, %c0_112] : memref<2x192x96xbf16, #tpu.memory_space<vmem>>, vector<1x192x96xbf16>
    %224 = vector.shape_cast %223 : vector<1x192x96xbf16> to vector<192x96xbf16>
    %cst_113 = arith.constant dense<0.000000e+00> : vector<8x96xf32>
    %225 = tpu.matmul %219, %224, %cst_113 {dimension_numbers = #tpu.dot_dimension_numbers<[1], [0], [0], [1], [0, 0, 1, 1], [], []>} : vector<8x192xbf16>, vector<192x96xbf16>, vector<8x96xf32> -> vector<8x96xf32>
    %226 = arith.maximumf %222, %225 : vector<8x96xf32>
    %227 = tpu.iota {dimensions = array<i32: 0>} : vector<8x1xi32>
    %c4_i32 = arith.constant 4 : i32
    %c0_i32_114 = arith.constant 0 : i32
    %228 = arith.cmpi eq, %c4_i32, %c0_i32_114 : i32
    %c1_i32_115 = arith.constant 1 : i32
    %229 = arith.select %228, %c1_i32_115, %c4_i32 : i32
    %230 = vector.broadcast %229 : i32 to vector<8x1xi32>
    %231 = arith.remsi %227, %230 : vector<8x1xi32>
    %c0_i32_116 = arith.constant 0 : i32
    %232 = vector.broadcast %c0_i32_116 : i32 to vector<8x1xi32>
    %233 = arith.cmpi ne, %231, %232 : vector<8x1xi32>
    %c0_i32_117 = arith.constant 0 : i32
    %234 = vector.broadcast %c0_i32_117 : i32 to vector<8x1xi32>
    %235 = arith.cmpi slt, %231, %234 : vector<8x1xi32>
    %c0_i32_118 = arith.constant 0 : i32
    %236 = arith.cmpi slt, %229, %c0_i32_118 : i32
    %237 = vector.broadcast %236 : i1 to vector<8x1xi1>
    %238 = vector.broadcast %237 : vector<8x1xi1> to vector<8x1xi1>
    %239 = arith.xori %235, %238 : vector<8x1xi1>
    %240 = arith.andi %239, %233 : vector<8x1xi1>
    %241 = vector.broadcast %229 : i32 to vector<8x1xi32>
    %242 = arith.addi %231, %241 : vector<8x1xi32>
    %243 = arith.select %240, %242, %231 : vector<8x1xi1>, vector<8x1xi32>
    %c1_i32_119 = arith.constant 1 : i32
    %244 = tpu.dynamic_rotate %226 by %c1_i32_119 dim 0 : vector<8x96xf32>, i32 -> vector<8x96xf32>
    %c0_i32_120 = arith.constant 0 : i32
    %245 = vector.broadcast %c0_i32_120 : i32 to vector<8x1xi32>
    %246 = arith.cmpi sgt, %243, %245 : vector<8x1xi32>
    %247 = arith.extui %246 : vector<8x1xi1> to vector<8x1xi32>
    %248 = arith.sitofp %247 : vector<8x1xi32> to vector<8x1xf32>
    %249 = vector.broadcast %248 : vector<8x1xf32> to vector<8x96xf32>
    %250 = arith.mulf %244, %249 : vector<8x96xf32>
    %c7_i32_121 = arith.constant 7 : i32
    %251 = tpu.dynamic_rotate %226 by %c7_i32_121 dim 0 : vector<8x96xf32>, i32 -> vector<8x96xf32>
    %c3_i32 = arith.constant 3 : i32
    %252 = vector.broadcast %c3_i32 : i32 to vector<8x1xi32>
    %253 = arith.cmpi slt, %243, %252 : vector<8x1xi32>
    %254 = arith.extui %253 : vector<8x1xi1> to vector<8x1xi32>
    %255 = arith.sitofp %254 : vector<8x1xi32> to vector<8x1xf32>
    %256 = vector.broadcast %255 : vector<8x1xf32> to vector<8x96xf32>
    %257 = arith.mulf %251, %256 : vector<8x96xf32>
    %258 = arith.truncf %226 : vector<8x96xf32> to vector<8x96xbf16>
    %c1_122 = arith.constant 1 : index
    %c0_123 = arith.constant 0 : index
    %c0_124 = arith.constant 0 : index
    %259 = vector.load %arg11[%c1_122, %c0_123, %c0_124] : memref<3x96x144xbf16, #tpu.memory_space<vmem>>, vector<1x96x144xbf16>
    %260 = vector.shape_cast %259 : vector<1x96x144xbf16> to vector<96x144xbf16>
    %cst_125 = arith.constant dense<0.000000e+00> : vector<8x144xf32>
    %261 = tpu.matmul %258, %260, %cst_125 {dimension_numbers = #tpu.dot_dimension_numbers<[1], [0], [0], [1], [0, 0, 1, 1], [], []>} : vector<8x96xbf16>, vector<96x144xbf16>, vector<8x144xf32> -> vector<8x144xf32>
    %262 = arith.truncf %250 : vector<8x96xf32> to vector<8x96xbf16>
    %c0_126 = arith.constant 0 : index
    %c0_127 = arith.constant 0 : index
    %c0_128 = arith.constant 0 : index
    %263 = vector.load %arg11[%c0_126, %c0_127, %c0_128] : memref<3x96x144xbf16, #tpu.memory_space<vmem>>, vector<1x96x144xbf16>
    %264 = vector.shape_cast %263 : vector<1x96x144xbf16> to vector<96x144xbf16>
    %cst_129 = arith.constant dense<0.000000e+00> : vector<8x144xf32>
    %265 = tpu.matmul %262, %264, %cst_129 {dimension_numbers = #tpu.dot_dimension_numbers<[1], [0], [0], [1], [0, 0, 1, 1], [], []>} : vector<8x96xbf16>, vector<96x144xbf16>, vector<8x144xf32> -> vector<8x144xf32>
    %266 = arith.addf %261, %265 : vector<8x144xf32>
    %267 = arith.truncf %257 : vector<8x96xf32> to vector<8x96xbf16>
    %c2_130 = arith.constant 2 : index
    %c0_131 = arith.constant 0 : index
    %c0_132 = arith.constant 0 : index
    %268 = vector.load %arg11[%c2_130, %c0_131, %c0_132] : memref<3x96x144xbf16, #tpu.memory_space<vmem>>, vector<1x96x144xbf16>
    %269 = vector.shape_cast %268 : vector<1x96x144xbf16> to vector<96x144xbf16>
    %cst_133 = arith.constant dense<0.000000e+00> : vector<8x144xf32>
    %270 = tpu.matmul %267, %269, %cst_133 {dimension_numbers = #tpu.dot_dimension_numbers<[1], [0], [0], [1], [0, 0, 1, 1], [], []>} : vector<8x96xbf16>, vector<96x144xbf16>, vector<8x144xf32> -> vector<8x144xf32>
    %271 = arith.addf %266, %270 : vector<8x144xf32>
    %c4 = arith.constant 4 : index
    %c0_134 = arith.constant 0 : index
    %272 = vector.load %arg2[%c4, %c0_134] : memref<6x256xf32, #tpu.memory_space<vmem>>, vector<1x144xf32>
    %273 = vector.broadcast %272 : vector<1x144xf32> to vector<8x144xf32>
    %274 = arith.addf %271, %273 : vector<8x144xf32>
    %cst_135 = arith.constant 0.000000e+00 : f32
    %275 = vector.broadcast %cst_135 : f32 to vector<8x144xf32>
    %276 = arith.maximumf %274, %275 : vector<8x144xf32>
    %277 = tpu.iota {dimensions = array<i32: 0>} : vector<8x1xi32>
    %c4_i32_136 = arith.constant 4 : i32
    %c0_i32_137 = arith.constant 0 : i32
    %278 = arith.cmpi eq, %c4_i32_136, %c0_i32_137 : i32
    %c1_i32_138 = arith.constant 1 : i32
    %279 = arith.select %278, %c1_i32_138, %c4_i32_136 : i32
    %280 = vector.broadcast %279 : i32 to vector<8x1xi32>
    %281 = arith.remsi %277, %280 : vector<8x1xi32>
    %c0_i32_139 = arith.constant 0 : i32
    %282 = vector.broadcast %c0_i32_139 : i32 to vector<8x1xi32>
    %283 = arith.cmpi ne, %281, %282 : vector<8x1xi32>
    %c0_i32_140 = arith.constant 0 : i32
    %284 = vector.broadcast %c0_i32_140 : i32 to vector<8x1xi32>
    %285 = arith.cmpi slt, %281, %284 : vector<8x1xi32>
    %c0_i32_141 = arith.constant 0 : i32
    %286 = arith.cmpi slt, %279, %c0_i32_141 : i32
    %287 = vector.broadcast %286 : i1 to vector<8x1xi1>
    %288 = vector.broadcast %287 : vector<8x1xi1> to vector<8x1xi1>
    %289 = arith.xori %285, %288 : vector<8x1xi1>
    %290 = arith.andi %289, %283 : vector<8x1xi1>
    %291 = vector.broadcast %279 : i32 to vector<8x1xi32>
    %292 = arith.addi %281, %291 : vector<8x1xi32>
    %293 = arith.select %290, %292, %281 : vector<8x1xi1>, vector<8x1xi32>
    %c1_i32_142 = arith.constant 1 : i32
    %294 = tpu.dynamic_rotate %276 by %c1_i32_142 dim 0 : vector<8x144xf32>, i32 -> vector<8x144xf32>
    %c0_i32_143 = arith.constant 0 : i32
    %295 = vector.broadcast %c0_i32_143 : i32 to vector<8x1xi32>
    %296 = arith.cmpi sgt, %293, %295 : vector<8x1xi32>
    %297 = arith.extui %296 : vector<8x1xi1> to vector<8x1xi32>
    %298 = arith.sitofp %297 : vector<8x1xi32> to vector<8x1xf32>
    %299 = vector.broadcast %298 : vector<8x1xf32> to vector<8x144xf32>
    %300 = arith.mulf %294, %299 : vector<8x144xf32>
    %c7_i32_144 = arith.constant 7 : i32
    %301 = tpu.dynamic_rotate %276 by %c7_i32_144 dim 0 : vector<8x144xf32>, i32 -> vector<8x144xf32>
    %c3_i32_145 = arith.constant 3 : i32
    %302 = vector.broadcast %c3_i32_145 : i32 to vector<8x1xi32>
    %303 = arith.cmpi slt, %293, %302 : vector<8x1xi32>
    %304 = arith.extui %303 : vector<8x1xi1> to vector<8x1xi32>
    %305 = arith.sitofp %304 : vector<8x1xi32> to vector<8x1xf32>
    %306 = vector.broadcast %305 : vector<8x1xf32> to vector<8x144xf32>
    %307 = arith.mulf %301, %306 : vector<8x144xf32>
    %308 = arith.truncf %276 : vector<8x144xf32> to vector<8x144xbf16>
    %c1_146 = arith.constant 1 : index
    %c0_147 = arith.constant 0 : index
    %c0_148 = arith.constant 0 : index
    %309 = vector.load %arg12[%c1_146, %c0_147, %c0_148] : memref<3x144x96xbf16, #tpu.memory_space<vmem>>, vector<1x144x96xbf16>
    %310 = vector.shape_cast %309 : vector<1x144x96xbf16> to vector<144x96xbf16>
    %cst_149 = arith.constant dense<0.000000e+00> : vector<8x96xf32>
    %311 = tpu.matmul %308, %310, %cst_149 {dimension_numbers = #tpu.dot_dimension_numbers<[1], [0], [0], [1], [0, 0, 1, 1], [], []>} : vector<8x144xbf16>, vector<144x96xbf16>, vector<8x96xf32> -> vector<8x96xf32>
    %312 = arith.truncf %300 : vector<8x144xf32> to vector<8x144xbf16>
    %c0_150 = arith.constant 0 : index
    %c0_151 = arith.constant 0 : index
    %c0_152 = arith.constant 0 : index
    %313 = vector.load %arg12[%c0_150, %c0_151, %c0_152] : memref<3x144x96xbf16, #tpu.memory_space<vmem>>, vector<1x144x96xbf16>
    %314 = vector.shape_cast %313 : vector<1x144x96xbf16> to vector<144x96xbf16>
    %cst_153 = arith.constant dense<0.000000e+00> : vector<8x96xf32>
    %315 = tpu.matmul %312, %314, %cst_153 {dimension_numbers = #tpu.dot_dimension_numbers<[1], [0], [0], [1], [0, 0, 1, 1], [], []>} : vector<8x144xbf16>, vector<144x96xbf16>, vector<8x96xf32> -> vector<8x96xf32>
    %316 = arith.addf %311, %315 : vector<8x96xf32>
    %317 = arith.truncf %307 : vector<8x144xf32> to vector<8x144xbf16>
    %c2_154 = arith.constant 2 : index
    %c0_155 = arith.constant 0 : index
    %c0_156 = arith.constant 0 : index
    %318 = vector.load %arg12[%c2_154, %c0_155, %c0_156] : memref<3x144x96xbf16, #tpu.memory_space<vmem>>, vector<1x144x96xbf16>
    %319 = vector.shape_cast %318 : vector<1x144x96xbf16> to vector<144x96xbf16>
    %cst_157 = arith.constant dense<0.000000e+00> : vector<8x96xf32>
    %320 = tpu.matmul %317, %319, %cst_157 {dimension_numbers = #tpu.dot_dimension_numbers<[1], [0], [0], [1], [0, 0, 1, 1], [], []>} : vector<8x144xbf16>, vector<144x96xbf16>, vector<8x96xf32> -> vector<8x96xf32>
    %321 = arith.addf %316, %320 : vector<8x96xf32>
    %c5 = arith.constant 5 : index
    %c0_158 = arith.constant 0 : index
    %322 = vector.load %arg2[%c5, %c0_158] : memref<6x256xf32, #tpu.memory_space<vmem>>, vector<1x96xf32>
    %323 = vector.broadcast %322 : vector<1x96xf32> to vector<8x96xf32>
    %324 = arith.addf %321, %323 : vector<8x96xf32>
    %cst_159 = arith.constant 0.000000e+00 : f32
    %325 = vector.broadcast %cst_159 : f32 to vector<8x96xf32>
    %326 = arith.maximumf %324, %325 : vector<8x96xf32>
    %c0_160 = arith.constant 0 : index
    %c0_161 = arith.constant 0 : index
    %327 = vector.load %arg13[%c0_160, %c0_161] : memref<2x8xbf16, #tpu.memory_space<vmem>>, vector<2x8xbf16>
    %328 = arith.truncf %326 : vector<8x96xf32> to vector<8x96xbf16>
    %cst_162 = arith.constant dense<0.000000e+00> : vector<2x96xf32>
    %329 = tpu.matmul %327, %328, %cst_162 {dimension_numbers = #tpu.dot_dimension_numbers<[1], [0], [0], [1], [0, 0, 1, 1], [], []>} : vector<2x8xbf16>, vector<8x96xbf16>, vector<2x96xf32> -> vector<2x96xf32>
    %330 = arith.truncf %329 : vector<2x96xf32> to vector<2x96xbf16>
    %c0_163 = arith.constant 0 : index
    %c0_164 = arith.constant 0 : index
    %331 = vector.load %arg14[%c0_163, %c0_164] : memref<96x10xbf16, #tpu.memory_space<vmem>>, vector<96x10xbf16>
    %cst_165 = arith.constant dense<0.000000e+00> : vector<2x10xf32>
    %332 = tpu.matmul %330, %331, %cst_165 {dimension_numbers = #tpu.dot_dimension_numbers<[1], [0], [0], [1], [0, 0, 1, 1], [], []>} : vector<2x96xbf16>, vector<96x10xbf16>, vector<2x10xf32> -> vector<2x10xf32>
    %c0_166 = arith.constant 0 : index
    %c0_167 = arith.constant 0 : index
    %333 = vector.load %arg15[%c0_166, %c0_167] : memref<1x10xf32, #tpu.memory_space<vmem>>, vector<1x10xf32>
    %334 = vector.broadcast %333 : vector<1x10xf32> to vector<2x10xf32>
    %335 = arith.addf %332, %334 : vector<2x10xf32>
    %c0_168 = arith.constant 0 : index
    %c0_169 = arith.constant 0 : index
    %c0_170 = arith.constant 0 : index
    %336 = vector.load %arg16[%c0_168, %c0_169, %c0_170] : memref<1x2x10xf32, #tpu.memory_space<vmem>>, vector<1x2x10xf32>
    %337 = vector.shape_cast %336 : vector<1x2x10xf32> to vector<2x10xf32>
    %338 = vector.shape_cast %335 : vector<2x10xf32> to vector<1x2x10xf32>
    tpu.vector_store %arg16[%c0_168, %c0_169, %c0_170], %338 {strides = array<i32>} : memref<1x2x10xf32, #tpu.memory_space<vmem>>, vector<1x2x10xf32>,
    return
  }
  func.func @transform_0(%arg0: i32) -> (i32, i32) {
    %c0_i32 = arith.constant 0 : i32
    %c0_i32_0 = arith.constant 0 : i32
    return %arg0, %c0_i32 : i32, i32
  }
  func.func @transform_1(%arg0: i32) -> (i32, i32) {
    %c0_i32 = arith.constant 0 : i32
    %c0_i32_0 = arith.constant 0 : i32
    %c0_i32_1 = arith.constant 0 : i32
    return %c0_i32, %c0_i32_0 : i32, i32
  }
  func.func @transform_2(%arg0: i32) -> (i32, i32, i32) {
    %c0_i32 = arith.constant 0 : i32
    %c0_i32_0 = arith.constant 0 : i32
    %c0_i32_1 = arith.constant 0 : i32
    %c0_i32_2 = arith.constant 0 : i32
    return %c0_i32, %c0_i32_0, %c0_i32_1 : i32, i32, i32
  }
  func.func @transform_3(%arg0: i32) -> (i32, i32, i32) {
    %c0_i32 = arith.constant 0 : i32
    %c0_i32_0 = arith.constant 0 : i32
    %c0_i32_1 = arith.constant 0 : i32
    %c0_i32_2 = arith.constant 0 : i32
    return %c0_i32, %c0_i32_0, %c0_i32_1 : i32, i32, i32
  }
  func.func @transform_4(%arg0: i32) -> (i32, i32) {
    %c0_i32 = arith.constant 0 : i32
    %c0_i32_0 = arith.constant 0 : i32
    %c0_i32_1 = arith.constant 0 : i32
    return %c0_i32, %c0_i32_0 : i32, i32
  }
  func.func @transform_5(%arg0: i32) -> (i32, i32, i32) {
    %c0_i32 = arith.constant 0 : i32
    %c0_i32_0 = arith.constant 0 : i32
    %c0_i32_1 = arith.constant 0 : i32
    %c0_i32_2 = arith.constant 0 : i32
    return %c0_i32, %c0_i32_0, %c0_i32_1 : i32, i32, i32
  }
  func.func @transform_6(%arg0: i32) -> (i32, i32, i32) {
    %c0_i32 = arith.constant 0 : i32
    %c0_i32_0 = arith.constant 0 : i32
    %c0_i32_1 = arith.constant 0 : i32
    %c0_i32_2 = arith.constant 0 : i32
    return %c0_i32, %c0_i32_0, %c0_i32_1 : i32, i32, i32
  }
  func.func @transform_7(%arg0: i32) -> (i32, i32, i32) {
    %c0_i32 = arith.constant 0 : i32
    %c0_i32_0 = arith.constant 0 : i32
    %c0_i32_1 = arith.constant 0 : i32
    %c0_i32_2 = arith.constant 0 : i32
    return %c0_i32, %c0_i32_0, %c0_i32_1 : i32, i32, i32
  }
  func.func @transform_8(%arg0: i32) -> (i32, i32) {
    %c0_i32 = arith.constant 0 : i32
    %c0_i32_0 = arith.constant 0 : i32
    %c0_i32_1 = arith.constant 0 : i32
    return %c0_i32, %c0_i32_0 : i32, i32
  }
  func.func @transform_9(%arg0: i32) -> (i32, i32, i32) {
    %c0_i32 = arith.constant 0 : i32
    %c0_i32_0 = arith.constant 0 : i32
    %c0_i32_1 = arith.constant 0 : i32
    %c0_i32_2 = arith.constant 0 : i32
    return %c0_i32, %c0_i32_0, %c0_i32_1 : i32, i32, i32
  }
  func.func @transform_10(%arg0: i32) -> (i32, i32, i32) {
    %c0_i32 = arith.constant 0 : i32
    %c0_i32_0 = arith.constant 0 : i32
    %c0_i32_1 = arith.constant 0 : i32
    %c0_i32_2 = arith.constant 0 : i32
    return %c0_i32, %c0_i32_0, %c0_i32_1 : i32, i32, i32
  }
  func.func @transform_11(%arg0: i32) -> (i32, i32, i32) {
    %c0_i32 = arith.constant 0 : i32
    %c0_i32_0 = arith.constant 0 : i32
    %c0_i32_1 = arith.constant 0 : i32
    %c0_i32_2 = arith.constant 0 : i32
    return %c0_i32, %c0_i32_0, %c0_i32_1 : i32, i32, i32
  }
  func.func @transform_12(%arg0: i32) -> (i32, i32) {
    %c0_i32 = arith.constant 0 : i32
    %c0_i32_0 = arith.constant 0 : i32
    %c0_i32_1 = arith.constant 0 : i32
    return %c0_i32, %c0_i32_0 : i32, i32
  }
  func.func @transform_13(%arg0: i32) -> (i32, i32) {
    %c0_i32 = arith.constant 0 : i32
    %c0_i32_0 = arith.constant 0 : i32
    %c0_i32_1 = arith.constant 0 : i32
    return %c0_i32, %c0_i32_0 : i32, i32
  }
  func.func @transform_14(%arg0: i32) -> (i32, i32) {
    %c0_i32 = arith.constant 0 : i32
    %c0_i32_0 = arith.constant 0 : i32
    %c0_i32_1 = arith.constant 0 : i32
    return %c0_i32, %c0_i32_0 : i32, i32
  }
  func.func @transform_15(%arg0: i32) -> (i32, i32, i32) {
    %c0_i32 = arith.constant 0 : i32
    %c0_i32_0 = arith.constant 0 : i32
    %c0_i32_1 = arith.constant 0 : i32
    return %arg0, %c0_i32, %c0_i32_0 : i32, i32, i32
  }
}

</mosaic_0001>

<bundles_post_ra>
// kernel: tile.33
= control target key start
LH: loop header
LB: loop body
LE: loop exit
PB: predicated region body
PF: predicated region fallthrough
CT: control target
= control target key end

     0   :  { %s28_s0 = inlined_call_operand.vmem [shape: f32[4], index: 0, kind: input, shape index: {}]   ;;  %s29_s1 = inlined_call_operand.vmem [shape: f32[16,4], index: 1, kind: output, shape index: {}]  }
   0x1   :  { %v4_v0 = vld [vmem:[%s28_s0] ss:$0 sm:$0xff] }
   0x2   :  { %5 = vst [vmem:[%s29_s1] sm:$0xff] %v4_v0  ;;  %8 = vst [vmem:[%s29_s1 + $0x8] sm:$0xff] %v4_v0 }

// kernel: tile.34
= control target key start
LH: loop header
LB: loop body
LE: loop exit
PB: predicated region body
PF: predicated region fallthrough
CT: control target
= control target key end

     0   :  { %s133_s10 = smov 60   ;;  %s134_s11 = smov 52   ;;  %vm3_vm0 = vcmask 31744   ;;  %vm9_vm1 = vcmask 523744   ;;  %vm15_vm2 = vcmask 490944   ;;  %vm21_vm3 = vcmask 458144   ;;  %s209_s0 = inlined_call_operand.vmem [shape: f32[16,4], index: 0, kind: input, shape index: {}]   ;;  %s210_s1 = inlined_call_operand.vmem [shape: f32[64], index: 1, kind: output, shape index: {}]  }
   0x1   :  { %v103_v0 = vld [vmem:[%s209_s0 + $0xf] sm:$0x1]   ;;  %v105_v1 = vld [vmem:[%s209_s0 + $0xd] sm:$0x1]   ;;  %v104_v2 = vld [vmem:[%s209_s0 + $0xe] sm:$0x1]  }
   0x2   :  { %7 = vrot.lane.b32.xlu0 %v103_v0, %s133_s10  ;;  %19 = vrot.lane.b32.xlu1 %v105_v1, %s134_s11  ;;  %v106_v3 = vld [vmem:[%s209_s0 + $0xc] sm:$0x1]   ;;  %s135_s16 = smov 56   ;;  %s136_s17 = smov 48   ;;  %v107_v4 = vld [vmem:[%s209_s0 + $0xb] sm:$0x1]  }
   0x3   :  { %v108_v5 = vld [vmem:[%s209_s0 + $0xa] sm:$0x1]   ;;  %v2_v6 = vld [vmem:[%s209_s0] sm:$0x1]   ;;  %s137_s24 = smov 44   ;;  %s138_s25 = smov 40  }
   0x4   :  { %4 = vst.msk [vmem:[#allocation0] sm:$0x1] %vm3_vm0, %v2_v6   ;;  %v109_v7 = vld [vmem:[%s209_s0 + $0x9] sm:$0x1]   ;;  %v110_v8 = vld [vmem:[%s209_s0 + $0x8] sm:$0x1]  }
   0x5   :  { %s139_s30 = smov 36   ;;  %s140_s2 = smov 32   ;;  %v111_v9 = vld [vmem:[%s209_s0 + $0x7] sm:$0x1]   ;;  %v112_v10 = vld [vmem:[%s209_s0 + $0x6] sm:$0x1]  }
   0x6   :  { %13 = vrot.lane.b32.xlu0 %v104_v2, %s135_s16  ;;  %25 = vrot.lane.b32.xlu1 %v106_v3, %s136_s17  ;;  %s141_s7 = smov 28   ;;  %s142_s8 = smov 24   ;;  %v113_v11 = vld [vmem:[%s209_s0 + $0x5] sm:$0x1]   ;;  %v114_v12 = vld [vmem:[%s209_s0 + $0x4] sm:$0x1]  }
   0x7   :  { %s143_s13 = smov 20   ;;  %s144_s14 = smov 16   ;;  %v115_v13 = vld [vmem:[%s209_s0 + $0x3] sm:$0x1]   ;;  %v116_v14 = vld [vmem:[%s209_s0 + $0x2] sm:$0x1]  }
   0x8   :  { %s145_s19 = smov 12   ;;  %s146_s20 = smov 8   ;;  %v117_v15 = vld [vmem:[%s209_s0 + $0x1] sm:$0x1]   ;;  %vm27_vm4 = vcmask 425344   ;;  %vm33_vm5 = vcmask 392544  }
   0x9   :  { %s147_s0 = smov 4   ;;  %vm39_vm6 = vcmask 359744   ;;  %vm45_vm7 = vcmask 326944   ;;  %vm51_vm8 = vcmask 294144   ;;  %vm57_vm9 = vcmask 261344  }
   0xa   :  { %31 = vrot.lane.b32.xlu0 %v107_v4, %s137_s24  ;;  %37 = vrot.lane.b32.xlu1 %v108_v5, %s138_s25  ;;  %vm63_vm10 = vcmask 228544   ;;  %vm69_vm11 = vcmask 195744   ;;  %vm75_vm12 = vcmask 162944   ;;  %vm81_vm13 = vcmask 130144  }
   0xb   :  { %vm87_vm14 = vcmask 97344   ;;  %vm93_vm15 = vcmask 64544  }
   0xe   :  { %43 = vrot.lane.b32.xlu0 %v109_v7, %s139_s30  ;;  %49 = vrot.lane.b32.xlu1 %v110_v8, %s140_s2 }
  0x12   :  { %55 = vrot.lane.b32.xlu0 %v111_v9, %s141_s7  ;;  %61 = vrot.lane.b32.xlu1 %v112_v10, %s142_s8 }
  0x16   :  { %67 = vrot.lane.b32.xlu0 %v113_v11, %s143_s13  ;;  %73 = vrot.lane.b32.xlu1 %v114_v12, %s144_s14 }
  0x1a   :  { %79 = vrot.lane.b32.xlu0 %v115_v13, %s145_s19  ;;  %85 = vrot.lane.b32.xlu1 %v116_v14, %s146_s20 }
  0x1e   :  { %91 = vrot.lane.b32.xlu0 %v117_v15, %s147_s0 }
  0x74   :  { %v8_v16 = vpop.permute.xlu0 %7   ;;  %v20_v17 = vpop.permute.xlu1 %19  }
  0x75   :  { %10 = vst.msk [vmem:[#allocation0] sm:$0x1] %vm9_vm1, %v8_v16  }
  0x78   :  { %v14_v18 = vpop.permute.xlu0 %13   ;;  %v26_v19 = vpop.permute.xlu1 %25  }
  0x79   :  { %16 = vst.msk [vmem:[#allocation0] sm:$0x1] %vm15_vm2, %v14_v18  }
  0x7a   :  { %22 = vst.msk [vmem:[#allocation0] sm:$0x1] %vm21_vm3, %v20_v17  }
  0x7b   :  { %28 = vst.msk [vmem:[#allocation0] sm:$0x1] %vm27_vm4, %v26_v19  }
  0x7c   :  { %v32_v20 = vpop.permute.xlu0 %31   ;;  %v38_v21 = vpop.permute.xlu1 %37  }
  0x7d   :  { %34 = vst.msk [vmem:[#allocation0] sm:$0x1] %vm33_vm5, %v32_v20  }
  0x7e   :  { %40 = vst.msk [vmem:[#allocation0] sm:$0x1] %vm39_vm6, %v38_v21  }
  0x80   :  { %v44_v22 = vpop.permute.xlu0 %43   ;;  %v50_v23 = vpop.permute.xlu1 %49  }
  0x81   :  { %46 = vst.msk [vmem:[#allocation0] sm:$0x1] %vm45_vm7, %v44_v22  }
  0x82   :  { %52 = vst.msk [vmem:[#allocation0] sm:$0x1] %vm51_vm8, %v50_v23  }
  0x84   :  { %v56_v24 = vpop.permute.xlu0 %55   ;;  %v62_v25 = vpop.permute.xlu1 %61  }
  0x85   :  { %58 = vst.msk [vmem:[#allocation0] sm:$0x1] %vm57_vm9, %v56_v24  }
  0x86   :  { %64 = vst.msk [vmem:[#allocation0] sm:$0x1] %vm63_vm10, %v62_v25  }
  0x88   :  { %v68_v26 = vpop.permute.xlu0 %67   ;;  %v74_v27 = vpop.permute.xlu1 %73  }
  0x89   :  { %70 = vst.msk [vmem:[#allocation0] sm:$0x1] %vm69_vm11, %v68_v26  }
  0x8a   :  { %76 = vst.msk [vmem:[#allocation0] sm:$0x1] %vm75_vm12, %v74_v27  }
  0x8c   :  { %v80_v28 = vpop.permute.xlu0 %79   ;;  %v86_v29 = vpop.permute.xlu1 %85  }
  0x8d   :  { %82 = vst.msk [vmem:[#allocation0] sm:$0x1] %vm81_vm13, %v80_v28  }
  0x8e   :  { %88 = vst.msk [vmem:[#allocation0] sm:$0x1] %vm87_vm14, %v86_v29  }
  0x90   :  { %v92_v30 = vpop.permute.xlu0 %91  }
  0x91   :  { %94 = vst.msk [vmem:[#allocation0] sm:$0x1] %vm93_vm15, %v92_v30  }
  0x98   :  { %v99_v31 = vld [vmem:[#allocation0] sm:$0x1] }
  0x99   :  { %102 = vst [vmem:[%s210_s1] sm:$0x1] %v99_v31 }

// kernel: tile.38
= control target key start
LH: loop header
LB: loop body
LE: loop exit
PB: predicated region body
PF: predicated region fallthrough
CT: control target
= control target key end

     0   :  { %s28_s0 = inlined_call_operand.vmem [shape: f32[8], index: 0, kind: input, shape index: {}]   ;;  %s29_s1 = inlined_call_operand.vmem [shape: f32[16,8], index: 1, kind: output, shape index: {}]  }
   0x1   :  { %v4_v0 = vld [vmem:[%s28_s0] ss:$0 sm:$0xff] }
   0x2   :  { %5 = vst [vmem:[%s29_s1] sm:$0xff] %v4_v0  ;;  %8 = vst [vmem:[%s29_s1 + $0x8] sm:$0xff] %v4_v0 }

// kernel: tile.39
= control target key start
LH: loop header
LB: loop body
LE: loop exit
PB: predicated region body
PF: predicated region fallthrough
CT: control target
= control target key end

     0   :  { %s133_s10 = smov 120   ;;  %s134_s11 = smov 104   ;;  %vm3_vm0 = vcmask 64512   ;;  %vm9_vm1 = vcmask 1048512   ;;  %vm15_vm2 = vcmask 982912   ;;  %vm21_vm3 = vcmask 917312   ;;  %s209_s0 = inlined_call_operand.vmem [shape: f32[16,8], index: 0, kind: input, shape index: {}]   ;;  %s210_s1 = inlined_call_operand.vmem [shape: f32[128], index: 1, kind: output, shape index: {}]  }
   0x1   :  { %v103_v0 = vld [vmem:[%s209_s0 + $0xf] sm:$0x1]   ;;  %v105_v1 = vld [vmem:[%s209_s0 + $0xd] sm:$0x1]   ;;  %v104_v2 = vld [vmem:[%s209_s0 + $0xe] sm:$0x1]  }
   0x2   :  { %7 = vrot.lane.b32.xlu0 %v103_v0, %s133_s10  ;;  %19 = vrot.lane.b32.xlu1 %v105_v1, %s134_s11  ;;  %v106_v3 = vld [vmem:[%s209_s0 + $0xc] sm:$0x1]   ;;  %s135_s16 = smov 112   ;;  %s136_s17 = smov 96   ;;  %v107_v4 = vld [vmem:[%s209_s0 + $0xb] sm:$0x1]  }
   0x3   :  { %v108_v5 = vld [vmem:[%s209_s0 + $0xa] sm:$0x1]   ;;  %v2_v6 = vld [vmem:[%s209_s0] sm:$0x1]   ;;  %s137_s24 = smov 88   ;;  %s138_s25 = smov 80  }
   0x4   :  { %4 = vst.msk [vmem:[#allocation0] sm:$0x1] %vm3_vm0, %v2_v6   ;;  %v109_v7 = vld [vmem:[%s209_s0 + $0x9] sm:$0x1]   ;;  %v110_v8 = vld [vmem:[%s209_s0 + $0x8] sm:$0x1]  }
   0x5   :  { %s139_s30 = smov 72   ;;  %s140_s2 = smov 64   ;;  %v111_v9 = vld [vmem:[%s209_s0 + $0x7] sm:$0x1]   ;;  %v112_v10 = vld [vmem:[%s209_s0 + $0x6] sm:$0x1]  }
   0x6   :  { %13 = vrot.lane.b32.xlu0 %v104_v2, %s135_s16  ;;  %25 = vrot.lane.b32.xlu1 %v106_v3, %s136_s17  ;;  %s141_s7 = smov 56   ;;  %s142_s8 = smov 48   ;;  %v113_v11 = vld [vmem:[%s209_s0 + $0x5] sm:$0x1]   ;;  %v114_v12 = vld [vmem:[%s209_s0 + $0x4] sm:$0x1]  }
   0x7   :  { %s143_s13 = smov 40   ;;  %s144_s14 = smov 32   ;;  %v115_v13 = vld [vmem:[%s209_s0 + $0x3] sm:$0x1]   ;;  %v116_v14 = vld [vmem:[%s209_s0 + $0x2] sm:$0x1]  }
   0x8   :  { %s145_s19 = smov 24   ;;  %s146_s20 = smov 16   ;;  %v117_v15 = vld [vmem:[%s209_s0 + $0x1] sm:$0x1]   ;;  %vm27_vm4 = vcmask 851712   ;;  %vm33_vm5 = vcmask 786112  }
   0x9   :  { %s147_s0 = smov 8   ;;  %vm39_vm6 = vcmask 720512   ;;  %vm45_vm7 = vcmask 654912   ;;  %vm51_vm8 = vcmask 589312   ;;  %vm57_vm9 = vcmask 523712  }
   0xa   :  { %31 = vrot.lane.b32.xlu0 %v107_v4, %s137_s24  ;;  %37 = vrot.lane.b32.xlu1 %v108_v5, %s138_s25  ;;  %vm63_vm10 = vcmask 458112   ;;  %vm69_vm11 = vcmask 392512   ;;  %vm75_vm12 = vcmask 326912   ;;  %vm81_vm13 = vcmask 261312  }
   0xb   :  { %vm87_vm14 = vcmask 195712   ;;  %vm93_vm15 = vcmask 130112  }
   0xe   :  { %43 = vrot.lane.b32.xlu0 %v109_v7, %s139_s30  ;;  %49 = vrot.lane.b32.xlu1 %v110_v8, %s140_s2 }
  0x12   :  { %55 = vrot.lane.b32.xlu0 %v111_v9, %s141_s7  ;;  %61 = vrot.lane.b32.xlu1 %v112_v10, %s142_s8 }
  0x16   :  { %67 = vrot.lane.b32.xlu0 %v113_v11, %s143_s13  ;;  %73 = vrot.lane.b32.xlu1 %v114_v12, %s144_s14 }
  0x1a   :  { %79 = vrot.lane.b32.xlu0 %v115_v13, %s145_s19  ;;  %85 = vrot.lane.b32.xlu1 %v116_v14, %s146_s20 }
  0x1e   :  { %91 = vrot.lane.b32.xlu0 %v117_v15, %s147_s0 }
  0x74   :  { %v8_v16 = vpop.permute.xlu0 %7   ;;  %v20_v17 = vpop.permute.xlu1 %19  }
  0x75   :  { %10 = vst.msk [vmem:[#allocation0] sm:$0x1] %vm9_vm1, %v8_v16  }
  0x78   :  { %v14_v18 = vpop.permute.xlu0 %13   ;;  %v26_v19 = vpop.permute.xlu1 %25  }
  0x79   :  { %16 = vst.msk [vmem:[#allocation0] sm:$0x1] %vm15_vm2, %v14_v18  }
  0x7a   :  { %22 = vst.msk [vmem:[#allocation0] sm:$0x1] %vm21_vm3, %v20_v17  }
  0x7b   :  { %28 = vst.msk [vmem:[#allocation0] sm:$0x1] %vm27_vm4, %v26_v19  }
  0x7c   :  { %v32_v20 = vpop.permute.xlu0 %31   ;;  %v38_v21 = vpop.permute.xlu1 %37  }
  0x7d   :  { %34 = vst.msk [vmem:[#allocation0] sm:$0x1] %vm33_vm5, %v32_v20  }
  0x7e   :  { %40 = vst.msk [vmem:[#allocation0] sm:$0x1] %vm39_vm6, %v38_v21  }
  0x80   :  { %v44_v22 = vpop.permute.xlu0 %43   ;;  %v50_v23 = vpop.permute.xlu1 %49  }
  0x81   :  { %46 = vst.msk [vmem:[#allocation0] sm:$0x1] %vm45_vm7, %v44_v22  }
  0x82   :  { %52 = vst.msk [vmem:[#allocation0] sm:$0x1] %vm51_vm8, %v50_v23  }
  0x84   :  { %v56_v24 = vpop.permute.xlu0 %55   ;;  %v62_v25 = vpop.permute.xlu1 %61  }
  0x85   :  { %58 = vst.msk [vmem:[#allocation0] sm:$0x1] %vm57_vm9, %v56_v24  }
  0x86   :  { %64 = vst.msk [vmem:[#allocation0] sm:$0x1] %vm63_vm10, %v62_v25  }
  0x88   :  { %v68_v26 = vpop.permute.xlu0 %67   ;;  %v74_v27 = vpop.permute.xlu1 %73  }
  0x89   :  { %70 = vst.msk [vmem:[#allocation0] sm:$0x1] %vm69_vm11, %v68_v26  }
  0x8a   :  { %76 = vst.msk [vmem:[#allocation0] sm:$0x1] %vm75_vm12, %v74_v27  }
  0x8c   :  { %v80_v28 = vpop.permute.xlu0 %79   ;;  %v86_v29 = vpop.permute.xlu1 %85  }
  0x8d   :  { %82 = vst.msk [vmem:[#allocation0] sm:$0x1] %vm81_vm13, %v80_v28  }
  0x8e   :  { %88 = vst.msk [vmem:[#allocation0] sm:$0x1] %vm87_vm14, %v86_v29  }
  0x90   :  { %v92_v30 = vpop.permute.xlu0 %91  }
  0x91   :  { %94 = vst.msk [vmem:[#allocation0] sm:$0x1] %vm93_vm15, %v92_v30  }
  0x98   :  { %v99_v31 = vld [vmem:[#allocation0] sm:$0x1] }
  0x99   :  { %102 = vst [vmem:[%s210_s1] sm:$0x1] %v99_v31 }

// kernel: tile.48
= control target key start
LH: loop header
LB: loop body
LE: loop exit
PB: predicated region body
PF: predicated region fallthrough
CT: control target
= control target key end

     0   :  { %s22_s0 = inlined_call_operand.vmem [shape: f32[24], index: 0, kind: input, shape index: {}]   ;;  %s23_s1 = inlined_call_operand.vmem [shape: f32[8,24], index: 1, kind: output, shape index: {}]  }
   0x1   :  { %v4_v0 = vld [vmem:[%s22_s0] ss:$0 sm:$0xff] }
   0x2   :  { %5 = vst [vmem:[%s23_s1] sm:$0xff] %v4_v0 }

// kernel: tile.49
= control target key start
LH: loop header
LB: loop body
LE: loop exit
PB: predicated region body
PF: predicated region fallthrough
CT: control target
= control target key end

     0   :  { %vm9_vm0 = vcmask 64512   ;;  %s79_s12 = smov 120   ;;  %s80_s13 = smov 72   ;;  %vm3_vm1 = vcmask 195584   ;;  %vm13_vm2 = vcmask 130048   ;;  %vm16_vm3 = vcmask 1048512   ;;  %s126_s0 = inlined_call_operand.vmem [shape: f32[8,24], index: 0, kind: input, shape index: {}]   ;;  %s127_s1 = inlined_call_operand.vmem [shape: f32[192], index: 1, kind: output, shape index: {}]  }
   0x1   :  { %v64_v0 = vld [vmem:[%s126_s0 + $0x5] sm:$0x1]   ;;  %v67_v3 = vld [vmem:[%s126_s0 + $0x3] sm:$0x1]   ;;  %v66_v4 = vld [vmem:[%s126_s0 + $0x4] sm:$0x1]  }
   0x2   :  { %v65_v1 = vld [vmem:[%s126_s0 + $0x5] sm:$0x1]   ;;  %26 = vrot.lane.b32.xlu1 %v67_v3, %s80_s13  ;;  %v68_v5 = vld [vmem:[%s126_s0 + $0x2] sm:$0x1]   ;;  %v2_v6 = vld [vmem:[%s126_s0] sm:$0x1]  }
   0x3   :  { %v10_v2 = vsel %vm9_vm0, %v65_v1, %v64_v0  ;;  %4 = vst.msk [vmem:[#allocation0] sm:$0x1] %vm3_vm1, %v2_v6   ;;  %s81_s20 = smov 96   ;;  %s82_s21 = smov 48   ;;  %v69_v7 = vld [vmem:[%s126_s0 + $0x7] sm:$0x1]  }
   0x4   :  { %11 = vrot.lane.b32.xlu0 %v10_v2, %s79_s12  ;;  %v70_v8 = vld [vmem:[%s126_s0 + $0x1] sm:$0x1]   ;;  %s83_s26 = smov 40   ;;  %s84_s27 = smov 24   ;;  %v71_v9 = vld [vmem:[%s126_s0 + $0x6] sm:$0x1]  }
   0x5   :  { %s85_s0 = smov 16   ;;  %vm22_vm4 = vcmask 982784   ;;  %vm28_vm5 = vcmask 785984   ;;  %vm34_vm6 = vcmask 589184   ;;  %vm40_vm7 = vcmask 523584  }
   0x6   :  { %32 = vrot.lane.b32.xlu1 %v68_v5, %s82_s21  ;;  %vm47_vm8 = vcmask 392384   ;;  %vm53_vm9 = vcmask 326784  }
   0x8   :  { %20 = vrot.lane.b32.xlu0 %v66_v4, %s81_s20 }
   0xa   :  { %45 = vrot.lane.b32.xlu1 %v70_v8, %s84_s27 }
   0xc   :  { %38 = vrot.lane.b32.xlu0 %v69_v7, %s83_s26 }
  0x10   :  { %51 = vrot.lane.b32.xlu0 %v71_v9, %s85_s0 }
  0x74   :  { %v27_v11 = vpop.permute.xlu1 %26  }
  0x76   :  { %v12_v10 = vpop.permute.xlu0 %11  }
  0x77   :  { %15 = vst.msk [vmem:[#allocation0 + $0x1] sm:$0x1] %vm13_vm2, %v12_v10  }
  0x78   :  { %17 = vst.msk [vmem:[#allocation0] sm:$0x1] %vm16_vm3, %v12_v10   ;;  %v33_v13 = vpop.permute.xlu1 %32  }
  0x7a   :  { %v21_v12 = vpop.permute.xlu0 %20  }
  0x7b   :  { %23 = vst.msk [vmem:[#allocation0] sm:$0x1] %vm22_vm4, %v21_v12  }
  0x7c   :  { %29 = vst.msk [vmem:[#allocation0] sm:$0x1] %vm28_vm5, %v27_v11   ;;  %v46_v15 = vpop.permute.xlu1 %45  }
  0x7d   :  { %35 = vst.msk [vmem:[#allocation0] sm:$0x1] %vm34_vm6, %v33_v13  }
  0x7e   :  { %v39_v14 = vpop.permute.xlu0 %38   ;;  %48 = vst.msk [vmem:[#allocation0] sm:$0x1] %vm47_vm8, %v46_v15  }
  0x7f   :  { %42 = vst.msk [vmem:[#allocation0 + $0x1] sm:$0x1] %vm40_vm7, %v39_v14  }
  0x82   :  { %v52_v16 = vpop.permute.xlu0 %51  }
  0x83   :  { %55 = vst.msk [vmem:[#allocation0 + $0x1] sm:$0x1] %vm53_vm9, %v52_v16  }
  0x8a   :  { %v60_v17 = vld [vmem:[#allocation0] sm:$0x3] }
  0x8b   :  { %63 = vst [vmem:[%s127_s1] sm:$0x3] %v60_v17 }

// kernel: tile.43
= control target key start
LH: loop header
LB: loop body
LE: loop exit
PB: predicated region body
PF: predicated region fallthrough
CT: control target
= control target key end

     0   :  { %s22_s0 = inlined_call_operand.vmem [shape: f32[12], index: 0, kind: input, shape index: {}]   ;;  %s23_s1 = inlined_call_operand.vmem [shape: f32[8,12], index: 1, kind: output, shape index: {}]  }
   0x1   :  { %v4_v0 = vld [vmem:[%s22_s0] ss:$0 sm:$0xff] }
   0x2   :  { %5 = vst [vmem:[%s23_s1] sm:$0xff] %v4_v0 }

// kernel: tile.44
= control target key start
LH: loop header
LB: loop body
LE: loop exit
PB: predicated region body
PF: predicated region fallthrough
CT: control target
= control target key end

     0   :  { %s69_s10 = smov 84   ;;  %s70_s11 = smov 60   ;;  %vm3_vm0 = vcmask 97280   ;;  %vm9_vm1 = vcmask 786080   ;;  %vm15_vm2 = vcmask 687680   ;;  %vm21_vm3 = vcmask 589280   ;;  %s113_s0 = inlined_call_operand.vmem [shape: f32[8,12], index: 0, kind: input, shape index: {}]   ;;  %s114_s1 = inlined_call_operand.vmem [shape: f32[96], index: 1, kind: output, shape index: {}]  }
   0x1   :  { %v55_v0 = vld [vmem:[%s113_s0 + $0x7] sm:$0x1]   ;;  %v57_v1 = vld [vmem:[%s113_s0 + $0x5] sm:$0x1]   ;;  %v56_v2 = vld [vmem:[%s113_s0 + $0x6] sm:$0x1]  }
   0x2   :  { %7 = vrot.lane.b32.xlu0 %v55_v0, %s69_s10  ;;  %19 = vrot.lane.b32.xlu1 %v57_v1, %s70_s11  ;;  %v58_v3 = vld [vmem:[%s113_s0 + $0x4] sm:$0x1]   ;;  %v2_v4 = vld [vmem:[%s113_s0] sm:$0x1]   ;;  %s71_s18 = smov 72   ;;  %s72_s19 = smov 48  }
   0x3   :  { %4 = vst.msk [vmem:[#allocation0] sm:$0x1] %vm3_vm0, %v2_v4   ;;  %v59_v5 = vld [vmem:[%s113_s0 + $0x3] sm:$0x1]   ;;  %v60_v6 = vld [vmem:[%s113_s0 + $0x2] sm:$0x1]  }
   0x4   :  { %s73_s24 = smov 36   ;;  %s74_s25 = smov 24   ;;  %v61_v7 = vld [vmem:[%s113_s0 + $0x1] sm:$0x1]   ;;  %vm27_vm4 = vcmask 490880   ;;  %vm33_vm5 = vcmask 392480  }
   0x5   :  { %s75_s0 = smov 12   ;;  %vm39_vm6 = vcmask 294080   ;;  %vm45_vm7 = vcmask 195680  }
   0x6   :  { %13 = vrot.lane.b32.xlu0 %v56_v2, %s71_s18  ;;  %25 = vrot.lane.b32.xlu1 %v58_v3, %s72_s19 }
   0xa   :  { %31 = vrot.lane.b32.xlu0 %v59_v5, %s73_s24  ;;  %37 = vrot.lane.b32.xlu1 %v60_v6, %s74_s25 }
   0xe   :  { %43 = vrot.lane.b32.xlu0 %v61_v7, %s75_s0 }
  0x74   :  { %v8_v8 = vpop.permute.xlu0 %7   ;;  %v20_v9 = vpop.permute.xlu1 %19  }
  0x75   :  { %10 = vst.msk [vmem:[#allocation0] sm:$0x1] %vm9_vm1, %v8_v8  }
  0x78   :  { %v14_v10 = vpop.permute.xlu0 %13   ;;  %v26_v11 = vpop.permute.xlu1 %25  }
  0x79   :  { %16 = vst.msk [vmem:[#allocation0] sm:$0x1] %vm15_vm2, %v14_v10  }
  0x7a   :  { %22 = vst.msk [vmem:[#allocation0] sm:$0x1] %vm21_vm3, %v20_v9  }
  0x7b   :  { %28 = vst.msk [vmem:[#allocation0] sm:$0x1] %vm27_vm4, %v26_v11  }
  0x7c   :  { %v32_v12 = vpop.permute.xlu0 %31   ;;  %v38_v13 = vpop.permute.xlu1 %37  }
  0x7d   :  { %34 = vst.msk [vmem:[#allocation0] sm:$0x1] %vm33_vm5, %v32_v12  }
  0x7e   :  { %40 = vst.msk [vmem:[#allocation0] sm:$0x1] %vm39_vm6, %v38_v13  }
  0x80   :  { %v44_v14 = vpop.permute.xlu0 %43  }
  0x81   :  { %46 = vst.msk [vmem:[#allocation0] sm:$0x1] %vm45_vm7, %v44_v14  }
  0x88   :  { %v51_v15 = vld [vmem:[#allocation0] sm:$0x1] }
  0x89   :  { %54 = vst [vmem:[%s114_s1] sm:$0x1] %v51_v15 }

// kernel: tile.53
= control target key start
LH: loop header
LB: loop body
LE: loop exit
PB: predicated region body
PF: predicated region fallthrough
CT: control target
= control target key end

     0   :  { %s22_s0 = inlined_call_operand.vmem [shape: f32[36], index: 0, kind: input, shape index: {}]   ;;  %s23_s1 = inlined_call_operand.vmem [shape: f32[4,36], index: 1, kind: output, shape index: {}]  }
   0x1   :  { %v4_v0 = vld [vmem:[%s22_s0] ss:$0 sm:$0xff] }
   0x2   :  { %5 = vst [vmem:[%s23_s1] sm:$0xf] %v4_v0 }

// kernel: tile.54
= control target key start
LH: loop header
LB: loop body
LE: loop exit
PB: predicated region body
PF: predicated region fallthrough
CT: control target
= control target key end

     0   :  { %vm14_vm0 = vcmask 162816   ;;  %vm8_vm1 = vcmask 293888   ;;  %s47_s8 = smov 36   ;;  %s48_s9 = smov 72   ;;  %vm18_vm2 = vcmask 130048   ;;  %vm21_vm3 = vcmask 1048416   ;;  %s65_s0 = inlined_call_operand.vmem [shape: f32[4,36], index: 0, kind: input, shape index: {}]   ;;  %s66_s1 = inlined_call_operand.vmem [shape: f32[144], index: 1, kind: output, shape index: {}]  }
   0x1   :  { %v5_v0 = vld [vmem:[%s65_s0] sm:$0xf]  ;;  %s46_s0 = smov 108   ;;  %vm27_vm4 = vcmask 884288   ;;  %vm33_vm5 = vcmask 589088  }
   0x2   :  { %6 = vst [vmem:[#allocation1] sm:$0xf] %v5_v0 }
   0x9   :  { %v11_v1 = vld [vmem:[#allocation1 + $0x3] sm:$0x1]   ;;  %v30_v4 = vld [vmem:[#allocation1 + $0x1] sm:$0x1]   ;;  %v7_v5 = vld [vmem:[#allocation1] sm:$0x1]  }
   0xa   :  { %v13_v2 = vld [vmem:[#allocation1 + $0x3] sm:$0x1]   ;;  %31 = vrot.lane.b32.xlu1 %v30_v4, %s47_s8  ;;  %9 = vst.msk [vmem:[#allocation0] sm:$0x1] %vm8_vm1, %v7_v5   ;;  %v24_v6 = vld [vmem:[#allocation1 + $0x2] sm:$0x1]  }
   0xb   :  { %v15_v3 = vsel %vm14_vm0, %v13_v2, %v11_v1 }
   0xc   :  { %16 = vrot.lane.b32.xlu0 %v15_v3, %s46_s0 }
  0x10   :  { %25 = vrot.lane.b32.xlu0 %v24_v6, %s48_s9 }
  0x7c   :  { %v32_v8 = vpop.permute.xlu1 %31  }
  0x7e   :  { %v17_v7 = vpop.permute.xlu0 %16  }
  0x7f   :  { %20 = vst.msk [vmem:[#allocation0 + $0x1] sm:$0x1] %vm18_vm2, %v17_v7  }
  0x80   :  { %22 = vst.msk [vmem:[#allocation0] sm:$0x1] %vm21_vm3, %v17_v7  }
  0x82   :  { %v26_v9 = vpop.permute.xlu0 %25  }
  0x83   :  { %28 = vst.msk [vmem:[#allocation0] sm:$0x1] %vm27_vm4, %v26_v9  }
  0x84   :  { %34 = vst.msk [vmem:[#allocation0] sm:$0x1] %vm33_vm5, %v32_v8  }
  0x8b   :  { %v39_v10 = vld [vmem:[#allocation0] sm:$0x3] }
  0x8c   :  { %42 = vst [vmem:[%s66_s1] sm:$0x3] %v39_v10 }

// kernel: tile.58
= control target key start
LH: loop header
LB: loop body
LE: loop exit
PB: predicated region body
PF: predicated region fallthrough
CT: control target
= control target key end

     0   :  { %s22_s0 = inlined_call_operand.vmem [shape: f32[24], index: 0, kind: input, shape index: {}]   ;;  %s23_s1 = inlined_call_operand.vmem [shape: f32[4,24], index: 1, kind: output, shape index: {}]  }
   0x1   :  { %v4_v0 = vld [vmem:[%s22_s0] ss:$0 sm:$0xff] }
   0x2   :  { %5 = vst [vmem:[%s23_s1] sm:$0xf] %v4_v0 }

// kernel: tile.59
= control target key start
LH: loop header
LB: loop body
LE: loop exit
PB: predicated region body
PF: predicated region fallthrough
CT: control target
= control target key end

     0   :  { %vm8_vm0 = vcmask 195584   ;;  %s40_s8 = smov 24   ;;  %s41_s9 = smov 48   ;;  %vm14_vm1 = vcmask 785984   ;;  %vm20_vm2 = vcmask 589184   ;;  %vm26_vm3 = vcmask 392384   ;;  %s58_s0 = inlined_call_operand.vmem [shape: f32[4,24], index: 0, kind: input, shape index: {}]   ;;  %s59_s1 = inlined_call_operand.vmem [shape: f32[96], index: 1, kind: output, shape index: {}]  }
   0x1   :  { %v5_v0 = vld [vmem:[%s58_s0] sm:$0xf]  ;;  %s39_s0 = smov 72  }
   0x2   :  { %6 = vst [vmem:[#allocation1] sm:$0xf] %v5_v0 }
   0x9   :  { %v11_v1 = vld [vmem:[#allocation1 + $0x3] sm:$0x1]   ;;  %v23_v2 = vld [vmem:[#allocation1 + $0x1] sm:$0x1]   ;;  %v7_v3 = vld [vmem:[#allocation1] sm:$0x1]  }
   0xa   :  { %12 = vrot.lane.b32.xlu0 %v11_v1, %s39_s0  ;;  %24 = vrot.lane.b32.xlu1 %v23_v2, %s40_s8  ;;  %v17_v4 = vld [vmem:[#allocation1 + $0x2] sm:$0x1]   ;;  %9 = vst.msk [vmem:[#allocation0] sm:$0x1] %vm8_vm0, %v7_v3  }
   0xe   :  { %18 = vrot.lane.b32.xlu0 %v17_v4, %s41_s9 }
  0x7c   :  { %v13_v5 = vpop.permute.xlu0 %12   ;;  %v25_v6 = vpop.permute.xlu1 %24  }
  0x7d   :  { %15 = vst.msk [vmem:[#allocation0] sm:$0x1] %vm14_vm1, %v13_v5  }
  0x80   :  { %v19_v7 = vpop.permute.xlu0 %18  }
  0x81   :  { %21 = vst.msk [vmem:[#allocation0] sm:$0x1] %vm20_vm2, %v19_v7  }
  0x82   :  { %27 = vst.msk [vmem:[#allocation0] sm:$0x1] %vm26_vm3, %v25_v6  }
  0x89   :  { %v32_v8 = vld [vmem:[#allocation0] sm:$0x1] }
  0x8a   :  { %35 = vst [vmem:[%s59_s1] sm:$0x1] %v32_v8 }

// kernel: forward.1
= control target key start
LH: loop header
LB: loop body
LE: loop exit
PB: predicated region body
PF: predicated region fallthrough
CT: control target
= control target key end

     0   :  { %s5346_s0 = inlined_call_operand.vmem [shape: f32[64,16], index: 0, kind: input, shape index: {}]   ;;  %s5347_s1 = inlined_call_operand.vmem [shape: f32[6,256], index: 1, kind: input, shape index: {}]   ;;  %s5348_s2 = inlined_call_operand.vmem [shape: bf16[3,16,64], index: 2, kind: input, shape index: {}]   ;;  %s5349_s3 = inlined_call_operand.vmem [shape: bf16[3,64,128], index: 3, kind: input, shape index: {}]   ;;  %s5350_s4 = inlined_call_operand.vmem [shape: bf16[16,32], index: 4, kind: input, shape index: {}]   ;;  %s5351_s5 = inlined_call_operand.vmem [shape: bf16[2,128,64], index: 5, kind: input, shape index: {}]   ;;  %s5352_s6 = inlined_call_operand.vmem [shape: bf16[3,64,96], index: 6, kind: input, shape index: {}]   ;;  %s5353_s7 = inlined_call_operand.vmem [shape: bf16[3,96,192], index: 7, kind: input, shape index: {}]   ;;  %s5354_s8 = inlined_call_operand.vmem [shape: bf16[8,16], index: 8, kind: input, shape index: {}]   ;;  %s5355_s9 = inlined_call_operand.vmem [shape: bf16[2,192,96], index: 9, kind: input, shape index: {}]   ;;  %s5356_s10 = inlined_call_operand.vmem [shape: bf16[3,96,144], index: 10, kind: input, shape index: {}]   ;;  %s5357_s11 = inlined_call_operand.vmem [shape: bf16[3,144,96], index: 11, kind: input, shape index: {}]   ;;  %s5358_s12 = inlined_call_operand.vmem [shape: bf16[2,8], index: 12, kind: input, shape index: {}]   ;;  %s5359_s13 = inlined_call_operand.vmem [shape: bf16[96,10], index: 13, kind: input, shape index: {}]   ;;  %s5360_s14 = inlined_call_operand.vmem [shape: f32[1,10], index: 14, kind: input, shape index: {}]   ;;  %s5361_s15 = inlined_call_operand.hbm [shape: f32[2,2,10], index: 15, kind: output, shape index: {}]  }
   0x1   :  { %5362 = sst [smem:[#allocation6_spill]] %s5346_s0 }
   0x2   :  { %5363 = sst [smem:[#allocation7_spill]] %s5348_s2 }
   0x3   :  { %5364 = sst [smem:[#allocation8_spill]] %s5349_s3 }
   0x4   :  { %5365 = sst [smem:[#allocation9_spill]] %s5350_s4 }
   0x5   :  { %20 = vsyncpa [#allocation3], 0 }
   0x6   :  { %22 = vsyncpa [#allocation3 + $0x1], 0  ;;  %s4423_s18 = smov 0   ;;  %s4425_s19 = smov 0  }
   0x7   :  { %s4427_s20 = smov 0   ;;  %s4429_s21 = smov 0  }
   0x8 LB: > { %s4444_s22 = sadd.s32 4294967295, %s4337_s21   ;;  %s3407_s23 = sadd.s32 4294967294, %s4337_s21   ;;  %s4337_s21 = sphi %s4429_s21, %s5377_s21   ;;  %s4333_s20 = sphi %s4427_s20, %s5376_s20   ;;  %s4329_s19 = sphi %s4425_s19, %s5375_s19   ;;  %s4325_s18 = sphi %s4423_s18, %s5374_s18  }
   0x9   : > { %s4448_s24 = sadd.s32 1, %s4337_s21   ;;  %s355_s25 = sadd.s32 1, %s4333_s20 }
   0xa   : > { %s352_s26 = ssub.s32 %s4337_s21, %s4448_s24  ;;  %p365_p0 = scmp.ne.s32.totalorder %s4333_s20, %s4329_s19 }
   0xb   : > { %p353_p1 = scmp.eq.s32.totalorder %s352_s26, 0  ;;  %p366_p2 = scmp.eq.s32.totalorder %s4444_s22, 1 }
   0xc   : > { %p371_p3 = scmp.ne.s32.totalorder %s4329_s19, %s4325_s18  ;;  %p372_p4 = scmp.eq.s32.totalorder %s3407_s23, 1 }
   0xd   : > { %s4459_s27 = scalar_select %p353_p1, %s4333_s20, %s355_s25  }
   0xe   : > { %p4461_p5 = por %p366_p2, %p365_p0  ;;  %p4465_p6 = por %p372_p4, %p371_p3 }
   0xf   : > { %5366 = sst [smem:[#allocation5_spill]] %s4459_s27  ;;  %p3410_p7 = scmp.ge.s32.totalorder %s4337_s21, 1 }
  0x10   : > { %p441_p8 = scmp.lt.s32.totalorder %s4337_s21, 3 }
  0x12   : > { %p442_p9 = pnand %p3410_p7, %p441_p8 }
  0x13   : > { %s5369_s2 = sld [smem:[#allocation7_spill]] (!%p442_p9)  ;;  %s3412_s17 = sshll.u32 (!%p442_p9), %s4444_s22, 2 }
  0x14   : > { %445 = sbr.rel (%p442_p9) target bundleno = 2642 (0xa52), region = 80  ;;  %p490_p10 = scmp.lt.s32.totalorder (!%p442_p9), %s3412_s17, 7 }
  0x15   : > { %s5370_s0 = sld [smem:[#allocation6_spill]] (!%p442_p9)  ;;  %s486_s16 = sand.u32 (!%p442_p9), 1, %s4329_s19  }
  0x16   : > { %s5371_s3 = sld [smem:[#allocation8_spill]] (!%p442_p9) }
  0x17   : > { %s5372_s4 = sld [smem:[#allocation9_spill]] (!%p442_p9) }
  0x19   : > { %v4068_v0 = vld [vmem:[%s5369_s2] sm:$0xff]   ;;  %v500_v1 = vlaneseq  ;;  %v4069_v2 = vld [vmem:[%s5369_s2 + $0x10] sm:$0xff]   ;;  %v4070_v4 = vld [vmem:[%s5369_s2 + $0x8] sm:$0xff]   ;;  %s5379_s17 = smov (!%p490_p10, %s3412_s17), 7  ;;  %vm618_vm0 = vcmask 130048   ;;  %v4339_v14 = vmov 0.0  }
  0x1a   : > { %3866 = vmatprep.subr.bf16.mxu1 %v4068_v0  ;;  %3878 = vmatprep.subr.bf16.mxu0 %v4069_v2  ;;  %s3413_s30 = sshll.u32 %s5379_s17, 3  ;;  %vm883_vm7 = vcmask 523264   ;;  %vm4340_vm8 = vmmov 0   ;;  %vm1142_vm9 = vcmask 261120   ;;  %vm1788_vm14 = vcmask 785408   ;;  %s3411_s2 = sshll.u32 %s486_s16, 1 }
  0x1b   : > { %v4478_v3 = vshrl.u32 %v500_v1, 7  ;;  %3867 = vmatpush3.bf16.msra.mxu1 %v4068_v0  ;;  %3879 = vmatpush3.bf16.msra.mxu0 %v4069_v2  ;;  %s493_s27 = scalar_lea.vmem %s5370_s0, %s3413_s30  ;;  %s3791_s0 = sshll.u32 %s4444_s22, 5 }
  0x1c   : > { %3872 = vmatprep.subr.bf16.mxu1 %v4070_v4  ;;  %v496_v11 = vld [vmem:[%s493_s27] sm:$0xff]  ;;  %v497_v12 = vld [vmem:[%s493_s27 + $0x8] sm:$0xff]  ;;  %v499_v13 = vld [vmem:[%s493_s27 + $0x18] sm:$0xff]  ;;  %s5305_s26 = scalar_lea.hbm %s5361_s15, %s3791_s0  ;;  %s3335_s30 = scalar_lea.sflag [#allocation3], %s486_s16 }
  0x1d   : > { %v509_v5 = vand.u32 15, %v4478_v3  ;;  %v503_v6 = vadd.s32 16, %v4478_v3  ;;  %v4486_v7 = vadd.s32 8, %v4478_v3  ;;  %v504_v8 = vadd.s32 24, %v4478_v3  ;;  %v498_v20 = vld [vmem:[%s493_s27 + $0x10] sm:$0xff]  ;;  %v4071_v47 = vld [vmem:[%s5371_s3 + $0x38] sm:$0xff]  }
  0x1e   : > { %vm557_vm1 = vcmp.lt.s32.totalorder %v4478_v3, 1  ;;  %vm582_vm3 = vcmp.lt.s32.totalorder %v4478_v3, 7  ;;  %v553_v17 = vrot.slane %v496_v11, 7  ;;  %v554_v18 = vrot.slane %v497_v12, 7  ;;  %3896 = vmatprep.subr.bf16.mxu0 %v4071_v47  ;;  %v4072_v48 = vld [vmem:[%s5371_s3 + $0x18] sm:$0xff]   ;;  %v4073_v49 = vld [vmem:[%s5371_s3 + $0x30] sm:$0xff]  }
  0x1f   : > { %vm562_vm2 = vcmp.gt.s32.totalorder %v509_v5, 0  ;;  %v523_v9 = vand.u32 15, %v503_v6  ;;  %v516_v10 = vand.u32 15, %v4486_v7  ;;  %v530_v16 = vand.u32 15, %v504_v8  ;;  %v4074_v50 = vld [vmem:[%s5371_s3 + $0x10] sm:$0xff]   ;;  %v4075_v51 = vld [vmem:[%s5371_s3 + $0x28] sm:$0xff]  }
  0x20   : > { %v4495_v15 = vsel %vm562_vm2, 1.0, %v4339_v14  ;;  %v556_v19 = vrot.slane %v499_v13, 7  ;;  %v555_v21 = vrot.slane %v498_v20, 7  ;;  %v578_v23 = vrot.slane %v496_v11, 1  ;;  %v4076_v52 = vld [vmem:[%s5371_s3 + $0x8] sm:$0xff]   ;;  %v4077_v53 = vld [vmem:[%s5371_s3 + $0x20] sm:$0xff]  }
  0x21   : > { %vm564_vm4 = vcmp.gt.s32.totalorder %v523_v9, 0  ;;  %v579_v24 = vrot.slane %v497_v12, 1  ;;  %v560_v25 = vsel %vm557_vm1, %v553_v17, %v554_v18  ;;  %v580_v27 = vrot.slane %v498_v20, 1  ;;  %v4078_v54 = vld [vmem:[%s5371_s3] sm:$0xff]   ;;  %v4079_v55 = vld [vmem:[%s5371_s3 + $0x58] sm:$0xff]  }
  0x22   : > { %v4499_v22 = vsel %vm564_vm4, 1.0, %v4339_v14  ;;  %v561_v26 = vsel %vm557_vm1, %v556_v19, %v553_v17  ;;  %vm588_vm5 = vcmp.lt.s32.totalorder %v516_v10, 15  ;;  %v558_v29 = vsel %vm557_vm1, %v555_v21, %v556_v19 }
  0x23   : > { %v574_v28 = vmul.f32 %v4495_v15, %v561_v26  ;;  %v559_v30 = vsel %vm557_vm1, %v554_v18, %v555_v21  ;;  %v584_v32 = vsel %vm582_vm3, %v579_v24, %v580_v27  ;;  %v585_v33 = vsel %vm582_vm3, %v578_v23, %v579_v24 }
  0x24   : > { %v576_v31 = vmul.f32 %v4499_v22, %v559_v30  ;;  %v4516_v34 = vsel %vm588_vm5, 1.0, %v4339_v14  ;;  %v581_v37 = vrot.slane %v499_v13, 1  ;;  %vm590_vm6 = vcmp.lt.s32.totalorder %v530_v16, 15 }
  0x25   : > { %v608_v35 = vpack.c.bf16 %v560_v25, %v574_v28  ;;  %v600_v36 = vmul.f32 %v4516_v34, %v584_v32  ;;  %v603_v39 = vpack.c.bf16 %v497_v12, %v496_v11  ;;  %v4525_v43 = vsel %vm590_vm6, 1.0, %v4339_v14 }
  0x26   : > { %v609_v38 = vpack.c.bf16 %v558_v29, %v576_v31  ;;  %v583_v41 = vsel %vm582_vm3, %v580_v27, %v581_v37  ;;  %v586_v42 = vsel %vm582_vm3, %v581_v37, %v578_v23  ;;  %v604_v46 = vpack.c.bf16 %v499_v13, %v498_v20 }
  0x27   : > { %3868 = vmatprep.mubr.msk.bf16.mxu1 %vm618_vm0, %v608_v35  ;;  %v735_v40 = vpack.c.bf16 %v600_v36, %v585_v33  ;;  %v602_v44 = vmul.f32 %v4525_v43, %v586_v42  ;;  %vm3185_vm2 = vcmask 64512  }
  0x28   : > { %3869 = vmatmul.mubr.msk.bf16.vlgmr.msra.gmra.mxu1 %vm618_vm0, %v609_v38 }
  0x29   : > { %3880 = vmatprep.mubr.msk.bf16.mxu0 %vm618_vm0, %v735_v40  ;;  %3873 = vmatpush3.bf16.msra.mxu1 %v4070_v4  ;;  %v736_v45 = vpack.c.bf16 %v602_v44, %v583_v41  ;;  %v805_v4 = vld [vmem:[%s5347_s1] ss:$0 sm:$0xff] }
  0x2a   : > { %3874 = vmatprep.mubr.msk.bf16.mxu1 %vm618_vm0, %v603_v39  ;;  %3884 = vmatprep.subr.bf16.mxu1 %v4072_v48 }
  0x2b   : > { %3881 = vmatmul.mubr.msk.bf16.vlgmr.msra.gmra.mxu0 %vm618_vm0, %v736_v45 }
  0x2c   : > { %3897 = vmatpush3.bf16.msra.mxu0 %v4071_v47 }
  0x2d   : > { %3898 = vmatprep.subr.bf16.mxu0 %v4073_v49 }
  0x30   : > { %3875 = vmatmul.mubr.msk.bf16.vlgmr.msra.gmra.mxu1 %vm618_vm0, %v604_v46  ;;  %3899 = vmatpush3.bf16.msra.mxu0 %v4073_v49  ;;  %v4082_v49 = vld [vmem:[%s5371_s3 + $0x40] sm:$0xff]  }
  0x31   : > { %3885 = vmatpush3.bf16.msra.mxu1 %v4072_v48  ;;  %3900 = vmatprep.subr.bf16.mxu0 %v4075_v51  ;;  %v4080_v48 = vld [vmem:[%s5371_s3 + $0x50] sm:$0xff]  }
  0x32   : > { %3886 = vmatprep.subr.bf16.mxu1 %v4074_v50 }
  0x34   : > { %3901 = vmatpush3.bf16.msra.mxu0 %v4075_v51 }
  0x35   : > { %3887 = vmatpush3.bf16.msra.mxu1 %v4074_v50  ;;  %3902 = vmatprep.subr.bf16.mxu0 %v4077_v53 }
  0x36   : > { %3888 = vmatprep.subr.bf16.mxu1 %v4076_v52 }
  0x38   : > { %3903 = vmatpush3.bf16.msra.mxu0 %v4077_v53 }
  0x39   : > { %3889 = vmatpush3.bf16.msra.mxu1 %v4076_v52  ;;  %3920 = vmatprep.subr.bf16.mxu0 %v4339_v14 }
  0x3a   : > { %3890 = vmatprep.subr.bf16.mxu1 %v4078_v54 }
  0x3d   : > { %3891 = vmatpush3.bf16.msra.mxu1 %v4078_v54  ;;  %v4087_v54 = vld [vmem:[%s5351_s5 + $0x70] sm:$0xff]  }
  0x3e   : > { %3908 = vmatprep.subr.bf16.mxu1 %v4079_v55 }
  0xe8   : > { %v3870_v56 = vpop.f32.mrf.mxu1 }
  0xea   : > { %v659_v57 = vpop.f32.mrf.mxu1 }
  0xeb   : > { %v3882_v59 = vpop.f32.mrf.mxu0 }
  0xec   : > { %v3871_v58 = vpop.f32.mrf.mxu1 }
  0xed   : > { %v786_v62 = vpop.f32.mrf.mxu0 }
  0xee   : > { %v662_v60 = vpop.f32.mrf.mxu1 }
  0xef   : > { %v3883_v6 = vpop.f32.mrf.mxu0 }
  0xf0   : > { %v3876_v61 = vpop.f32.mrf.mxu1 }
  0xf1   : > { %v729_v63 = vadd.f32 %v3876_v61, %v3870_v56  ;;  %v789_v18 = vpop.f32.mrf.mxu0  ;;  %v4091_v56 = vld [vmem:[%s5351_s5 + $0x60] sm:$0xff]  }
  0xf2   : > { %v720_v0 = vpop.f32.mrf.mxu1 }
  0xf3   : > { %v803_v1 = vadd.f32 %v3882_v59, %v729_v63  ;;  %v721_v2 = vadd.f32 %v720_v0, %v659_v57  ;;  %v4093_v57 = vld [vmem:[%s5351_s5 + $0x58] sm:$0xff]  }
  0xf4   : > { %v3877_v5 = vpop.f32.mrf.mxu1 }
  0xf5   : > { %v801_v8 = vadd.f32 %v786_v62, %v721_v2  ;;  %v732_v9 = vadd.f32 %v3877_v5, %v3871_v58  ;;  %v808_v11 = vadd.f32 %v805_v4, %v803_v1  ;;  %v4095_v58 = vld [vmem:[%s5351_s5 + $0x50] sm:$0xff]   ;;  %v1112_v5 = vld [vmem:[%s5347_s1 + $0x1] ss:$0 sm:$0xff] }
  0xf6   : > { %v723_v10 = vpop.f32.mrf.mxu1 }
  0xf7   : > { %v806_v12 = vadd.f32 %v805_v4, %v801_v8  ;;  %v804_v13 = vadd.f32 %v3883_v6, %v732_v9  ;;  %v724_v16 = vadd.f32 %v723_v10, %v662_v60  ;;  %v812_v21 = vmax.f32 %v808_v11, 0.0 }
  0xf9   : > { %v810_v17 = vmax.f32 %v806_v12, 0.0  ;;  %v809_v19 = vadd.f32 %v805_v4, %v804_v13  ;;  %v802_v20 = vadd.f32 %v789_v18, %v724_v16  ;;  %v816_v28 = vrot.slane %v812_v21, 7 }
  0xfa   : > { %v828_v29 = vrot.slane %v812_v21, 1 }
  0xfb   : > { %v813_v23 = vmax.f32 %v809_v19, 0.0  ;;  %v807_v24 = vadd.f32 %v805_v4, %v802_v20  ;;  %v814_v25 = vrot.slane %v810_v17, 7  ;;  %v826_v37 = vrot.slane %v810_v17, 1 }
  0xfd   : > { %v817_v26 = vrot.slane %v813_v23, 7  ;;  %v811_v27 = vmax.f32 %v807_v24, 0.0  ;;  %v839_v36 = vpack.c.bf16 %v813_v23, %v812_v21 }
  0xff   : > { %v821_v30 = vsel %vm557_vm1, %v817_v26, %v814_v25  ;;  %v815_v31 = vrot.slane %v811_v27, 7  ;;  %v827_v32 = vrot.slane %v811_v27, 1  ;;  %v838_v33 = vpack.c.bf16 %v811_v27, %v810_v17 }
 0x100   : > { %v822_v35 = vmul.f32 %v4495_v15, %v821_v30  ;;  %v818_v44 = vsel %vm557_vm1, %v816_v28, %v817_v26 }
 0x101   : > { %v819_v38 = vsel %vm557_vm1, %v815_v31, %v816_v28  ;;  %3904 = vmatprep.mubr.msk.bf16.mxu0 %vm883_vm7, %v838_v33  ;;  %v820_v39 = vsel %vm557_vm1, %v814_v25, %v815_v31  ;;  %v831_v40 = vsel %vm582_vm3, %v827_v32, %v828_v29  ;;  %v832_v45 = vsel %vm582_vm3, %v826_v37, %v827_v32 }
 0x102   : > { %3905 = vmatmul.mubr.msk.bf16.vlgmr.msra.gmra.mxu0 %vm883_vm7, %v839_v36  ;;  %v849_v41 = vpack.c.bf16 %v820_v39, %v822_v35  ;;  %v824_v42 = vmul.f32 %v4499_v22, %v819_v38  ;;  %v835_v15 = vmul.f32 %v4516_v34, %v831_v40  ;;  %v4081_v22 = vld [vmem:[%s5371_s3 + $0x48] sm:$0xff]   ;;  %v829_v34 = vrot.slane %v813_v23, 1 }
 0x103   : > { %3924 = vmatprep.mubr.msk.bf16.mxu0 %vm4340_vm8, %v4339_v14 }
 0x104   : > { %3892 = vmatprep.mubr.msk.bf16.mxu1 %vm883_vm7, %v849_v41  ;;  %v850_v46 = vpack.c.bf16 %v818_v44, %v824_v42  ;;  %v1018_v47 = vpack.c.bf16 %v835_v15, %v832_v45  ;;  %v833_v50 = vsel %vm582_vm3, %v829_v34, %v826_v37  ;;  %v830_v52 = vsel %vm582_vm3, %v828_v29, %v829_v34  ;;  %v4083_v44 = vld [vmem:[%s5372_s4] sm:$0xff]   ;;  %v4084_v45 = vld [vmem:[%s5351_s5 + $0x38] sm:$0xff]   ;;  %v4094_v34 = vld [vmem:[%s5351_s5 + $0x10] sm:$0xff]   ;;  %s488_s4 = scalar_lea.vmem [#allocation2], %s3411_s2  ;;  %s4342_s2 = smov [#allocation2]  }
 0x105   : > { %v837_v51 = vmul.f32 %v4525_v43, %v833_v50  ;;  %v4085_v43 = vld [vmem:[%s5351_s5 + $0x78] sm:$0xff]   ;;  %v4097_v50 = vld [vmem:[%s5351_s5 + $0x48] sm:$0xff]   ;;  %s3348_s27 = sshll.u32 %s488_s4, 4  ;;  %s4281_s3 = sshll.u32 %s4342_s2, 4  ;;  %s5307_s27 = int_to_ptr.vmem [resolvable:$true] %s3348_s27  ;;  %s4282_s3 = int_to_ptr.vmem [resolvable:$false] %s4281_s3 }
 0x106   : > { %3893 = vmatmul.mubr.msk.bf16.vlgmr.msra.gmra.mxu1 %vm883_vm7, %v850_v46  ;;  %v4086_v46 = vld [vmem:[%s5351_s5 + $0x30] sm:$0xff]   ;;  %s4277_s22 = scalar_lea.vmem %s5307_s27, 32  ;;  %s4283_s23 = scalar_lea.vmem %s4282_s3, 64 }
 0x107   : > { %3909 = vmatpush3.bf16.msra.mxu1 %v4079_v55  ;;  %3916 = vmatprep.mubr.msk.bf16.mxu1 %vm883_vm7, %v1018_v47  ;;  %v1019_v53 = vpack.c.bf16 %v837_v51, %v830_v52  ;;  %v4089_v55 = vld [vmem:[%s5351_s5 + $0x68] sm:$0xff]   ;;  %v4098_v51 = vld [vmem:[%s5351_s5] sm:$0xff]   ;;  %p4278_p11 = scmp.ne.s32.totalorder %s5307_s27, %s4277_s22  ;;  %p4284_p0 = scmp.lt.s32.totalorder %s5307_s27, %s4282_s3 }
 0x108   : > { %3910 = vmatprep.subr.bf16.mxu1 %v4080_v48  ;;  %v4088_v47 = vld [vmem:[%s5351_s5 + $0x28] sm:$0xff]   ;;  %v4099_v52 = vld [vmem:[%s5351_s5 + $0x40] sm:$0xff]   ;;  %p4285_p1 = scmp.lt.s32.totalorder %s4283_s23, %s4277_s22 }
 0x109   : > { %p4279_p12 = pnand %p4278_p11, %p4461_p5 }
 0x10a   : > { %p4286_p2 = por %p4285_p1, %p4284_p0 }
 0x10b   : > { %3911 = vmatpush3.bf16.msra.mxu1 %v4080_v48  ;;  %v4090_v48 = vld [vmem:[%s5351_s5 + $0x20] sm:$0xff]   ;;  %p4280_p13 = pneg %p4279_p12 }
 0x10c   : > { %3912 = vmatprep.subr.bf16.mxu1 %v4081_v22 }
 0x10d   : > { %p4287_p3 = pnand %p4286_p2, %p4280_p13 }
 0x10f   : > { %3913 = vmatpush3.bf16.msra.mxu1 %v4081_v22  ;;  %v4092_v22 = vld [vmem:[%s5351_s5 + $0x18] sm:$0xff]  }
 0x110   : > { %3914 = vmatprep.subr.bf16.mxu1 %v4082_v49 }
 0x113   : > { %3915 = vmatpush3.bf16.msra.mxu1 %v4082_v49  ;;  %v4096_v49 = vld [vmem:[%s5351_s5 + $0x8] sm:$0xff]  }
 0x114   : > { %3948 = vmatprep.subr.bf16.mxu1 %v4339_v14 }
 0x116   : > { %3917 = vmatmul.mubr.msk.bf16.vlgmr.msra.gmra.mxu1 %vm883_vm7, %v1019_v53 }
 0x117   : > { %3964 = vmatprep.mubr.msk.bf16.mxu1 %vm4340_vm8, %v4339_v14  ;;  %3949 = vmatpush3.bf16.msra.mxu1 %v4085_v43 }
 0x118   : > { %3950 = vmatprep.subr.bf16.mxu1 %v4339_v14 }
 0x11b   : > { %3951 = vmatpush3.bf16.msra.mxu1 %v4087_v54 }
 0x11c   : > { %3952 = vmatprep.subr.bf16.mxu1 %v4339_v14 }
 0x11f   : > { %3953 = vmatpush3.bf16.msra.mxu1 %v4089_v55  ;;  %v4100_v55 = vld [vmem:[%s5352_s6 + $0x38] sm:$0xff]  }
 0x120   : > { %3954 = vmatprep.subr.bf16.mxu1 %v4339_v14 }
 0x123   : > { %3955 = vmatpush3.bf16.msra.mxu1 %v4091_v56  ;;  %v4101_v56 = vld [vmem:[%s5352_s6 + $0x18] sm:$0xff]  }
 0x124   : > { %3956 = vmatprep.subr.bf16.mxu1 %v4339_v14 }
 0x127   : > { %3957 = vmatpush3.bf16.msra.mxu1 %v4093_v57 }
 0x128   : > { %3958 = vmatprep.subr.bf16.mxu1 %v4339_v14 }
 0x12b   : > { %3959 = vmatpush3.bf16.msra.mxu1 %v4095_v58 }
 0x12c   : > { %3960 = vmatprep.subr.bf16.mxu1 %v4339_v14 }
 0x12f   : > { %3961 = vmatpush3.bf16.msra.mxu1 %v4097_v50  ;;  %v4132_v50 = vld [vmem:[%s5353_s7 + $0x84] ss:$8 sps:$4 sm:$0xff]  }
 0x130   : > { %3962 = vmatprep.subr.bf16.mxu1 %v4339_v14 }
 0x133   : > { %3963 = vmatpush3.bf16.msra.mxu1 %v4099_v52  ;;  %v4130_v52 = vld [vmem:[%s5353_s7 + $0x80] ss:$8 sps:$4 sm:$0xff]  }
 0x134   : > { %3980 = vmatprep.subr.bf16.mxu1 %v4339_v14 }
 0x1c2   : > { %v3906_v61 = vpop.f32.mrf.mxu0 }
 0x1c4   : > { %v1003_v63 = vpop.f32.mrf.mxu0 }
 0x1c6   : > { %v3894_v59 = vpop.f32.mrf.mxu1  ;;  %v3907_v2 = vpop.f32.mrf.mxu0 }
 0x1c7   : > { %v1012_v1 = vadd.f32 %v3906_v61, %v3894_v59  ;;  %v4102_v59 = vld [vmem:[%s5352_s6 + $0x30] sm:$0xff]   ;;  %v4104_v61 = vld [vmem:[%s5352_s6 + $0x28] sm:$0xff]  }
 0x1c8   : > { %v924_v60 = vpop.f32.mrf.mxu1  ;;  %v1006_v13 = vpop.f32.mrf.mxu0 }
 0x1c9   : > { %v1004_v6 = vadd.f32 %v1003_v63, %v924_v60  ;;  %v4103_v60 = vld [vmem:[%s5352_s6 + $0x10] sm:$0xff]   ;;  %v4106_v63 = vld [vmem:[%s5352_s6 + $0x20] sm:$0xff]  }
 0x1ca   : > { %v3895_v62 = vpop.f32.mrf.mxu1 }
 0x1cb   : > { %v1015_v10 = vadd.f32 %v3907_v2, %v3895_v62  ;;  %v4105_v62 = vld [vmem:[%s5352_s6 + $0x8] sm:$0xff]   ;;  %v1412_v2 = vand.u32 7, %v4486_v7 }
 0x1cc   : > { %v927_v0 = vpop.f32.mrf.mxu1 }
 0x1cd   : > { %v1007_v17 = vadd.f32 %v1006_v13, %v927_v0  ;;  %v4107_v0 = vld [vmem:[%s5352_s6] sm:$0xff]   ;;  %vm1430_vm11 = vcmp.gt.s32.totalorder %v1412_v2, 0  ;;  %vm1442_vm12 = vcmp.lt.s32.totalorder %v1412_v2, 7 }
 0x1d6   : > { %v3918_v4 = vpop.f32.mrf.mxu1 }
 0x1d7   : > { %v1110_v8 = vadd.f32 %v3918_v4, %v1012_v1  ;;  %v1405_v1 = vand.u32 7, %v4478_v3 }
 0x1d8   : > { %v1093_v9 = vpop.f32.mrf.mxu1 }
 0x1d9   : > { %v1115_v11 = vadd.f32 %v1112_v5, %v1110_v8  ;;  %v1108_v12 = vadd.f32 %v1093_v9, %v1004_v6  ;;  %vm1429_vm10 = vcmp.gt.s32.totalorder %v1405_v1, 0  ;;  %vm1441_vm13 = vcmp.lt.s32.totalorder %v1405_v1, 7 }
 0x1da   : > { %v3919_v16 = vpop.f32.mrf.mxu1  ;;  %v4724_v13 = vsel %vm1429_vm10, 1.0, %v4339_v14 }
 0x1db   : > { %v1113_v18 = vadd.f32 %v1112_v5, %v1108_v12  ;;  %v1111_v19 = vadd.f32 %v3919_v16, %v1015_v10  ;;  %v1119_v21 = vmax.f32 %v1115_v11, 0.0 }
 0x1dc   : > { %v1096_v20 = vpop.f32.mrf.mxu1 }
 0x1dd   : > { %v1117_v23 = vmax.f32 %v1113_v18, 0.0  ;;  %v1116_v24 = vadd.f32 %v1112_v5, %v1111_v19  ;;  %v1109_v25 = vadd.f32 %v1096_v20, %v1007_v17  ;;  %v1123_v28 = vrot.slane %v1119_v21, 1 }
 0x1de   : > { %v4727_v20 = vsel %vm1430_vm11, 1.0, %v4339_v14 }
 0x1df   : > { %v1120_v26 = vmax.f32 %v1116_v24, 0.0  ;;  %v1114_v27 = vadd.f32 %v1112_v5, %v1109_v25  ;;  %v1121_v29 = vrot.slane %v1117_v23, 1 }
 0x1e1   : > { %v1124_v30 = vrot.slane %v1120_v26, 1  ;;  %v1118_v31 = vmax.f32 %v1114_v27, 0.0 }
 0x1e3   : > { %v1125_v32 = vsel %vm582_vm3, %v1123_v28, %v1124_v30  ;;  %v1128_v33 = vsel %vm582_vm3, %v1124_v30, %v1121_v29  ;;  %v1122_v35 = vrot.slane %v1118_v31, 1 }
 0x1e4   : > { %v1131_v36 = vmax.f32 %v1119_v21, %v1125_v32  ;;  %v1132_v37 = vmax.f32 %v1120_v26, %v1128_v33  ;;  %v4108_v26 = vld [vmem:[%s5352_s6 + $0x58] sm:$0xff]  }
 0x1e5   : > { %v1126_v38 = vsel %vm582_vm3, %v1122_v35, %v1123_v28  ;;  %v1127_v39 = vsel %vm582_vm3, %v1121_v29, %v1122_v35  ;;  %v4109_v28 = vld [vmem:[%s5352_s6 + $0x50] sm:$0xff]   ;;  %v4755_v35 = vsel %vm1441_vm13, 1.0, %v4339_v14 }
 0x1e6   : > { %v1136_v40 = vpack.c.bf16 %v1132_v37, %v1131_v36  ;;  %v1129_v41 = vmax.f32 %v1117_v23, %v1127_v39  ;;  %v1130_v42 = vmax.f32 %v1118_v31, %v1126_v38  ;;  %v4110_v31 = vld [vmem:[%s5352_s6 + $0x48] sm:$0xff]   ;;  %v4758_v36 = vsel %vm1442_vm12, 1.0, %v4339_v14  ;;  %v4111_v37 = vld [vmem:[%s5352_s6 + $0x40] sm:$0xff]  }
 0x1e8   : > { %3921 = vmatpush3.bf16.msra.mxu0 %v1136_v40  ;;  %v1135_v15 = vpack.c.bf16 %v1130_v42, %v1129_v41  ;;  %v4114_v41 = vld [vmem:[%s5353_s7 + $0xb4] ss:$8 sps:$4 sm:$0xff]   ;;  %v4112_v42 = vld [vmem:[%s5353_s7 + $0xb0] ss:$8 sps:$4 sm:$0xff]  }
 0x1e9   : > { %3922 = vmatprep.subr.bf16.mxu0 %v4339_v14 }
 0x1ec   : > { %3923 = vmatpush3.bf16.msra.mxu0 %v1135_v15  ;;  %v4115_v15 = vld [vmem:[%s5353_s7 + $0x50] ss:$8 sps:$4 sm:$0xff]  }
 0x1ed   : > { %3928 = vmatprep.subr.bf16.mxu0 %v4339_v14 }
 0x1ef   : > { %3925 = vmatmul.mubr.msk.bf16.vlgmr.msra.gmra.mxu0 %vm1142_vm9, %v4083_v44  ;;  %v4117_v44 = vld [vmem:[%s5353_s7 + $0x54] ss:$8 sps:$4 sm:$0xff]  }
 0x1f0   : > { %3929 = vmatpush3.bf16.msra.mxu0 %v4084_v45  ;;  %3944 = vmatprep.mubr.msk.bf16.mxu0 %vm4340_vm8, %v4339_v14  ;;  %v4118_v45 = vld [vmem:[%s5353_s7 + $0xa0] ss:$8 sps:$4 sm:$0xff]  }
 0x1f1   : > { %3930 = vmatprep.subr.bf16.mxu0 %v4339_v14 }
 0x1f4   : > { %3931 = vmatpush3.bf16.msra.mxu0 %v4086_v46  ;;  %v4120_v46 = vld [vmem:[%s5353_s7 + $0xa4] ss:$8 sps:$4 sm:$0xff]  }
 0x1f5   : > { %3932 = vmatprep.subr.bf16.mxu0 %v4339_v14 }
 0x1f8   : > { %3933 = vmatpush3.bf16.msra.mxu0 %v4088_v47  ;;  %v4123_v47 = vld [vmem:[%s5353_s7 + $0x44] ss:$8 sps:$4 sm:$0xff]  }
 0x1f9   : > { %3934 = vmatprep.subr.bf16.mxu0 %v4339_v14 }
 0x1fc   : > { %3935 = vmatpush3.bf16.msra.mxu0 %v4090_v48  ;;  %v4126_v48 = vld [vmem:[%s5353_s7 + $0x94] ss:$8 sps:$4 sm:$0xff]  }
 0x1fd   : > { %3936 = vmatprep.subr.bf16.mxu0 %v4339_v14 }
 0x200   : > { %3937 = vmatpush3.bf16.msra.mxu0 %v4092_v22  ;;  %v4121_v22 = vld [vmem:[%s5353_s7 + $0x40] ss:$8 sps:$4 sm:$0xff]  }
 0x201   : > { %3938 = vmatprep.subr.bf16.mxu0 %v4339_v14 }
 0x204   : > { %3939 = vmatpush3.bf16.msra.mxu0 %v4094_v34  ;;  %v4124_v34 = vld [vmem:[%s5353_s7 + $0x90] ss:$8 sps:$4 sm:$0xff]  }
 0x205   : > { %3940 = vmatprep.subr.bf16.mxu0 %v4339_v14 }
 0x208   : > { %3941 = vmatpush3.bf16.msra.mxu0 %v4096_v49  ;;  %v4129_v49 = vld [vmem:[%s5353_s7 + $0x34] ss:$8 sps:$4 sm:$0xff]  }
 0x209   : > { %3942 = vmatprep.subr.bf16.mxu0 %v4339_v14 }
 0x20c   : > { %3943 = vmatpush3.bf16.msra.mxu0 %v4098_v51  ;;  %v4127_v51 = vld [vmem:[%s5353_s7 + $0x30] ss:$8 sps:$4 sm:$0xff]  }
 0x20d   : > { %3968 = vmatprep.subr.bf16.mxu0 %v4339_v14 }
 0x2af   : > { %v1180_v53 = vpop.f32.mrf.mxu0 }
 0x2b1   : > { %v3926_v43 = vpop.f32.mrf.mxu0 }
 0x2b2   : > { %v4138_v43 = vld [vmem:[%s5353_s7 + $0x74] ss:$8 sps:$4 sm:$0xff]  }
 0x2b3   : > { %v1183_v54 = vpop.f32.mrf.mxu0 }
 0x2b4   : > { %v1187_v57 = vpack.c.bf16 %v1183_v54, %v1180_v53  ;;  %v4135_v53 = vld [vmem:[%s5353_s7 + $0x24] ss:$8 sps:$4 sm:$0xff]   ;;  %v4133_v54 = vld [vmem:[%s5353_s7 + $0x20] ss:$8 sps:$4 sm:$0xff]  }
 0x2b5   : > { %v3927_v58 = vpop.f32.mrf.mxu0 }
 0x2b6   : > { %3945 = vmatmul.mubr.bf16.vlgmr.msra.gmra.mxu0 %v1187_v57  ;;  %3965 = vmatmul.mubr.bf16.vlgmr.msra.gmra.mxu1 %v1187_v57  ;;  %v4144_v57 = vld [vmem:[%s5353_s7 + $0x64] ss:$8 sps:$4 sm:$0xff]   ;;  %v4139_v58 = vld [vmem:[%s5353_s7 + $0x10] ss:$8 sps:$4 sm:$0xff]  }
 0x2b7   : > { %3981 = vmatpush3.bf16.msra.mxu1 %v4100_v55  ;;  %3969 = vmatpush3.bf16.msra.mxu0 %v4101_v56  ;;  %v4136_v55 = vld [vmem:[%s5353_s7 + $0x70] ss:$8 sps:$4 sm:$0xff]   ;;  %v4141_v56 = vld [vmem:[%s5353_s7 + $0x14] ss:$8 sps:$4 sm:$0xff]  }
 0x2b8   : > { %3982 = vmatprep.subr.bf16.mxu1 %v4339_v14  ;;  %3970 = vmatprep.subr.bf16.mxu0 %v4339_v14 }
 0x2b9   : > { %3988 = vmatprep.mubr.msk.bf16.mxu1 %vm4340_vm8, %v4339_v14  ;;  %3976 = vmatprep.mubr.msk.bf16.mxu0 %vm4340_vm8, %v4339_v14 }
 0x2bb   : > { %3983 = vmatpush3.bf16.msra.mxu1 %v4102_v59  ;;  %3971 = vmatpush3.bf16.msra.mxu0 %v4103_v60  ;;  %v4142_v59 = vld [vmem:[%s5353_s7 + $0x60] ss:$8 sps:$4 sm:$0xff]   ;;  %v4147_v60 = vld [vmem:[%s5353_s7 + $0x4] ss:$8 sps:$4 sm:$0xff]  }
 0x2bc   : > { %3984 = vmatprep.subr.bf16.mxu1 %v4339_v14  ;;  %3972 = vmatprep.subr.bf16.mxu0 %v4339_v14 }
 0x2bf   : > { %3985 = vmatpush3.bf16.msra.mxu1 %v4104_v61  ;;  %3973 = vmatpush3.bf16.msra.mxu0 %v4105_v62  ;;  %v4341_v61 = vmov 0   ;;  %v4145_v62 = vld [vmem:[%s5353_s7] ss:$8 sps:$4 sm:$0xff]  }
 0x2c0   : > { %3986 = vmatprep.subr.bf16.mxu1 %v4339_v14  ;;  %3974 = vmatprep.subr.bf16.mxu0 %v4339_v14 }
 0x2c3   : > { %3987 = vmatpush3.bf16.msra.mxu1 %v4106_v63  ;;  %3975 = vmatpush3.bf16.msra.mxu0 %v4107_v0  ;;  %v4150_v63 = vld [vmem:[%s5353_s7 + $0x114] ss:$8 sps:$4 sm:$0xff]  }
 0x2c4   : > { %3992 = vmatprep.subr.bf16.mxu0 %v4339_v14  ;;  %1796 = vmatprep.subr.bf16.mxu1 %v4117_v44 }
 0x376   : > { %v1286_v4 = vpop.f32.mrf.mxu0  ;;  %v1392_v5 = vpop.f32.mrf.mxu1 }
 0x377   : > { %v1399_v9 = vmax.f32 %v1286_v4, %v1392_v5 }
 0x378   : > { %v3946_v6 = vpop.f32.mrf.mxu0  ;;  %v3966_v8 = vpop.f32.mrf.mxu1 }
 0x379   : > { %v1425_v18 = vrot.slane %v1399_v9, 7  ;;  %v1437_v30 = vrot.slane %v1399_v9, 1 }
 0x37a   : > { %v1289_v10 = vpop.f32.mrf.mxu0  ;;  %v1395_v11 = vpop.f32.mrf.mxu1 }
 0x37b   : > { %v1400_v12 = vmax.f32 %v1289_v10, %v1395_v11 }
 0x37c   : > { %v3947_v16 = vpop.f32.mrf.mxu0  ;;  %v3967_v17 = vpop.f32.mrf.mxu1 }
 0x37d   : > { %v1426_v19 = vrot.slane %v1400_v12, 7  ;;  %v1449_v7 = vpack.c.bf16 %v1400_v12, %v1399_v9  ;;  %v1438_v29 = vrot.slane %v1400_v12, 1  ;;  %v1684_v12 = vld [vmem:[%s5347_s1 + $0x2] ss:$0 sm:$0xff] }
 0x37f   : > { %v1427_v21 = vsel %vm557_vm1, %v1425_v18, %v1426_v19  ;;  %v1428_v23 = vsel %vm557_vm1, %v1426_v19, %v1425_v18  ;;  %3989 = vmatmul.mubr.msk.bf16.vlgmr.msra.gmra.mxu1 %vm883_vm7, %v1449_v7  ;;  %v1439_v32 = vsel %vm582_vm3, %v1437_v30, %v1438_v29  ;;  %v1440_v33 = vsel %vm582_vm3, %v1438_v29, %v1437_v30 }
 0x380   : > { %v1435_v24 = vmul.f32 %v4724_v13, %v1428_v23  ;;  %v1436_v25 = vmul.f32 %v4727_v20, %v1427_v21  ;;  %v1447_v38 = vmul.f32 %v4755_v35, %v1439_v32  ;;  %v1448_v39 = vmul.f32 %v4758_v36, %v1440_v33  ;;  %1797 = vmatpush1.bf16.msra.mxu1 %v4115_v15  ;;  %v4162_v15 = vld [vmem:[%s5353_s7 + $0xd4] ss:$8 sps:$4 sm:$0xff]  }
 0x381   : > { %1798 = vmatprep.subr.bf16.mxu1 %v4123_v47  ;;  %1824 = vmatprep.mubr.bf16.mxu1 %v4341_v61  ;;  %v4165_v47 = vld [vmem:[%s5353_s7 + $0xc4] ss:$8 sps:$4 sm:$0xff]  }
 0x382   : > { %v1459_v27 = vpack.c.bf16 %v1436_v25, %v1435_v24  ;;  %v1604_v40 = vpack.c.bf16 %v1448_v39, %v1447_v38  ;;  %v4153_v39 = vld [vmem:[%s5353_s7 + $0x104] ss:$8 sps:$4 sm:$0xff]  }
 0x384   : > { %3977 = vmatmul.mubr.msk.bf16.vlgmr.msra.gmra.mxu0 %vm883_vm7, %v1459_v27  ;;  %1799 = vmatpush1.bf16.msra.mxu1 %v4121_v22 }
 0x385   : > { %3993 = vmatpush3.bf16.msra.mxu0 %v4108_v26  ;;  %4000 = vmatprep.mubr.msk.bf16.mxu0 %vm4340_vm8, %v4339_v14 }
 0x386   : > { %3994 = vmatprep.subr.bf16.mxu0 %v4339_v14  ;;  %1800 = vmatprep.subr.bf16.mxu1 %v4129_v49 }
 0x388   : > { %1801 = vmatpush1.bf16.msra.mxu1 %v4127_v51 }
 0x389   : > { %3995 = vmatpush3.bf16.msra.mxu0 %v4109_v28  ;;  %1802 = vmatprep.subr.bf16.mxu1 %v4135_v53  ;;  %v4173_v53 = vld [vmem:[%s5355_s9 + $0x80] sm:$0xff]  }
 0x38a   : > { %3996 = vmatprep.subr.bf16.mxu0 %v4339_v14 }
 0x38c   : > { %1803 = vmatpush1.bf16.msra.mxu1 %v4133_v54  ;;  %v4177_v54 = vld [vmem:[%s5355_s9 + $0x70] sm:$0xff]  }
 0x38d   : > { %3997 = vmatpush3.bf16.msra.mxu0 %v4110_v31  ;;  %1804 = vmatprep.subr.bf16.mxu1 %v4141_v56  ;;  %v4181_v56 = vld [vmem:[%s5355_s9 + $0x60] sm:$0xff]  }
 0x38e   : > { %3998 = vmatprep.subr.bf16.mxu0 %v4339_v14 }
 0x390   : > { %1805 = vmatpush1.bf16.msra.mxu1 %v4139_v58  ;;  %v4185_v58 = vld [vmem:[%s5355_s9 + $0xb0] sm:$0xff]  }
 0x391   : > { %3999 = vmatpush3.bf16.msra.mxu0 %v4111_v37  ;;  %1806 = vmatprep.subr.bf16.mxu1 %v4147_v60  ;;  %v4148_v37 = vld [vmem:[%s5353_s7 + $0x110] ss:$8 sps:$4 sm:$0xff]  }
 0x392   : > { %1902 = vmatprep.subr.bf16.mxu0 %v4114_v41  ;;  %v4159_v41 = vld [vmem:[%s5353_s7 + $0xe4] ss:$8 sps:$4 sm:$0xff]  }
 0x394   : > { %4001 = vmatmul.mubr.msk.bf16.vlgmr.msra.gmra.mxu0 %vm883_vm7, %v1604_v40  ;;  %1807 = vmatpush1.bf16.msra.mxu1 %v4145_v62  ;;  %v4154_v40 = vld [vmem:[%s5353_s7 + $0xf0] ss:$8 sps:$4 sm:$0xff]  }
 0x395   : > { %1903 = vmatpush1.bf16.msra.mxu0 %v4112_v42  ;;  %1930 = vmatprep.mubr.bf16.mxu0 %v4341_v61  ;;  %v4157_v42 = vld [vmem:[%s5353_s7 + $0xe0] ss:$8 sps:$4 sm:$0xff]  }
 0x396   : > { %1904 = vmatprep.subr.bf16.mxu0 %v4120_v46  ;;  %2022 = vmatprep.subr.bf16.mxu1 %v4150_v63  ;;  %v4160_v46 = vld [vmem:[%s5353_s7 + $0xd0] ss:$8 sps:$4 sm:$0xff]  }
 0x399   : > { %1905 = vmatpush1.bf16.msra.mxu0 %v4118_v45 }
 0x39a   : > { %1906 = vmatprep.subr.bf16.mxu0 %v4126_v48 }
 0x39d   : > { %1907 = vmatpush1.bf16.msra.mxu0 %v4124_v34  ;;  %v4163_v34 = vld [vmem:[%s5353_s7 + $0xc0] ss:$8 sps:$4 sm:$0xff]  }
 0x39e   : > { %1908 = vmatprep.subr.bf16.mxu0 %v4132_v50 }
 0x3a1   : > { %1909 = vmatpush1.bf16.msra.mxu0 %v4130_v52  ;;  %v4167_v52 = vld [vmem:[%s5355_s9 + $0x98] sm:$0xff]  }
 0x3a2   : > { %1910 = vmatprep.subr.bf16.mxu0 %v4138_v43  ;;  %v4175_v43 = vld [vmem:[%s5355_s9 + $0x78] sm:$0xff]  }
 0x3a5   : > { %1911 = vmatpush1.bf16.msra.mxu0 %v4136_v55  ;;  %v4179_v55 = vld [vmem:[%s5355_s9 + $0x68] sm:$0xff]  }
 0x3a6   : > { %1912 = vmatprep.subr.bf16.mxu0 %v4144_v57  ;;  %v4183_v57 = vld [vmem:[%s5355_s9 + $0xb8] sm:$0xff]  }
 0x3a9   : > { %1913 = vmatpush1.bf16.msra.mxu0 %v4142_v59  ;;  %v4187_v59 = vld [vmem:[%s5355_s9 + $0xa8] sm:$0xff]  }
 0x43f   : > { %v1597_v0 = vpop.f32.mrf.mxu1 }
 0x441   : > { %v3990_v1 = vpop.f32.mrf.mxu1 }
 0x442   : > { %v2070_v1 = vsub.s32 0, %v4478_v3 }
 0x443   : > { %v1600_v2 = vpop.f32.mrf.mxu1 }
 0x444   : > { %v1529_v4 = vpop.f32.mrf.mxu0 }
 0x445   : > { %v3991_v5 = vpop.f32.mrf.mxu1  ;;  %v1598_v10 = vadd.f32 %v1597_v0, %v1529_v4  ;;  %v3597_v4 = vld [vmem:[%s5347_s1 + $0x3] ss:$8 sm:$0x3] }
 0x446   : > { %v3978_v6 = vpop.f32.mrf.mxu0  ;;  %v2074_v5 = vsub.s32 1, %v4478_v3 }
 0x448   : > { %v1532_v8 = vpop.f32.mrf.mxu0 }
 0x449   : > { %v1601_v18 = vadd.f32 %v1600_v2, %v1532_v8 }
 0x44a   : > { %v3979_v9 = vpop.f32.mrf.mxu0 }
 0x44b   : > { %v2071_v9 = vrot.slane %v3597_v4, %v2070_v1 }
 0x454   : > { %v1675_v11 = vpop.f32.mrf.mxu0 }
 0x455   : > { %v1682_v16 = vadd.f32 %v1675_v11, %v1598_v10 }
 0x456   : > { %v4002_v17 = vpop.f32.mrf.mxu0 }
 0x457   : > { %v1685_v19 = vadd.f32 %v1684_v12, %v1682_v16  ;;  %v2075_v17 = vrot.slane %v3597_v4, %v2074_v5  ;;  %v4190_v4 = vld [vmem:[%s5356_s10 + $0xb0] ss:$8 sps:$4 sm:$0xff]  }
 0x458   : > { %v1678_v7 = vpop.f32.mrf.mxu0 }
 0x459   : > { %v1683_v21 = vadd.f32 %v1678_v7, %v1601_v18  ;;  %v1687_v24 = vmax.f32 %v1685_v19, 0.0 }
 0x45a   : > { %v4003_v23 = vpop.f32.mrf.mxu0 }
 0x45b   : > { %v1686_v25 = vadd.f32 %v1684_v12, %v1683_v21  ;;  %v1689_v27 = vrot.slane %v1687_v24, 7  ;;  %v1695_v45 = vrot.slane %v1687_v24, 1 }
 0x45d   : > { %v1688_v26 = vmax.f32 %v1686_v25, 0.0 }
 0x45f   : > { %v1690_v28 = vrot.slane %v1688_v26, 7  ;;  %v1701_v29 = vpack.c.bf16 %v1688_v26, %v1687_v24  ;;  %v1696_v44 = vrot.slane %v1688_v26, 1 }
 0x461   : > { %v1691_v30 = vsel %vm557_vm1, %v1689_v27, %v1690_v28  ;;  %v1692_v31 = vsel %vm557_vm1, %v1690_v28, %v1689_v27  ;;  %3571 = vmatmul.mubr.msk.bf16.vlgmr.msra.gmra.mxu0 %vm1788_vm14, %v1701_v29  ;;  %v1697_v48 = vsel %vm582_vm3, %v1695_v45, %v1696_v44  ;;  %v1698_v22 = vsel %vm582_vm3, %v1696_v44, %v1695_v45 }
 0x462   : > { %v1693_v32 = vmul.f32 %v4724_v13, %v1692_v31  ;;  %v1694_v33 = vmul.f32 %v4727_v20, %v1691_v30  ;;  %2136 = vmatprep.mubr.bf16.mxu0 %v4341_v61  ;;  %v4151_v13 = vld [vmem:[%s5353_s7 + $0x100] ss:$8 sps:$4 sm:$0xff]   ;;  %v4156_v20 = vld [vmem:[%s5353_s7 + $0xf4] ss:$8 sps:$4 sm:$0xff]   ;;  %v1699_v49 = vmul.f32 %v4755_v35, %v1697_v48  ;;  %v1700_v50 = vmul.f32 %v4758_v36, %v1698_v22 }
 0x463   : > { %v4169_v35 = vld [vmem:[%s5355_s9 + $0x90] sm:$0xff]   ;;  %v4171_v36 = vld [vmem:[%s5355_s9 + $0x88] sm:$0xff]  }
 0x464   : > { %v1715_v38 = vpack.c.bf16 %v1694_v33, %v1693_v32  ;;  %v1941_v51 = vpack.c.bf16 %v1700_v50, %v1699_v49  ;;  %v2098_v49 = vld [vmem:[%s5354_s8] sm:$0xf]  ;;  %v4166_v50 = vld [vmem:[%s5355_s9 + $0x38] sm:$0xff]  }
 0x466   : > { %3558 = vmatmul.mubr.msk.bf16.vlgmr.msra.gmra.mxu1 %vm1788_vm14, %v1715_v38 }
 0x467   : > { %2023 = vmatpush1.bf16.msra.mxu1 %v4148_v37  ;;  %2050 = vmatprep.mubr.bf16.mxu1 %v4341_v61 }
 0x468   : > { %2024 = vmatprep.subr.bf16.mxu1 %v4153_v39 }
 0x46b   : > { %2025 = vmatpush1.bf16.msra.mxu1 %v4151_v13 }
 0x46c   : > { %2026 = vmatprep.subr.bf16.mxu1 %v4156_v20 }
 0x46f   : > { %2027 = vmatpush1.bf16.msra.mxu1 %v4154_v40 }
 0x470   : > { %2028 = vmatprep.subr.bf16.mxu1 %v4159_v41 }
 0x473   : > { %2029 = vmatpush1.bf16.msra.mxu1 %v4157_v42 }
 0x474   : > { %2030 = vmatprep.subr.bf16.mxu1 %v4162_v15 }
 0x477   : > { %2031 = vmatpush1.bf16.msra.mxu1 %v4160_v46 }
 0x478   : > { %2032 = vmatprep.subr.bf16.mxu1 %v4165_v47 }
 0x47b   : > { %2033 = vmatpush1.bf16.msra.mxu1 %v4163_v34 }
 0x47c   : > { %2383 = vmatprep.subr.bf16.mxu1 %v4341_v61 }
 0x47e   : > { %3596 = vmatmul.mubr.msk.bf16.vlgmr.msra.gmra.mxu1 %vm1788_vm14, %v1941_v51  ;;  %v4168_v51 = vld [vmem:[%s5355_s9 + $0x30] sm:$0xff]  }
 0x47f   : > { %2384 = vmatpush1.bf16.msra.mxu1 %v4167_v52  ;;  %v4170_v52 = vld [vmem:[%s5355_s9 + $0x28] sm:$0xff]  }
 0x480   : > { %2385 = vmatprep.subr.bf16.mxu1 %v4341_v61 }
 0x483   : > { %2386 = vmatpush1.bf16.msra.mxu1 %v4169_v35  ;;  %v4172_v35 = vld [vmem:[%s5355_s9 + $0x20] sm:$0xff]  }
 0x484   : > { %2387 = vmatprep.subr.bf16.mxu1 %v4341_v61 }
 0x487   : > { %2388 = vmatpush1.bf16.msra.mxu1 %v4171_v36  ;;  %v4174_v36 = vld [vmem:[%s5355_s9 + $0x18] sm:$0xff]  }
 0x488   : > { %2389 = vmatprep.subr.bf16.mxu1 %v4341_v61 }
 0x48b   : > { %2390 = vmatpush1.bf16.msra.mxu1 %v4173_v53  ;;  %v4176_v53 = vld [vmem:[%s5355_s9 + $0x10] sm:$0xff]  }
 0x48c   : > { %2391 = vmatprep.subr.bf16.mxu1 %v4341_v61 }
 0x48f   : > { %2392 = vmatpush1.bf16.msra.mxu1 %v4175_v43  ;;  %v4178_v43 = vld [vmem:[%s5355_s9 + $0x8] sm:$0xff]  }
 0x490   : > { %2393 = vmatprep.subr.bf16.mxu1 %v4341_v61 }
 0x493   : > { %2394 = vmatpush1.bf16.msra.mxu1 %v4177_v54  ;;  %v4180_v54 = vld [vmem:[%s5355_s9] sm:$0xff]  }
 0x494   : > { %2395 = vmatprep.subr.bf16.mxu1 %v4341_v61 }
 0x497   : > { %2396 = vmatpush1.bf16.msra.mxu1 %v4179_v55  ;;  %v4182_v55 = vld [vmem:[%s5355_s9 + $0x58] sm:$0xff]  }
 0x498   : > { %2397 = vmatprep.subr.bf16.mxu1 %v4341_v61 }
 0x49b   : > { %2398 = vmatpush1.bf16.msra.mxu1 %v4181_v56  ;;  %v4184_v56 = vld [vmem:[%s5355_s9 + $0x50] sm:$0xff]  }
 0x49c   : > { %2407 = vmatprep.subr.bf16.mxu1 %v4341_v61 }
 0x49f   : > { %2408 = vmatpush2.bf16.msra.mxu1 %v4183_v57  ;;  %v4186_v57 = vld [vmem:[%s5355_s9 + $0x48] sm:$0xff]  }
 0x4a0   : > { %2409 = vmatprep.subr.bf16.mxu1 %v4341_v61 }
 0x4a3   : > { %2410 = vmatpush2.bf16.msra.mxu1 %v4185_v58  ;;  %v4188_v58 = vld [vmem:[%s5355_s9 + $0x40] sm:$0xff]  }
 0x4a4   : > { %2411 = vmatprep.subr.bf16.mxu1 %v4341_v61 }
 0x4a7   : > { %2412 = vmatpush2.bf16.msra.mxu1 %v4187_v59  ;;  %v4189_v59 = vld [vmem:[%s5355_s9 + $0xa0] sm:$0xff]  }
 0x4a8   : > { %2413 = vmatprep.subr.bf16.mxu1 %v4341_v61 }
 0x4ab   : > { %2414 = vmatpush2.bf16.msra.mxu1 %v4189_v59  ;;  %v4241_v59 = vld [vmem:[%s5356_s10 + $0xc0] ss:$8 sps:$4 sm:$0xff]  }
 0x521   : > { %v1932_v63 = vpop.f32.mrf.mxu0 }
 0x523   : > { %v1934_v2 = vpop.f32.mrf.mxu0 }
 0x525   : > { %v1936_v10 = vpop.f32.mrf.mxu0 }
 0x526   : > { %v1826_v60 = vpop.f32.mrf.mxu1 }
 0x527   : > { %v1933_v8 = vadd.f32 %v1932_v63, %v1826_v60  ;;  %v1938_v23 = vpop.f32.mrf.mxu0  ;;  %v4192_v60 = vld [vmem:[%s5356_s10 + $0xb4] ss:$8 sps:$4 sm:$0xff]  }
 0x528   : > { %v1828_v62 = vpop.f32.mrf.mxu1  ;;  %2644 = vmatprep.subr.bf16.mxu1 %v4192_v60 }
 0x529   : > { %v1935_v12 = vadd.f32 %v1934_v2, %v1828_v62  ;;  %v4195_v62 = vld [vmem:[%s5356_s10 + $0x54] ss:$8 sps:$4 sm:$0xff]  }
 0x52a   : > { %v1830_v0 = vpop.f32.mrf.mxu1 }
 0x52b   : > { %v1937_v19 = vadd.f32 %v1936_v10, %v1830_v0  ;;  %v4198_v10 = vld [vmem:[%s5356_s10 + $0xa4] ss:$8 sps:$4 sm:$0xff]  }
 0x52c   : > { %v1832_v6 = vpop.f32.mrf.mxu1 }
 0x52d   : > { %v1939_v25 = vadd.f32 %v1938_v23, %v1832_v6  ;;  %v4193_v6 = vld [vmem:[%s5356_s10 + $0x50] ss:$8 sps:$4 sm:$0xff]   ;;  %v4210_v23 = vld [vmem:[%s5356_s10 + $0x84] ss:$8 sps:$4 sm:$0xff]  }
 0x53e   : > { %v2052_v11 = vpop.f32.mrf.mxu1 }
 0x53f   : > { %v2061_v16 = vadd.f32 %v2052_v11, %v1933_v8  ;;  %v4201_v11 = vld [vmem:[%s5356_s10 + $0x44] ss:$8 sps:$4 sm:$0xff]  }
 0x540   : > { %v2054_v18 = vpop.f32.mrf.mxu1 }
 0x541   : > { %v2078_v7 = vadd.f32 %v2071_v9, %v2061_v16  ;;  %v2062_v21 = vadd.f32 %v2054_v18, %v1935_v12  ;;  %v4196_v16 = vld [vmem:[%s5356_s10 + $0xa0] ss:$8 sps:$4 sm:$0xff]   ;;  %v4204_v18 = vld [vmem:[%s5356_s10 + $0x94] ss:$8 sps:$4 sm:$0xff]  }
 0x542   : > { %v2056_v24 = vpop.f32.mrf.mxu1 }
 0x543   : > { %v2079_v26 = vadd.f32 %v2075_v17, %v2062_v21  ;;  %v2063_v27 = vadd.f32 %v2056_v24, %v1937_v19  ;;  %v2082_v29 = vmax.f32 %v2078_v7, 0.0  ;;  %v4207_v19 = vld [vmem:[%s5356_s10 + $0x34] ss:$8 sps:$4 sm:$0xff]   ;;  %v4202_v7 = vld [vmem:[%s5356_s10 + $0x90] ss:$8 sps:$4 sm:$0xff]  }
 0x544   : > { %v2058_v28 = vpop.f32.mrf.mxu1  ;;  %v4205_v21 = vld [vmem:[%s5356_s10 + $0x30] ss:$8 sps:$4 sm:$0xff]   ;;  %v4213_v24 = vld [vmem:[%s5356_s10 + $0x24] ss:$8 sps:$4 sm:$0xff]  }
 0x545   : > { %v2080_v30 = vadd.f32 %v2071_v9, %v2063_v27  ;;  %v2064_v31 = vadd.f32 %v2058_v28, %v1939_v25  ;;  %v2083_v32 = vmax.f32 %v2079_v26, 0.0  ;;  %v2086_v38 = vrot.slane %v2082_v29, 1  ;;  %v4208_v25 = vld [vmem:[%s5356_s10 + $0x80] ss:$8 sps:$4 sm:$0xff]   ;;  %v4216_v27 = vld [vmem:[%s5356_s10 + $0x74] ss:$8 sps:$4 sm:$0xff]  }
 0x546   : > { %v4211_v26 = vld [vmem:[%s5356_s10 + $0x20] ss:$8 sps:$4 sm:$0xff]   ;;  %v4214_v28 = vld [vmem:[%s5356_s10 + $0x70] ss:$8 sps:$4 sm:$0xff]  }
 0x547   : > { %v2084_v33 = vmax.f32 %v2080_v30, 0.0  ;;  %v2081_v37 = vadd.f32 %v2075_v17, %v2064_v31  ;;  %v2087_v20 = vrot.slane %v2083_v32, 1  ;;  %v4199_v17 = vld [vmem:[%s5356_s10 + $0x40] ss:$8 sps:$4 sm:$0xff]   ;;  %v4217_v30 = vld [vmem:[%s5356_s10 + $0x10] ss:$8 sps:$4 sm:$0xff]  }
 0x548   : > { %v4222_v31 = vld [vmem:[%s5356_s10 + $0x64] ss:$8 sps:$4 sm:$0xff]  }
 0x549   : > { %v2088_v39 = vrot.slane %v2084_v33, 1  ;;  %v2085_v13 = vmax.f32 %v2081_v37, 0.0  ;;  %v4223_v37 = vld [vmem:[%s5356_s10] ss:$8 sps:$4 sm:$0xff]  }
 0x54b   : > { %v2090_v40 = vsel %vm582_vm3, %v2086_v38, %v2088_v39  ;;  %v2092_v41 = vsel %vm582_vm3, %v2088_v39, %v2086_v38  ;;  %v2089_v42 = vrot.slane %v2085_v13, 1  ;;  %v4228_v38 = vld [vmem:[%s5356_s10 + $0x114] ss:$8 sps:$4 sm:$0xff]   ;;  %v2428_v39 = vand.u32 3, %v4478_v3 }
 0x54c   : > { %v2094_v15 = vmax.f32 %v2082_v29, %v2090_v40  ;;  %v2096_v44 = vmax.f32 %v2084_v33, %v2092_v41  ;;  %v4219_v29 = vld [vmem:[%s5356_s10 + $0x14] ss:$8 sps:$4 sm:$0xff]   ;;  %v4225_v33 = vld [vmem:[%s5356_s10 + $0x4] ss:$8 sps:$4 sm:$0xff]  }
 0x54d   : > { %v2093_v45 = vsel %vm582_vm3, %v2089_v42, %v2087_v20  ;;  %v2091_v46 = vsel %vm582_vm3, %v2087_v20, %v2089_v42  ;;  %vm2437_vm15 = vcmp.gt.s32.totalorder %v2428_v39, 0  ;;  %vm2442_vm1 = vcmp.lt.s32.totalorder %v2428_v39, 3 }
 0x54e   : > { %v2097_v47 = vmax.f32 %v2085_v13, %v2093_v45  ;;  %v2095_v48 = vmax.f32 %v2083_v32, %v2091_v46  ;;  %v2099_v34 = vpack.c.bf16 %v2096_v44, %v2094_v15  ;;  %v4220_v32 = vld [vmem:[%s5356_s10 + $0x60] ss:$8 sps:$4 sm:$0xff]   ;;  %v5096_v41 = vsel %vm2437_vm15, 1.0, %v4339_v14 }
 0x54f   : > { %vm3332_vm3 = vcmask 74752  }
 0x550   : > { %v2100_v22 = vpack.c.bf16 %v2097_v47, %v2095_v48 }
 0x552   : > { %2118 = vmatprep.subr.bf16.mxu0 %v2100_v22 }
 0x553   : > { %2119 = vmatpush1.bf16.msra.mxu0 %v2099_v34 }
 0x554   : > { %2246 = vmatprep.subr.bf16.mxu0 %v4341_v61 }
 0x556   : > { %3598 = vmatmul.mubr.msk.bf16.vlgmr.msra.gmra.mxu0 %vm618_vm0, %v2098_v49  ;;  %v4226_v49 = vld [vmem:[%s5356_s10 + $0x110] ss:$8 sps:$4 sm:$0xff]  }
 0x557   : > { %2247 = vmatpush1.bf16.msra.mxu0 %v4166_v50 }
 0x558   : > { %2248 = vmatprep.subr.bf16.mxu0 %v4341_v61 }
 0x55b   : > { %2249 = vmatpush1.bf16.msra.mxu0 %v4168_v51  ;;  %v4231_v51 = vld [vmem:[%s5356_s10 + $0x104] ss:$8 sps:$4 sm:$0xff]  }
 0x55c   : > { %2250 = vmatprep.subr.bf16.mxu0 %v4341_v61 }
 0x55f   : > { %2251 = vmatpush1.bf16.msra.mxu0 %v4170_v52  ;;  %v4229_v52 = vld [vmem:[%s5356_s10 + $0x100] ss:$8 sps:$4 sm:$0xff]  }
 0x560   : > { %2252 = vmatprep.subr.bf16.mxu0 %v4341_v61 }
 0x563   : > { %2253 = vmatpush1.bf16.msra.mxu0 %v4172_v35  ;;  %v4234_v35 = vld [vmem:[%s5356_s10 + $0xf4] ss:$8 sps:$4 sm:$0xff]  }
 0x564   : > { %2254 = vmatprep.subr.bf16.mxu0 %v4341_v61 }
 0x567   : > { %2255 = vmatpush1.bf16.msra.mxu0 %v4174_v36  ;;  %v4232_v36 = vld [vmem:[%s5356_s10 + $0xf0] ss:$8 sps:$4 sm:$0xff]  }
 0x568   : > { %2256 = vmatprep.subr.bf16.mxu0 %v4341_v61 }
 0x56b   : > { %2257 = vmatpush1.bf16.msra.mxu0 %v4176_v53  ;;  %v4237_v53 = vld [vmem:[%s5356_s10 + $0xe4] ss:$8 sps:$4 sm:$0xff]  }
 0x56c   : > { %2258 = vmatprep.subr.bf16.mxu0 %v4341_v61 }
 0x56f   : > { %2259 = vmatpush1.bf16.msra.mxu0 %v4178_v43  ;;  %v4235_v43 = vld [vmem:[%s5356_s10 + $0xe0] ss:$8 sps:$4 sm:$0xff]  }
 0x570   : > { %2260 = vmatprep.subr.bf16.mxu0 %v4341_v61 }
 0x573   : > { %2261 = vmatpush1.bf16.msra.mxu0 %v4180_v54  ;;  %v4240_v54 = vld [vmem:[%s5356_s10 + $0xd4] ss:$8 sps:$4 sm:$0xff]  }
 0x574   : > { %2270 = vmatprep.subr.bf16.mxu0 %v4341_v61 }
 0x577   : > { %2271 = vmatpush2.bf16.msra.mxu0 %v4182_v55  ;;  %v4238_v55 = vld [vmem:[%s5356_s10 + $0xd0] ss:$8 sps:$4 sm:$0xff]  }
 0x578   : > { %2272 = vmatprep.subr.bf16.mxu0 %v4341_v61 }
 0x57b   : > { %2273 = vmatpush2.bf16.msra.mxu0 %v4184_v56 }
 0x57c   : > { %2274 = vmatprep.subr.bf16.mxu0 %v4341_v61 }
 0x57f   : > { %2275 = vmatpush2.bf16.msra.mxu0 %v4186_v57  ;;  %v4243_v57 = vld [vmem:[%s5356_s10 + $0xc4] ss:$8 sps:$4 sm:$0xff]  }
 0x580   : > { %2276 = vmatprep.subr.bf16.mxu0 %v4341_v61 }
 0x583   : > { %2277 = vmatpush2.bf16.msra.mxu0 %v4188_v58  ;;  %v5133_v58 = vsel %vm2442_vm1, 1.0, %v4339_v14 }
 0x584   : > { %2540 = vmatprep.subr.bf16.mxu0 %v4195_v62 }
 0x616   : > { %v2138_v63 = vpop.f32.mrf.mxu0 }
 0x617   : > { %v2145_v8 = vpack.c.bf16 %v2138_v63, %v2138_v63  ;;  %v4244_v63 = vld [vmem:[%s5357_s11 + $0x80] sm:$0xff]  }
 0x618   : > { %v2140_v0 = vpop.f32.mrf.mxu0 }
 0x619   : > { %v2146_v2 = vpack.c.bf16 %v2140_v0, %v2140_v0  ;;  %v4245_v0 = vld [vmem:[%s5357_s11 + $0x38] sm:$0xff]  }
 0x61a   : > { %v2142_v9 = vpop.f32.mrf.mxu0 }
 0x61b   : > { %3611 = vmatprep.mubr.msk.bf16.mxu0 %vm883_vm7, %v2146_v2  ;;  %3648 = vmatprep.mubr.msk.bf16.mxu1 %vm883_vm7, %v2146_v2  ;;  %v4246_v2 = vld [vmem:[%s5357_s11 + $0x78] sm:$0xff]   ;;  %v4250_v9 = vld [vmem:[%s5357_s11 + $0x68] sm:$0xff]  }
 0x61c   : > { %v2143_v12 = vpop.f32.mrf.mxu0  ;;  %2279 = vmatmul.mubr.bf16.vlgmr.msra.gmra.mxu0 %v2145_v8  ;;  %2416 = vmatmul.mubr.bf16.vlgmr.msra.gmra.mxu1 %v2145_v8  ;;  %v4249_v8 = vld [vmem:[%s5357_s11 + $0x28] sm:$0xff]  }
 0x61d   : > { %2645 = vmatpush1.bf16.msra.mxu1 %v4190_v4  ;;  %2541 = vmatpush1.bf16.msra.mxu0 %v4193_v6  ;;  %v4247_v4 = vld [vmem:[%s5357_s11 + $0x30] sm:$0xff]   ;;  %v4253_v12 = vld [vmem:[%s5357_s11 + $0x18] sm:$0xff]  }
 0x61e   : > { %2646 = vmatprep.subr.bf16.mxu1 %v4198_v10  ;;  %2542 = vmatprep.subr.bf16.mxu0 %v4201_v11  ;;  %v4248_v6 = vld [vmem:[%s5357_s11 + $0x70] sm:$0xff]   ;;  %v4251_v10 = vld [vmem:[%s5357_s11 + $0x20] sm:$0xff]  }
 0x61f   : > { %2672 = vmatprep.mubr.bf16.mxu1 %v4341_v61  ;;  %2568 = vmatprep.mubr.bf16.mxu0 %v4341_v61  ;;  %v4252_v11 = vld [vmem:[%s5357_s11 + $0x60] sm:$0xff]  }
 0x621   : > { %2647 = vmatpush1.bf16.msra.mxu1 %v4196_v16  ;;  %2543 = vmatpush1.bf16.msra.mxu0 %v4199_v17  ;;  %v4254_v16 = vld [vmem:[%s5357_s11 + $0x58] sm:$0xff]   ;;  %v4255_v17 = vld [vmem:[%s5357_s11 + $0x10] sm:$0xff]  }
 0x622   : > { %2648 = vmatprep.subr.bf16.mxu1 %v4204_v18  ;;  %2544 = vmatprep.subr.bf16.mxu0 %v4207_v19  ;;  %v4256_v18 = vld [vmem:[%s5357_s11 + $0x50] sm:$0xff]   ;;  %v4257_v19 = vld [vmem:[%s5357_s11 + $0x8] sm:$0xff]  }
 0x625   : > { %2649 = vmatpush1.bf16.msra.mxu1 %v4202_v7  ;;  %2545 = vmatpush1.bf16.msra.mxu0 %v4205_v21  ;;  %v4258_v7 = vld [vmem:[%s5357_s11 + $0x48] sm:$0xff]   ;;  %v4259_v21 = vld [vmem:[%s5357_s11] sm:$0xff]  }
 0x626   : > { %2650 = vmatprep.subr.bf16.mxu1 %v4210_v23  ;;  %2546 = vmatprep.subr.bf16.mxu0 %v4213_v24  ;;  %v4260_v23 = vld [vmem:[%s5357_s11 + $0x88] sm:$0xff]   ;;  %v4261_v24 = vld [vmem:[%s5357_s11 + $0x40] sm:$0xff]  }
 0x629   : > { %2651 = vmatpush1.bf16.msra.mxu1 %v4208_v25  ;;  %2547 = vmatpush1.bf16.msra.mxu0 %v4211_v26 }
 0x62a   : > { %2652 = vmatprep.subr.bf16.mxu1 %v4216_v27  ;;  %2548 = vmatprep.subr.bf16.mxu0 %v4219_v29 }
 0x62d   : > { %2653 = vmatpush1.bf16.msra.mxu1 %v4214_v28  ;;  %2549 = vmatpush1.bf16.msra.mxu0 %v4217_v30 }
 0x62e   : > { %2654 = vmatprep.subr.bf16.mxu1 %v4222_v31  ;;  %2550 = vmatprep.subr.bf16.mxu0 %v4225_v33  ;;  %v3714_v33 = vld [vmem:[%s5347_s1 + $0x4] ss:$8 sm:$0x3] }
 0x631   : > { %2655 = vmatpush1.bf16.msra.mxu1 %v4220_v32  ;;  %2551 = vmatpush1.bf16.msra.mxu0 %v4223_v37 }
 0x632   : > { %2924 = vmatprep.subr.bf16.mxu1 %v4341_v61  ;;  %2762 = vmatprep.subr.bf16.mxu0 %v4228_v38  ;;  %v2807_v38 = vrot.slane %v3714_v33, %v2070_v1 }
 0x6dc   : > { %v2280_v13 = vpop.f32.mrf.mxu0  ;;  %v2417_v20 = vpop.f32.mrf.mxu1 }
 0x6dd   : > { %v2423_v40 = vmax.f32 %v2280_v13, %v2417_v20 }
 0x6de   : > { %v2282_v42 = vpop.f32.mrf.mxu0  ;;  %v2419_v15 = vpop.f32.mrf.mxu1 }
 0x6df   : > { %v2436_v44 = vrot.slane %v2423_v40, 7  ;;  %v2446_v45 = vpack.c.bf16 %v2423_v40, %v2423_v40  ;;  %v2441_v56 = vrot.slane %v2423_v40, 1  ;;  %v2811_v40 = vrot.slane %v3714_v33, %v2074_v5  ;;  %v4276_v33 = vld [vmem:[%s5359_s13] sm:$0xff]  }
 0x6e0   : > { %v2283_v46 = vpop.f32.mrf.mxu0  ;;  %v2420_v47 = vpop.f32.mrf.mxu1 }
 0x6e1   : > { %v2440_v48 = vmul.f32 %v5096_v41, %v2436_v44  ;;  %3688 = vmatmul.mubr.msk.bf16.vlgmr.msra.gmra.mxu1 %vm1788_vm14, %v2446_v45  ;;  %v2445_v60 = vmul.f32 %v5133_v58, %v2441_v56  ;;  %v4266_v56 = vld [vmem:[%s5357_s11 + $0xa8] sm:$0xff]  }
 0x6e2   : > { %v2284_v22 = vpop.f32.mrf.mxu0  ;;  %v2421_v34 = vpop.f32.mrf.mxu1  ;;  %2925 = vmatpush1.bf16.msra.mxu1 %v4245_v0 }
 0x6e3   : > { %v2460_v50 = vpack.c.bf16 %v2440_v48, %v2440_v48  ;;  %v2681_v62 = vpack.c.bf16 %v2445_v60, %v2445_v60  ;;  %2926 = vmatprep.subr.bf16.mxu1 %v4341_v61  ;;  %v4269_v60 = vld [vmem:[%s5357_s11 + $0x90] sm:$0xff]  }
 0x6e5   : > { %3675 = vmatmul.mubr.msk.bf16.vlgmr.msra.gmra.mxu0 %vm1788_vm14, %v2460_v50 }
 0x6e6   : > { %2763 = vmatpush1.bf16.msra.mxu0 %v4226_v49  ;;  %2790 = vmatprep.mubr.bf16.mxu0 %v4341_v61 }
 0x6e7   : > { %2764 = vmatprep.subr.bf16.mxu0 %v4231_v51  ;;  %2927 = vmatpush1.bf16.msra.mxu1 %v4247_v4 }
 0x6e8   : > { %2928 = vmatprep.subr.bf16.mxu1 %v4341_v61 }
 0x6ea   : > { %2765 = vmatpush1.bf16.msra.mxu0 %v4229_v52 }
 0x6eb   : > { %2766 = vmatprep.subr.bf16.mxu0 %v4234_v35  ;;  %2929 = vmatpush1.bf16.msra.mxu1 %v4249_v8 }
 0x6ec   : > { %2930 = vmatprep.subr.bf16.mxu1 %v4341_v61 }
 0x6ee   : > { %2767 = vmatpush1.bf16.msra.mxu0 %v4232_v36  ;;  %v4262_v36 = vld [vmem:[%s5357_s11 + $0xc8] sm:$0xff]  }
 0x6ef   : > { %2768 = vmatprep.subr.bf16.mxu0 %v4237_v53  ;;  %2931 = vmatpush1.bf16.msra.mxu1 %v4251_v10 }
 0x6f0   : > { %2932 = vmatprep.subr.bf16.mxu1 %v4341_v61 }
 0x6f2   : > { %2769 = vmatpush1.bf16.msra.mxu0 %v4235_v43 }
 0x6f3   : > { %2770 = vmatprep.subr.bf16.mxu0 %v4240_v54  ;;  %2933 = vmatpush1.bf16.msra.mxu1 %v4253_v12  ;;  %v4264_v54 = vld [vmem:[%s5357_s11 + $0xb8] sm:$0xff]  }
 0x6f4   : > { %2934 = vmatprep.subr.bf16.mxu1 %v4341_v61 }
 0x6f6   : > { %2771 = vmatpush1.bf16.msra.mxu0 %v4238_v55  ;;  %v4265_v55 = vld [vmem:[%s5357_s11 + $0xb0] sm:$0xff]  }
 0x6f7   : > { %2772 = vmatprep.subr.bf16.mxu0 %v4243_v57  ;;  %2935 = vmatpush1.bf16.msra.mxu1 %v4255_v17  ;;  %v4267_v57 = vld [vmem:[%s5357_s11 + $0xa0] sm:$0xff]  }
 0x6f8   : > { %2936 = vmatprep.subr.bf16.mxu1 %v4341_v61 }
 0x6fa   : > { %2773 = vmatpush1.bf16.msra.mxu0 %v4241_v59  ;;  %v4268_v59 = vld [vmem:[%s5357_s11 + $0x98] sm:$0xff]  }
 0x6fb   : > { %3021 = vmatprep.subr.bf16.mxu0 %v4341_v61  ;;  %2937 = vmatpush1.bf16.msra.mxu1 %v4257_v19  ;;  %v3180_v19 = vld [vmem:[%s5347_s1 + $0x5] ss:$0 sm:$0xff] }
 0x6fc   : > { %2938 = vmatprep.subr.bf16.mxu1 %v4341_v61 }
 0x6fd   : > { %3713 = vmatmul.mubr.msk.bf16.vlgmr.msra.gmra.mxu0 %vm1788_vm14, %v2681_v62 }
 0x6fe   : > { %3022 = vmatpush1.bf16.msra.mxu0 %v4244_v63  ;;  %v4270_v63 = vld [vmem:[%s5357_s11 + $0xd0] sm:$0xff]  }
 0x6ff   : > { %3023 = vmatprep.subr.bf16.mxu0 %v4341_v61  ;;  %2939 = vmatpush1.bf16.msra.mxu1 %v4259_v21 }
 0x700   : > { %2954 = vmatprep.subr.bf16.mxu1 %v4341_v61 }
 0x702   : > { %3024 = vmatpush1.bf16.msra.mxu0 %v4246_v2 }
 0x703   : > { %3025 = vmatprep.subr.bf16.mxu0 %v4341_v61  ;;  %2955 = vmatpush2.bf16.msra.mxu1 %v4261_v24 }
 0x704   : > { %3139 = vmatprep.subr.bf16.mxu1 %v4341_v61 }
 0x706   : > { %3026 = vmatpush1.bf16.msra.mxu0 %v4248_v6 }
 0x707   : > { %3027 = vmatprep.subr.bf16.mxu0 %v4341_v61 }
 0x70a   : > { %3028 = vmatpush1.bf16.msra.mxu0 %v4250_v9 }
 0x70b   : > { %3029 = vmatprep.subr.bf16.mxu0 %v4341_v61 }
 0x70e   : > { %3030 = vmatpush1.bf16.msra.mxu0 %v4252_v11 }
 0x70f   : > { %3031 = vmatprep.subr.bf16.mxu0 %v4341_v61 }
 0x712   : > { %3032 = vmatpush1.bf16.msra.mxu0 %v4254_v16 }
 0x713   : > { %3033 = vmatprep.subr.bf16.mxu0 %v4341_v61 }
 0x716   : > { %3034 = vmatpush1.bf16.msra.mxu0 %v4256_v18 }
 0x717   : > { %3035 = vmatprep.subr.bf16.mxu0 %v4341_v61 }
 0x71a   : > { %3036 = vmatpush1.bf16.msra.mxu0 %v4258_v7 }
 0x71b   : > { %3051 = vmatprep.subr.bf16.mxu0 %v4341_v61 }
 0x71e   : > { %3052 = vmatpush2.bf16.msra.mxu0 %v4260_v23 }
 0x71f   : > { %4004 = vmatprep.subr.bf16.mxu0 %v4339_v14 }
 0x7a1   : > { %v2674_v25 = vpop.f32.mrf.mxu1 }
 0x7a3   : > { %v2676_v26 = vpop.f32.mrf.mxu1 }
 0x7a5   : > { %v2570_v27 = vpop.f32.mrf.mxu0  ;;  %v2678_v28 = vpop.f32.mrf.mxu1 }
 0x7a6   : > { %v2675_v37 = vadd.f32 %v2674_v25, %v2570_v27  ;;  %v3183_v27 = vld [vmem:[%s5358_s12] sm:$0x1]  ;;  %v4271_v28 = vld [vmem:[%s5359_s13 + $0x28] sm:$0xff]  }
 0x7a7   : > { %v2572_v29 = vpop.f32.mrf.mxu0  ;;  %v2679_v30 = vpop.f32.mrf.mxu1 }
 0x7a8   : > { %v2677_v13 = vadd.f32 %v2676_v26, %v2572_v29  ;;  %v4272_v29 = vld [vmem:[%s5359_s13 + $0x20] sm:$0xff]   ;;  %v4273_v30 = vld [vmem:[%s5359_s13 + $0x18] sm:$0xff]  }
 0x7a9   : > { %v2574_v31 = vpop.f32.mrf.mxu0 }
 0x7aa   : > { %v4274_v31 = vld [vmem:[%s5359_s13 + $0x10] sm:$0xff]  }
 0x7ab   : > { %v2575_v32 = vpop.f32.mrf.mxu0 }
 0x7ac   : > { %v4275_v32 = vld [vmem:[%s5359_s13 + $0x8] sm:$0xff]  }
 0x7bd   : > { %v2792_v39 = vpop.f32.mrf.mxu0 }
 0x7be   : > { %v2799_v20 = vadd.f32 %v2792_v39, %v2675_v37 }
 0x7bf   : > { %v2794_v42 = vpop.f32.mrf.mxu0 }
 0x7c0   : > { %v2814_v15 = vadd.f32 %v2807_v38, %v2799_v20  ;;  %v2800_v44 = vadd.f32 %v2794_v42, %v2677_v13 }
 0x7c1   : > { %v2796_v45 = vpop.f32.mrf.mxu0 }
 0x7c2   : > { %v2816_v46 = vmax.f32 %v2814_v15, 0.0  ;;  %v2815_v47 = vadd.f32 %v2811_v40, %v2800_v44  ;;  %v3782_v40 = vld [vmem:[%s5360_s14] ss:$0 sm:$0xff] }
 0x7c3   : > { %v2797_v48 = vpop.f32.mrf.mxu0 }
 0x7c4   : > { %v2818_v22 = vrot.slane %v2816_v46, 7  ;;  %v2817_v34 = vmax.f32 %v2815_v47, 0.0  ;;  %v2826_v52 = vpack.c.bf16 %v2816_v46, %v2816_v46  ;;  %v2822_v62 = vrot.slane %v2816_v46, 1 }
 0x7c6   : > { %v2819_v49 = vrot.slane %v2817_v34, 7  ;;  %v2823_v50 = vrot.slane %v2817_v34, 1  ;;  %v2827_v51 = vpack.c.bf16 %v2817_v34, %v2817_v34  ;;  %v2820_v1 = vmul.f32 %v5096_v41, %v2818_v22 }
 0x7c7   : > { %v2824_v0 = vmul.f32 %v5133_v58, %v2822_v62 }
 0x7c8   : > { %3752 = vmatprep.mubr.msk.bf16.mxu0 %vm618_vm0, %v2827_v51  ;;  %v2821_v3 = vmul.f32 %v5096_v41, %v2819_v49  ;;  %v2825_v5 = vmul.f32 %v5133_v58, %v2823_v50  ;;  %v2847_v53 = vpack.c.bf16 %v2820_v1, %v2820_v1  ;;  %v4263_v41 = vld [vmem:[%s5357_s11 + $0xc0] sm:$0xff]  }
 0x7c9   : > { %3054 = vmatmul.mubr.bf16.vlgmr.msra.gmra.mxu0 %v2826_v52  ;;  %v3061_v2 = vpack.c.bf16 %v2824_v0, %v2824_v0 }
 0x7ca   : > { %v2848_v35 = vpack.c.bf16 %v2821_v3, %v2821_v3  ;;  %4006 = vmatprep.mubr.msk.bf16.mxu0 %vm4340_vm8, %v4339_v14  ;;  %v3062_v43 = vpack.c.bf16 %v2825_v5, %v2825_v5 }
 0x7cc   : > { %3742 = vmatprep.mubr.msk.bf16.mxu1 %vm618_vm0, %v2848_v35 }
 0x7cd   : > { %2957 = vmatmul.mubr.bf16.vlgmr.msra.gmra.mxu1 %v2847_v53 }
 0x7ce   : > { %3140 = vmatpush1.bf16.msra.mxu1 %v4262_v36  ;;  %3780 = vmatprep.mubr.msk.bf16.mxu1 %vm618_vm0, %v3062_v43  ;;  %vm3189_vm0 = vcmask 1043456  }
 0x7cf   : > { %3141 = vmatprep.subr.bf16.mxu1 %v4341_v61 }
 0x7d2   : > { %3142 = vmatpush1.bf16.msra.mxu1 %v4263_v41 }
 0x7d3   : > { %3143 = vmatprep.subr.bf16.mxu1 %v4341_v61 }
 0x7d6   : > { %3144 = vmatpush1.bf16.msra.mxu1 %v4264_v54 }
 0x7d7   : > { %3145 = vmatprep.subr.bf16.mxu1 %v4341_v61 }
 0x7da   : > { %3146 = vmatpush1.bf16.msra.mxu1 %v4265_v55 }
 0x7db   : > { %3147 = vmatprep.subr.bf16.mxu1 %v4341_v61 }
 0x7de   : > { %3148 = vmatpush1.bf16.msra.mxu1 %v4266_v56 }
 0x7df   : > { %3149 = vmatprep.subr.bf16.mxu1 %v4341_v61 }
 0x7e2   : > { %3150 = vmatpush1.bf16.msra.mxu1 %v4267_v57 }
 0x7e3   : > { %3151 = vmatprep.subr.bf16.mxu1 %v4341_v61 }
 0x7e6   : > { %3152 = vmatpush1.bf16.msra.mxu1 %v4268_v59 }
 0x7e7   : > { %3153 = vmatprep.subr.bf16.mxu1 %v4341_v61 }
 0x7ea   : > { %3154 = vmatpush1.bf16.msra.mxu1 %v4269_v60 }
 0x7eb   : > { %3169 = vmatprep.subr.bf16.mxu1 %v4341_v61 }
 0x7ee   : > { %3170 = vmatpush2.bf16.msra.mxu1 %v4270_v63 }
 0x7f1   : > { %3172 = vmatmul.mubr.bf16.vlgmr.msra.gmra.mxu1 %v3061_v2 }
 0x889   : > { %v3055_v4 = vpop.f32.mrf.mxu0 }
 0x88b   : > { %v3057_v6 = vpop.f32.mrf.mxu0 }
 0x88d   : > { %v2958_v8 = vpop.f32.mrf.mxu1  ;;  %v3058_v9 = vpop.f32.mrf.mxu0 }
 0x88e   : > { %v3056_v17 = vadd.f32 %v3055_v4, %v2958_v8 }
 0x88f   : > { %v2960_v10 = vpop.f32.mrf.mxu1  ;;  %v3059_v11 = vpop.f32.mrf.mxu0 }
 0x891   : > { %v2961_v12 = vpop.f32.mrf.mxu1 }
 0x893   : > { %v2962_v16 = vpop.f32.mrf.mxu1 }
 0x8b1   : > { %v3173_v18 = vpop.f32.mrf.mxu1 }
 0x8b2   : > { %v3179_v61 = vadd.f32 %v3173_v18, %v3056_v17 }
 0x8b3   : > { %v3175_v7 = vpop.f32.mrf.mxu1 }
 0x8b4   : > { %v3181_v58 = vadd.f32 %v3180_v19, %v3179_v61 }
 0x8b5   : > { %v3176_v21 = vpop.f32.mrf.mxu1 }
 0x8b6   : > { %v3182_v23 = vmax.f32 %v3181_v58, 0.0 }
 0x8b7   : > { %v3177_v24 = vpop.f32.mrf.mxu1 }
 0x8b8   : > { %v3184_v25 = vpack.c.bf16 %v3182_v23, %v3182_v23 }
 0x8ba   : > { %v3191_v26 = vsel %vm3189_vm0, %v3184_v25, 0 }
 0x8bb   : > { %4005 = vmatpush3.bf16.msra.mxu0 %v3191_v26 }
 0x8bc   : > { %4010 = vmatprep.subr.bf16.mxu0 %v4339_v14 }
 0x8be   : > { %4007 = vmatmul.mubr.msk.bf16.vlgmr.msra.gmra.mxu0 %vm3185_vm2, %v3183_v27 }
 0x8bf   : > { %4011 = vmatpush3.bf16.msra.mxu0 %v4271_v28  ;;  %4022 = vmatprep.mubr.msk.bf16.mxu0 %vm4340_vm8, %v4339_v14 }
 0x8c0   : > { %4012 = vmatprep.subr.bf16.mxu0 %v4339_v14 }
 0x8c3   : > { %4013 = vmatpush3.bf16.msra.mxu0 %v4272_v29 }
 0x8c4   : > { %4014 = vmatprep.subr.bf16.mxu0 %v4339_v14 }
 0x8c7   : > { %4015 = vmatpush3.bf16.msra.mxu0 %v4273_v30 }
 0x8c8   : > { %4016 = vmatprep.subr.bf16.mxu0 %v4339_v14 }
 0x8cb   : > { %4017 = vmatpush3.bf16.msra.mxu0 %v4274_v31 }
 0x8cc   : > { %4018 = vmatprep.subr.bf16.mxu0 %v4339_v14 }
 0x8cf   : > { %4019 = vmatpush3.bf16.msra.mxu0 %v4275_v32 }
 0x8d0   : > { %4020 = vmatprep.subr.bf16.mxu0 %v4339_v14 }
 0x8d3   : > { %4021 = vmatpush3.bf16.msra.mxu0 %v4276_v33 }
 0x97e   : > { %v3227_v37 = vpop.f32.mrf.mxu0 }
 0x97f   : > { %v3233_v38 = vpack.c.bf16 %v3227_v37, %v3227_v37 }
 0x980   : > { %v4008_v39 = vpop.f32.mrf.mxu0 }
 0x981   : > { %4023 = vmatmul.mubr.msk.bf16.vlgmr.msra.gmra.mxu0 %vm1788_vm14, %v3233_v38 }
 0x982   : > { %v3230_v13 = vpop.f32.mrf.mxu0 }
 0x984   : > { %v4009_v20 = vpop.f32.mrf.mxu0 }
 0xa41   : > { %v3326_v14 = vpop.f32.mrf.mxu0 }
 0xa42   : > { %v3327_v42 = vadd.f32 %v3782_v40, %v3326_v14 }
 0xa43   : > { %v4024_v15 = vpop.f32.mrf.mxu0 }
 0xa44   : > { %3333 = vst.msk [vmem:[%s488_s4] sm:$0x3] %vm3332_vm3, %v3327_v42 }
 0xa45   : > { %v3329_v44 = vpop.f32.mrf.mxu0 }
 0xa46   : > { %4290 = shalt.err (!%p4287_p3)
}
 0xa47   : > { %s4291_s0 = scalar_lea.hbm %s5305_s26, 32  ;;  %s4295_s17 = scalar_lea.hbm %s5361_s15, 64 }
 0xa48   : > { %p4292_p4 = scmp.ne.s32.totalorder %s5305_s26, %s4291_s0  ;;  %p4296_p9 = scmp.lt.s32.totalorder %s5305_s26, %s5361_s15 }
 0xa49   : > { %p4297_p10 = scmp.lt.s32.totalorder %s4295_s17, %s4291_s0 }
 0xa4a   : > { %p4293_p7 = pnand %p4292_p4, %p4461_p5 }
 0xa4b   : > { %p4298_p11 = por %p4297_p10, %p4296_p9 }
 0xa4c   : > { %p4294_p8 = pneg %p4293_p7 }
 0xa4e   : > { %p4299_p12 = pnand %p4298_p11, %p4294_p8 }
 0xa50   : > { %4302 = shalt.err (!%p4299_p12)
}
 0xa51   : > { %4026 = dma.vmem_to_hbm [thread:$0]  (%p4461_p5), %s5307_s27, 32, %s5305_s26, %s3335_s30   ;;  %v4025_v45 = vpop.f32.mrf.mxu0 }
 0xa52 PF: > { %p4032_p13 = scmp.ge.s32.totalorder %s4337_s21, 2  ;;  %s3360_s22 = sand.u32 1, %s4325_s18  }
 0xa53   : > { %s3361_s3 = scalar_lea.sflag [#allocation3], %s3360_s22 }
 0xa54   : > { %p4029_p0 = pnand %p4032_p13, %p4465_p6 }
 0xa56   : > { %p4030_p1 = pneg %p4029_p0 }
 0xa58   : > { %4320 = dma.done.wait (%p4030_p1), %s3361_s3, 32  }
 0xa59   : > { %4322 = vsyncadd (%p4030_p1), %s3361_s3, 4294967264  ;;  %s5373_s28 = sld [smem:[#allocation5_spill]]  ;;  %p25_p2 = scmp.ge.s32.totalorder %s4448_s24, 4  }
 0xa5a   : > { %s5374_s18 = smov %s4329_s19  ;;  %s5375_s19 = smov %s4333_s20 }
 0xa5b   : > { %s5377_s21 = smov %s4448_s24  ;;  %27 = sbr.rel (!%p25_p2) target bundleno = 8 (0x8), region = 131 }
 0xa5f   : > { %s5376_s20 = smov %s5373_s28 }
 0xa60   :  { %3366 = vsyncpa [#allocation3], 1 }
 0xa61   :  { %3368 = vsyncpa [#allocation3 + $0x1], 1 }

</bundles_post_ra>
